<compile_context>
chip_gen: v7x
topology: tpu7x:2x2x1
jax: 0.10.0
libtpu: 0.0.40
codegen_flags: <defaults>
</compile_context>

<pallas_src>
import jax
import jax.numpy as jnp
import numpy as np
from jax.experimental import pallas as pl
from jax.experimental.pallas import tpu as pltpu

INPUT_SIZE = 28
HIDDEN = 50
LAYERS = 5
NUM_CLASSES = 10

H_PAD = 128    # lane-dense hidden width
C_PAD = 128    # lane-dense classifier width
SUBLANE = 8    # f32 sublane count; batch is padded to a multiple of this


def rnn_classifier_kernel(x_ref, w_ih0_ref, w_hh0_ref, w_fused_ref, b_ref,
                          w_fc_ref, b_fc_ref, out_ref):
    """x_ref: (T, Bp, Hp)   w_ih0/w_hh0: (Hp, Hp)   w_fused: (L-1, 2*Hp, Hp)
       b_ref: (L, Bp, Hp)   w_fc: (Hp, Cp)   b_fc: (Bp, Cp)   out: (Bp, Cp)"""
    T, Bp, Hp = x_ref.shape
    L = b_ref.shape[0]

    # ---- prologue: layer-0 input projection for ALL time steps as one big MXU op ----
    x_flat = x_ref[...].reshape(T * Bp, Hp)
    xproj = jnp.dot(x_flat, w_ih0_ref[...],
                    preferred_element_type=jnp.float32).reshape(T, Bp, Hp)

    # Biases loaded once (pre-broadcast in the wrapper) -> plain vadds inside the loop.
    b = b_ref[...]                                        # (L, Bp, Hp)

    # h_0 = 0 for every layer (PyTorch default when no initial hidden state is given).
    hs = [jnp.zeros((Bp, Hp), jnp.float32) for _ in range(L)]

    # ---- fully-unrolled recurrence (T and L are static and small) ----
    for t in range(T):
        # Layer 0: input projection already done in the prologue.
        pre0 = (xproj[t]
                + jnp.dot(hs[0], w_hh0_ref[...], preferred_element_type=jnp.float32)
                + b[0])
        hs[0] = jnp.tanh(pre0)
        # Layers 1..L-1: fused [input ; hidden] matmul -> one dot per layer.
        for l in range(1, L):
            cat = jnp.concatenate([hs[l - 1], hs[l]], axis=-1)        # (Bp, 2*Hp)
            pre = (jnp.dot(cat, w_fused_ref[l - 1],
                           preferred_element_type=jnp.float32) + b[l])
            hs[l] = jnp.tanh(pre)

    # fc(outputs[:, -1, :]) == fc(final hidden state of the top layer)
    out_ref[...] = (jnp.dot(hs[L - 1], w_fc_ref[...],
                            preferred_element_type=jnp.float32) + b_fc_ref[...])


def pack_params(params):
    """One-time weight packing (transpose + zero-pad + stack).  Call once at model load,
    NOT per forward call."""
    # Layer 0: separate input (28->50) and hidden (50->50) projections, padded to 128-wide.
    w_ih, b_ih, w_hh, b_hh = params["rnn"][0]
    w_ih0 = jnp.zeros((H_PAD, H_PAD), jnp.float32).at[:INPUT_SIZE, :HIDDEN].set(w_ih.T)
    w_hh0 = jnp.zeros((H_PAD, H_PAD), jnp.float32).at[:HIDDEN, :HIDDEN].set(w_hh.T)
    biases = [jnp.zeros((H_PAD,), jnp.float32).at[:HIDDEN].set(b_ih + b_hh)]

    # Layers 1..4: fuse [W_ih ; W_hh] so the recurrence does one matmul per layer.
    w_fused = []
    for l in range(1, LAYERS):
        w_ih, b_ih, w_hh, b_hh = params["rnn"][l]
        w = jnp.zeros((2 * H_PAD, H_PAD), jnp.float32)
        w = w.at[:HIDDEN, :HIDDEN].set(w_ih.T)                    # consumes h_{l-1} (this step)
        w = w.at[H_PAD:H_PAD + HIDDEN, :HIDDEN].set(w_hh.T)       # consumes h_l (previous step)
        w_fused.append(w)
        biases.append(jnp.zeros((H_PAD,), jnp.float32).at[:HIDDEN].set(b_ih + b_hh))

    return {
        "w_ih0": w_ih0,
        "w_hh0": w_hh0,
        "w_fused": jnp.stack(w_fused),                            # (L-1, 2*Hp, Hp)
        "bias": jnp.stack(biases),                                # (L, Hp)
        "w_fc": jnp.zeros((H_PAD, C_PAD), jnp.float32)
                  .at[:HIDDEN, :NUM_CLASSES].set(params["fc_w"].T),
        "b_fc": jnp.zeros((C_PAD,), jnp.float32).at[:NUM_CLASSES].set(params["fc_b"]),
    }


@jax.jit
def rnn_classifier_forward(x, packed):
    """x: (B, T, 28) float32 (PyTorch batch_first convention)."""
    B, T, I = x.shape
    Bp = max(SUBLANE, ((B + SUBLANE - 1) // SUBLANE) * SUBLANE)

    # Time-major, zero-padded to (T, Bp, H_PAD) so x_ref[t] is a clean (8k, 128) tile.
    x_tm = jnp.zeros((T, Bp, H_PAD), jnp.float32).at[:, :B, :I].set(
        jnp.transpose(x, (1, 0, 2)))

    # Pre-broadcast biases so the kernel does plain vadds (no in-loop broadcast_in_dim).
    bias = jnp.broadcast_to(packed["bias"][:, None, :], (LAYERS, Bp, H_PAD))
    b_fc = jnp.broadcast_to(packed["b_fc"][None, :], (Bp, C_PAD))

    out = pl.pallas_call(
        rnn_classifier_kernel,
        out_shape=jax.ShapeDtypeStruct((Bp, C_PAD), jnp.float32),
        in_specs=[pl.BlockSpec(memory_space=pltpu.MemorySpace.VMEM)] * 7,
        out_specs=pl.BlockSpec(memory_space=pltpu.MemorySpace.VMEM),
    )(x_tm, packed["w_ih0"], packed["w_hh0"], packed["w_fused"], bias,
      packed["w_fc"], b_fc)

    return out[:B, :NUM_CLASSES]


def init_params(key):
    """PyTorch-style deterministic init: U(-1/sqrt(H), 1/sqrt(H))."""
    k = 1.0 / np.sqrt(HIDDEN)
    params = {"rnn": []}
    for l in range(LAYERS):
        in_dim = INPUT_SIZE if l == 0 else HIDDEN
        key, k1, k2, k3, k4 = jax.random.split(key, 5)
        w_ih = jax.random.uniform(k1, (HIDDEN, in_dim), jnp.float32, -k, k)
        b_ih = jax.random.uniform(k2, (HIDDEN,), jnp.float32, -k, k)
        w_hh = jax.random.uniform(k3, (HIDDEN, HIDDEN), jnp.float32, -k, k)
        b_hh = jax.random.uniform(k4, (HIDDEN,), jnp.float32, -k, k)
        params["rnn"].append((w_ih, b_ih, w_hh, b_hh))
    key, k5, k6 = jax.random.split(key, 3)
    params["fc_w"] = jax.random.uniform(k5, (NUM_CLASSES, HIDDEN), jnp.float32, -k, k)
    params["fc_b"] = jax.random.uniform(k6, (NUM_CLASSES,), jnp.float32, -k, k)
    return params


def reference_forward(x, params):
    """Pure-JAX reference matching PyTorch nn.RNN + Linear semantics."""
    B, T, _ = x.shape
    seq = x
    for l in range(LAYERS):
        w_ih, b_ih, w_hh, b_hh = params["rnn"][l]
        h = jnp.zeros((B, HIDDEN), jnp.float32)
        outs = []
        for t in range(T):
            h = jnp.tanh(seq[:, t, :] @ w_ih.T + b_ih + h @ w_hh.T + b_hh)
            outs.append(h)
        seq = jnp.stack(outs, axis=1)
    return seq[:, -1, :] @ params["fc_w"].T + params["fc_b"]


if __name__ == "__main__":
    key = jax.random.PRNGKey(0)
    key, kx = jax.random.split(key)

    B, T = 2, 8
    x = jax.random.normal(kx, (B, T, INPUT_SIZE), jnp.float32)
    params = init_params(key)
    packed = pack_params(params)          # one-time weight packing (not per call)

    out = rnn_classifier_forward(x, packed)
    out = jax.block_until_ready(out)

    ref = reference_forward(x, params)
    assert out.shape == (B, NUM_CLASSES)
    assert np.allclose(np.asarray(out), np.asarray(ref), atol=1e-4, rtol=1e-4), \
        "Pallas kernel output mismatch vs reference"

    print("KERNEL_OK")
</pallas_src>

<mosaic_0001>
module attributes {stable_mosaic.version = 11 : i64} {
  func.func @rnn_classifier_kernel(%arg0: memref<8x8x128xf32, #tpu.memory_space<vmem>>, %arg1: memref<128x128xf32, #tpu.memory_space<vmem>>, %arg2: memref<128x128xf32, #tpu.memory_space<vmem>>, %arg3: memref<4x256x128xf32, #tpu.memory_space<vmem>>, %arg4: memref<5x8x128xf32, #tpu.memory_space<vmem>>, %arg5: memref<128x128xf32, #tpu.memory_space<vmem>>, %arg6: memref<8x128xf32, #tpu.memory_space<vmem>>, %arg7: memref<8x128xf32, #tpu.memory_space<vmem>>) attributes {dimension_semantics = [], scalar_prefetch = 0 : i64, scratch_operands = 0 : i64, tpu.core_type = #tpu.core_type<tc>} {
    %c0 = arith.constant 0 : index
    %c0_0 = arith.constant 0 : index
    %c0_1 = arith.constant 0 : index
    %0 = vector.load %arg0[%c0, %c0_0, %c0_1] : memref<8x8x128xf32, #tpu.memory_space<vmem>>, vector<8x8x128xf32>
    %1 = vector.shape_cast %0 : vector<8x8x128xf32> to vector<64x128xf32>
    %c0_2 = arith.constant 0 : index
    %c0_3 = arith.constant 0 : index
    %2 = vector.load %arg1[%c0_2, %c0_3] : memref<128x128xf32, #tpu.memory_space<vmem>>, vector<128x128xf32>
    %cst = arith.constant dense<0.000000e+00> : vector<64x128xf32>
    %3 = tpu.matmul %1, %2, %cst {dimension_numbers = #tpu.dot_dimension_numbers<[1], [0], [0], [1], [0, 0, 1, 1], [], []>} : vector<64x128xf32>, vector<128x128xf32>, vector<64x128xf32> -> vector<64x128xf32>
    %4 = vector.shape_cast %3 : vector<64x128xf32> to vector<8x8x128xf32>
    %c0_4 = arith.constant 0 : index
    %c0_5 = arith.constant 0 : index
    %c0_6 = arith.constant 0 : index
    %5 = vector.load %arg4[%c0_4, %c0_5, %c0_6] : memref<5x8x128xf32, #tpu.memory_space<vmem>>, vector<5x8x128xf32>
    %cst_7 = arith.constant 0.000000e+00 : f32
    %6 = vector.broadcast %cst_7 : f32 to vector<8x128xf32>
    %cst_8 = arith.constant 0.000000e+00 : f32
    %7 = vector.broadcast %cst_8 : f32 to vector<8x128xf32>
    %cst_9 = arith.constant 0.000000e+00 : f32
    %8 = vector.broadcast %cst_9 : f32 to vector<8x128xf32>
    %cst_10 = arith.constant 0.000000e+00 : f32
    %9 = vector.broadcast %cst_10 : f32 to vector<8x128xf32>
    %cst_11 = arith.constant 0.000000e+00 : f32
    %10 = vector.broadcast %cst_11 : f32 to vector<8x128xf32>
    %11 = vector.extract_strided_slice %4 {offsets = [0, 0, 0], sizes = [1, 8, 128], strides = [1, 1, 1]} : vector<8x8x128xf32> to vector<1x8x128xf32>
    %12 = vector.shape_cast %11 : vector<1x8x128xf32> to vector<8x128xf32>
    %c0_12 = arith.constant 0 : index
    %c0_13 = arith.constant 0 : index
    %13 = vector.load %arg2[%c0_12, %c0_13] : memref<128x128xf32, #tpu.memory_space<vmem>>, vector<128x128xf32>
    %cst_14 = arith.constant dense<0.000000e+00> : vector<8x128xf32>
    %14 = tpu.matmul %6, %13, %cst_14 {dimension_numbers = #tpu.dot_dimension_numbers<[1], [0], [0], [1], [0, 0, 1, 1], [], []>} : vector<8x128xf32>, vector<128x128xf32>, vector<8x128xf32> -> vector<8x128xf32>
    %15 = arith.addf %12, %14 : vector<8x128xf32>
    %16 = vector.extract_strided_slice %5 {offsets = [0, 0, 0], sizes = [1, 8, 128], strides = [1, 1, 1]} : vector<5x8x128xf32> to vector<1x8x128xf32>
    %17 = vector.shape_cast %16 : vector<1x8x128xf32> to vector<8x128xf32>
    %18 = arith.addf %15, %17 : vector<8x128xf32>
    %19 = math.tanh %18 : vector<8x128xf32>
    %20 = tpu.concatenate %19, %7 in 1 : vector<8x128xf32>, vector<8x128xf32> -> vector<8x256xf32>
    %c0_15 = arith.constant 0 : index
    %c0_16 = arith.constant 0 : index
    %c0_17 = arith.constant 0 : index
    %21 = vector.load %arg3[%c0_15, %c0_16, %c0_17] : memref<4x256x128xf32, #tpu.memory_space<vmem>>, vector<1x256x128xf32>
    %22 = vector.shape_cast %21 : vector<1x256x128xf32> to vector<256x128xf32>
    %cst_18 = arith.constant dense<0.000000e+00> : vector<8x128xf32>
    %23 = tpu.matmul %20, %22, %cst_18 {dimension_numbers = #tpu.dot_dimension_numbers<[1], [0], [0], [1], [0, 0, 1, 1], [], []>} : vector<8x256xf32>, vector<256x128xf32>, vector<8x128xf32> -> vector<8x128xf32>
    %24 = vector.extract_strided_slice %5 {offsets = [1, 0, 0], sizes = [1, 8, 128], strides = [1, 1, 1]} : vector<5x8x128xf32> to vector<1x8x128xf32>
    %25 = vector.shape_cast %24 : vector<1x8x128xf32> to vector<8x128xf32>
    %26 = arith.addf %23, %25 : vector<8x128xf32>
    %27 = math.tanh %26 : vector<8x128xf32>
    %28 = tpu.concatenate %27, %8 in 1 : vector<8x128xf32>, vector<8x128xf32> -> vector<8x256xf32>
    %c1 = arith.constant 1 : index
    %c0_19 = arith.constant 0 : index
    %c0_20 = arith.constant 0 : index
    %29 = vector.load %arg3[%c1, %c0_19, %c0_20] : memref<4x256x128xf32, #tpu.memory_space<vmem>>, vector<1x256x128xf32>
    %30 = vector.shape_cast %29 : vector<1x256x128xf32> to vector<256x128xf32>
    %cst_21 = arith.constant dense<0.000000e+00> : vector<8x128xf32>
    %31 = tpu.matmul %28, %30, %cst_21 {dimension_numbers = #tpu.dot_dimension_numbers<[1], [0], [0], [1], [0, 0, 1, 1], [], []>} : vector<8x256xf32>, vector<256x128xf32>, vector<8x128xf32> -> vector<8x128xf32>
    %32 = vector.extract_strided_slice %5 {offsets = [2, 0, 0], sizes = [1, 8, 128], strides = [1, 1, 1]} : vector<5x8x128xf32> to vector<1x8x128xf32>
    %33 = vector.shape_cast %32 : vector<1x8x128xf32> to vector<8x128xf32>
    %34 = arith.addf %31, %33 : vector<8x128xf32>
    %35 = math.tanh %34 : vector<8x128xf32>
    %36 = tpu.concatenate %35, %9 in 1 : vector<8x128xf32>, vector<8x128xf32> -> vector<8x256xf32>
    %c2 = arith.constant 2 : index
    %c0_22 = arith.constant 0 : index
    %c0_23 = arith.constant 0 : index
    %37 = vector.load %arg3[%c2, %c0_22, %c0_23] : memref<4x256x128xf32, #tpu.memory_space<vmem>>, vector<1x256x128xf32>
    %38 = vector.shape_cast %37 : vector<1x256x128xf32> to vector<256x128xf32>
    %cst_24 = arith.constant dense<0.000000e+00> : vector<8x128xf32>
    %39 = tpu.matmul %36, %38, %cst_24 {dimension_numbers = #tpu.dot_dimension_numbers<[1], [0], [0], [1], [0, 0, 1, 1], [], []>} : vector<8x256xf32>, vector<256x128xf32>, vector<8x128xf32> -> vector<8x128xf32>
    %40 = vector.extract_strided_slice %5 {offsets = [3, 0, 0], sizes = [1, 8, 128], strides = [1, 1, 1]} : vector<5x8x128xf32> to vector<1x8x128xf32>
    %41 = vector.shape_cast %40 : vector<1x8x128xf32> to vector<8x128xf32>
    %42 = arith.addf %39, %41 : vector<8x128xf32>
    %43 = math.tanh %42 : vector<8x128xf32>
    %44 = tpu.concatenate %43, %10 in 1 : vector<8x128xf32>, vector<8x128xf32> -> vector<8x256xf32>
    %c3 = arith.constant 3 : index
    %c0_25 = arith.constant 0 : index
    %c0_26 = arith.constant 0 : index
    %45 = vector.load %arg3[%c3, %c0_25, %c0_26] : memref<4x256x128xf32, #tpu.memory_space<vmem>>, vector<1x256x128xf32>
    %46 = vector.shape_cast %45 : vector<1x256x128xf32> to vector<256x128xf32>
    %cst_27 = arith.constant dense<0.000000e+00> : vector<8x128xf32>
    %47 = tpu.matmul %44, %46, %cst_27 {dimension_numbers = #tpu.dot_dimension_numbers<[1], [0], [0], [1], [0, 0, 1, 1], [], []>} : vector<8x256xf32>, vector<256x128xf32>, vector<8x128xf32> -> vector<8x128xf32>
    %48 = vector.extract_strided_slice %5 {offsets = [4, 0, 0], sizes = [1, 8, 128], strides = [1, 1, 1]} : vector<5x8x128xf32> to vector<1x8x128xf32>
    %49 = vector.shape_cast %48 : vector<1x8x128xf32> to vector<8x128xf32>
    %50 = arith.addf %47, %49 : vector<8x128xf32>
    %51 = math.tanh %50 : vector<8x128xf32>
    %52 = vector.extract_strided_slice %4 {offsets = [1, 0, 0], sizes = [1, 8, 128], strides = [1, 1, 1]} : vector<8x8x128xf32> to vector<1x8x128xf32>
    %53 = vector.shape_cast %52 : vector<1x8x128xf32> to vector<8x128xf32>
    %c0_28 = arith.constant 0 : index
    %c0_29 = arith.constant 0 : index
    %54 = vector.load %arg2[%c0_28, %c0_29] : memref<128x128xf32, #tpu.memory_space<vmem>>, vector<128x128xf32>
    %cst_30 = arith.constant dense<0.000000e+00> : vector<8x128xf32>
    %55 = tpu.matmul %19, %54, %cst_30 {dimension_numbers = #tpu.dot_dimension_numbers<[1], [0], [0], [1], [0, 0, 1, 1], [], []>} : vector<8x128xf32>, vector<128x128xf32>, vector<8x128xf32> -> vector<8x128xf32>
    %56 = arith.addf %53, %55 : vector<8x128xf32>
    %57 = vector.extract_strided_slice %5 {offsets = [0, 0, 0], sizes = [1, 8, 128], strides = [1, 1, 1]} : vector<5x8x128xf32> to vector<1x8x128xf32>
    %58 = vector.shape_cast %57 : vector<1x8x128xf32> to vector<8x128xf32>
    %59 = arith.addf %56, %58 : vector<8x128xf32>
    %60 = math.tanh %59 : vector<8x128xf32>
    %61 = tpu.concatenate %60, %27 in 1 : vector<8x128xf32>, vector<8x128xf32> -> vector<8x256xf32>
    %c0_31 = arith.constant 0 : index
    %c0_32 = arith.constant 0 : index
    %c0_33 = arith.constant 0 : index
    %62 = vector.load %arg3[%c0_31, %c0_32, %c0_33] : memref<4x256x128xf32, #tpu.memory_space<vmem>>, vector<1x256x128xf32>
    %63 = vector.shape_cast %62 : vector<1x256x128xf32> to vector<256x128xf32>
    %cst_34 = arith.constant dense<0.000000e+00> : vector<8x128xf32>
    %64 = tpu.matmul %61, %63, %cst_34 {dimension_numbers = #tpu.dot_dimension_numbers<[1], [0], [0], [1], [0, 0, 1, 1], [], []>} : vector<8x256xf32>, vector<256x128xf32>, vector<8x128xf32> -> vector<8x128xf32>
    %65 = vector.extract_strided_slice %5 {offsets = [1, 0, 0], sizes = [1, 8, 128], strides = [1, 1, 1]} : vector<5x8x128xf32> to vector<1x8x128xf32>
    %66 = vector.shape_cast %65 : vector<1x8x128xf32> to vector<8x128xf32>
    %67 = arith.addf %64, %66 : vector<8x128xf32>
    %68 = math.tanh %67 : vector<8x128xf32>
    %69 = tpu.concatenate %68, %35 in 1 : vector<8x128xf32>, vector<8x128xf32> -> vector<8x256xf32>
    %c1_35 = arith.constant 1 : index
    %c0_36 = arith.constant 0 : index
    %c0_37 = arith.constant 0 : index
    %70 = vector.load %arg3[%c1_35, %c0_36, %c0_37] : memref<4x256x128xf32, #tpu.memory_space<vmem>>, vector<1x256x128xf32>
    %71 = vector.shape_cast %70 : vector<1x256x128xf32> to vector<256x128xf32>
    %cst_38 = arith.constant dense<0.000000e+00> : vector<8x128xf32>
    %72 = tpu.matmul %69, %71, %cst_38 {dimension_numbers = #tpu.dot_dimension_numbers<[1], [0], [0], [1], [0, 0, 1, 1], [], []>} : vector<8x256xf32>, vector<256x128xf32>, vector<8x128xf32> -> vector<8x128xf32>
    %73 = vector.extract_strided_slice %5 {offsets = [2, 0, 0], sizes = [1, 8, 128], strides = [1, 1, 1]} : vector<5x8x128xf32> to vector<1x8x128xf32>
    %74 = vector.shape_cast %73 : vector<1x8x128xf32> to vector<8x128xf32>
    %75 = arith.addf %72, %74 : vector<8x128xf32>
    %76 = math.tanh %75 : vector<8x128xf32>
    %77 = tpu.concatenate %76, %43 in 1 : vector<8x128xf32>, vector<8x128xf32> -> vector<8x256xf32>
    %c2_39 = arith.constant 2 : index
    %c0_40 = arith.constant 0 : index
    %c0_41 = arith.constant 0 : index
    %78 = vector.load %arg3[%c2_39, %c0_40, %c0_41] : memref<4x256x128xf32, #tpu.memory_space<vmem>>, vector<1x256x128xf32>
    %79 = vector.shape_cast %78 : vector<1x256x128xf32> to vector<256x128xf32>
    %cst_42 = arith.constant dense<0.000000e+00> : vector<8x128xf32>
    %80 = tpu.matmul %77, %79, %cst_42 {dimension_numbers = #tpu.dot_dimension_numbers<[1], [0], [0], [1], [0, 0, 1, 1], [], []>} : vector<8x256xf32>, vector<256x128xf32>, vector<8x128xf32> -> vector<8x128xf32>
    %81 = vector.extract_strided_slice %5 {offsets = [3, 0, 0], sizes = [1, 8, 128], strides = [1, 1, 1]} : vector<5x8x128xf32> to vector<1x8x128xf32>
    %82 = vector.shape_cast %81 : vector<1x8x128xf32> to vector<8x128xf32>
    %83 = arith.addf %80, %82 : vector<8x128xf32>
    %84 = math.tanh %83 : vector<8x128xf32>
    %85 = tpu.concatenate %84, %51 in 1 : vector<8x128xf32>, vector<8x128xf32> -> vector<8x256xf32>
    %c3_43 = arith.constant 3 : index
    %c0_44 = arith.constant 0 : index
    %c0_45 = arith.constant 0 : index
    %86 = vector.load %arg3[%c3_43, %c0_44, %c0_45] : memref<4x256x128xf32, #tpu.memory_space<vmem>>, vector<1x256x128xf32>
    %87 = vector.shape_cast %86 : vector<1x256x128xf32> to vector<256x128xf32>
    %cst_46 = arith.constant dense<0.000000e+00> : vector<8x128xf32>
    %88 = tpu.matmul %85, %87, %cst_46 {dimension_numbers = #tpu.dot_dimension_numbers<[1], [0], [0], [1], [0, 0, 1, 1], [], []>} : vector<8x256xf32>, vector<256x128xf32>, vector<8x128xf32> -> vector<8x128xf32>
    %89 = vector.extract_strided_slice %5 {offsets = [4, 0, 0], sizes = [1, 8, 128], strides = [1, 1, 1]} : vector<5x8x128xf32> to vector<1x8x128xf32>
    %90 = vector.shape_cast %89 : vector<1x8x128xf32> to vector<8x128xf32>
    %91 = arith.addf %88, %90 : vector<8x128xf32>
    %92 = math.tanh %91 : vector<8x128xf32>
    %93 = vector.extract_strided_slice %4 {offsets = [2, 0, 0], sizes = [1, 8, 128], strides = [1, 1, 1]} : vector<8x8x128xf32> to vector<1x8x128xf32>
    %94 = vector.shape_cast %93 : vector<1x8x128xf32> to vector<8x128xf32>
    %c0_47 = arith.constant 0 : index
    %c0_48 = arith.constant 0 : index
    %95 = vector.load %arg2[%c0_47, %c0_48] : memref<128x128xf32, #tpu.memory_space<vmem>>, vector<128x128xf32>
    %cst_49 = arith.constant dense<0.000000e+00> : vector<8x128xf32>
    %96 = tpu.matmul %60, %95, %cst_49 {dimension_numbers = #tpu.dot_dimension_numbers<[1], [0], [0], [1], [0, 0, 1, 1], [], []>} : vector<8x128xf32>, vector<128x128xf32>, vector<8x128xf32> -> vector<8x128xf32>
    %97 = arith.addf %94, %96 : vector<8x128xf32>
    %98 = vector.extract_strided_slice %5 {offsets = [0, 0, 0], sizes = [1, 8, 128], strides = [1, 1, 1]} : vector<5x8x128xf32> to vector<1x8x128xf32>
    %99 = vector.shape_cast %98 : vector<1x8x128xf32> to vector<8x128xf32>
    %100 = arith.addf %97, %99 : vector<8x128xf32>
    %101 = math.tanh %100 : vector<8x128xf32>
    %102 = tpu.concatenate %101, %68 in 1 : vector<8x128xf32>, vector<8x128xf32> -> vector<8x256xf32>
    %c0_50 = arith.constant 0 : index
    %c0_51 = arith.constant 0 : index
    %c0_52 = arith.constant 0 : index
    %103 = vector.load %arg3[%c0_50, %c0_51, %c0_52] : memref<4x256x128xf32, #tpu.memory_space<vmem>>, vector<1x256x128xf32>
    %104 = vector.shape_cast %103 : vector<1x256x128xf32> to vector<256x128xf32>
    %cst_53 = arith.constant dense<0.000000e+00> : vector<8x128xf32>
    %105 = tpu.matmul %102, %104, %cst_53 {dimension_numbers = #tpu.dot_dimension_numbers<[1], [0], [0], [1], [0, 0, 1, 1], [], []>} : vector<8x256xf32>, vector<256x128xf32>, vector<8x128xf32> -> vector<8x128xf32>
    %106 = vector.extract_strided_slice %5 {offsets = [1, 0, 0], sizes = [1, 8, 128], strides = [1, 1, 1]} : vector<5x8x128xf32> to vector<1x8x128xf32>
    %107 = vector.shape_cast %106 : vector<1x8x128xf32> to vector<8x128xf32>
    %108 = arith.addf %105, %107 : vector<8x128xf32>
    %109 = math.tanh %108 : vector<8x128xf32>
    %110 = tpu.concatenate %109, %76 in 1 : vector<8x128xf32>, vector<8x128xf32> -> vector<8x256xf32>
    %c1_54 = arith.constant 1 : index
    %c0_55 = arith.constant 0 : index
    %c0_56 = arith.constant 0 : index
    %111 = vector.load %arg3[%c1_54, %c0_55, %c0_56] : memref<4x256x128xf32, #tpu.memory_space<vmem>>, vector<1x256x128xf32>
    %112 = vector.shape_cast %111 : vector<1x256x128xf32> to vector<256x128xf32>
    %cst_57 = arith.constant dense<0.000000e+00> : vector<8x128xf32>
    %113 = tpu.matmul %110, %112, %cst_57 {dimension_numbers = #tpu.dot_dimension_numbers<[1], [0], [0], [1], [0, 0, 1, 1], [], []>} : vector<8x256xf32>, vector<256x128xf32>, vector<8x128xf32> -> vector<8x128xf32>
    %114 = vector.extract_strided_slice %5 {offsets = [2, 0, 0], sizes = [1, 8, 128], strides = [1, 1, 1]} : vector<5x8x128xf32> to vector<1x8x128xf32>
    %115 = vector.shape_cast %114 : vector<1x8x128xf32> to vector<8x128xf32>
    %116 = arith.addf %113, %115 : vector<8x128xf32>
    %117 = math.tanh %116 : vector<8x128xf32>
    %118 = tpu.concatenate %117, %84 in 1 : vector<8x128xf32>, vector<8x128xf32> -> vector<8x256xf32>
    %c2_58 = arith.constant 2 : index
    %c0_59 = arith.constant 0 : index
    %c0_60 = arith.constant 0 : index
    %119 = vector.load %arg3[%c2_58, %c0_59, %c0_60] : memref<4x256x128xf32, #tpu.memory_space<vmem>>, vector<1x256x128xf32>
    %120 = vector.shape_cast %119 : vector<1x256x128xf32> to vector<256x128xf32>
    %cst_61 = arith.constant dense<0.000000e+00> : vector<8x128xf32>
    %121 = tpu.matmul %118, %120, %cst_61 {dimension_numbers = #tpu.dot_dimension_numbers<[1], [0], [0], [1], [0, 0, 1, 1], [], []>} : vector<8x256xf32>, vector<256x128xf32>, vector<8x128xf32> -> vector<8x128xf32>
    %122 = vector.extract_strided_slice %5 {offsets = [3, 0, 0], sizes = [1, 8, 128], strides = [1, 1, 1]} : vector<5x8x128xf32> to vector<1x8x128xf32>
    %123 = vector.shape_cast %122 : vector<1x8x128xf32> to vector<8x128xf32>
    %124 = arith.addf %121, %123 : vector<8x128xf32>
    %125 = math.tanh %124 : vector<8x128xf32>
    %126 = tpu.concatenate %125, %92 in 1 : vector<8x128xf32>, vector<8x128xf32> -> vector<8x256xf32>
    %c3_62 = arith.constant 3 : index
    %c0_63 = arith.constant 0 : index
    %c0_64 = arith.constant 0 : index
    %127 = vector.load %arg3[%c3_62, %c0_63, %c0_64] : memref<4x256x128xf32, #tpu.memory_space<vmem>>, vector<1x256x128xf32>
    %128 = vector.shape_cast %127 : vector<1x256x128xf32> to vector<256x128xf32>
    %cst_65 = arith.constant dense<0.000000e+00> : vector<8x128xf32>
    %129 = tpu.matmul %126, %128, %cst_65 {dimension_numbers = #tpu.dot_dimension_numbers<[1], [0], [0], [1], [0, 0, 1, 1], [], []>} : vector<8x256xf32>, vector<256x128xf32>, vector<8x128xf32> -> vector<8x128xf32>
    %130 = vector.extract_strided_slice %5 {offsets = [4, 0, 0], sizes = [1, 8, 128], strides = [1, 1, 1]} : vector<5x8x128xf32> to vector<1x8x128xf32>
    %131 = vector.shape_cast %130 : vector<1x8x128xf32> to vector<8x128xf32>
    %132 = arith.addf %129, %131 : vector<8x128xf32>
    %133 = math.tanh %132 : vector<8x128xf32>
    %134 = vector.extract_strided_slice %4 {offsets = [3, 0, 0], sizes = [1, 8, 128], strides = [1, 1, 1]} : vector<8x8x128xf32> to vector<1x8x128xf32>
    %135 = vector.shape_cast %134 : vector<1x8x128xf32> to vector<8x128xf32>
    %c0_66 = arith.constant 0 : index
    %c0_67 = arith.constant 0 : index
    %136 = vector.load %arg2[%c0_66, %c0_67] : memref<128x128xf32, #tpu.memory_space<vmem>>, vector<128x128xf32>
    %cst_68 = arith.constant dense<0.000000e+00> : vector<8x128xf32>
    %137 = tpu.matmul %101, %136, %cst_68 {dimension_numbers = #tpu.dot_dimension_numbers<[1], [0], [0], [1], [0, 0, 1, 1], [], []>} : vector<8x128xf32>, vector<128x128xf32>, vector<8x128xf32> -> vector<8x128xf32>
    %138 = arith.addf %135, %137 : vector<8x128xf32>
    %139 = vector.extract_strided_slice %5 {offsets = [0, 0, 0], sizes = [1, 8, 128], strides = [1, 1, 1]} : vector<5x8x128xf32> to vector<1x8x128xf32>
    %140 = vector.shape_cast %139 : vector<1x8x128xf32> to vector<8x128xf32>
    %141 = arith.addf %138, %140 : vector<8x128xf32>
    %142 = math.tanh %141 : vector<8x128xf32>
    %143 = tpu.concatenate %142, %109 in 1 : vector<8x128xf32>, vector<8x128xf32> -> vector<8x256xf32>
    %c0_69 = arith.constant 0 : index
    %c0_70 = arith.constant 0 : index
    %c0_71 = arith.constant 0 : index
    %144 = vector.load %arg3[%c0_69, %c0_70, %c0_71] : memref<4x256x128xf32, #tpu.memory_space<vmem>>, vector<1x256x128xf32>
    %145 = vector.shape_cast %144 : vector<1x256x128xf32> to vector<256x128xf32>
    %cst_72 = arith.constant dense<0.000000e+00> : vector<8x128xf32>
    %146 = tpu.matmul %143, %145, %cst_72 {dimension_numbers = #tpu.dot_dimension_numbers<[1], [0], [0], [1], [0, 0, 1, 1], [], []>} : vector<8x256xf32>, vector<256x128xf32>, vector<8x128xf32> -> vector<8x128xf32>
    %147 = vector.extract_strided_slice %5 {offsets = [1, 0, 0], sizes = [1, 8, 128], strides = [1, 1, 1]} : vector<5x8x128xf32> to vector<1x8x128xf32>
    %148 = vector.shape_cast %147 : vector<1x8x128xf32> to vector<8x128xf32>
    %149 = arith.addf %146, %148 : vector<8x128xf32>
    %150 = math.tanh %149 : vector<8x128xf32>
    %151 = tpu.concatenate %150, %117 in 1 : vector<8x128xf32>, vector<8x128xf32> -> vector<8x256xf32>
    %c1_73 = arith.constant 1 : index
    %c0_74 = arith.constant 0 : index
    %c0_75 = arith.constant 0 : index
    %152 = vector.load %arg3[%c1_73, %c0_74, %c0_75] : memref<4x256x128xf32, #tpu.memory_space<vmem>>, vector<1x256x128xf32>
    %153 = vector.shape_cast %152 : vector<1x256x128xf32> to vector<256x128xf32>
    %cst_76 = arith.constant dense<0.000000e+00> : vector<8x128xf32>
    %154 = tpu.matmul %151, %153, %cst_76 {dimension_numbers = #tpu.dot_dimension_numbers<[1], [0], [0], [1], [0, 0, 1, 1], [], []>} : vector<8x256xf32>, vector<256x128xf32>, vector<8x128xf32> -> vector<8x128xf32>
    %155 = vector.extract_strided_slice %5 {offsets = [2, 0, 0], sizes = [1, 8, 128], strides = [1, 1, 1]} : vector<5x8x128xf32> to vector<1x8x128xf32>
    %156 = vector.shape_cast %155 : vector<1x8x128xf32> to vector<8x128xf32>
    %157 = arith.addf %154, %156 : vector<8x128xf32>
    %158 = math.tanh %157 : vector<8x128xf32>
    %159 = tpu.concatenate %158, %125 in 1 : vector<8x128xf32>, vector<8x128xf32> -> vector<8x256xf32>
    %c2_77 = arith.constant 2 : index
    %c0_78 = arith.constant 0 : index
    %c0_79 = arith.constant 0 : index
    %160 = vector.load %arg3[%c2_77, %c0_78, %c0_79] : memref<4x256x128xf32, #tpu.memory_space<vmem>>, vector<1x256x128xf32>
    %161 = vector.shape_cast %160 : vector<1x256x128xf32> to vector<256x128xf32>
    %cst_80 = arith.constant dense<0.000000e+00> : vector<8x128xf32>
    %162 = tpu.matmul %159, %161, %cst_80 {dimension_numbers = #tpu.dot_dimension_numbers<[1], [0], [0], [1], [0, 0, 1, 1], [], []>} : vector<8x256xf32>, vector<256x128xf32>, vector<8x128xf32> -> vector<8x128xf32>
    %163 = vector.extract_strided_slice %5 {offsets = [3, 0, 0], sizes = [1, 8, 128], strides = [1, 1, 1]} : vector<5x8x128xf32> to vector<1x8x128xf32>
    %164 = vector.shape_cast %163 : vector<1x8x128xf32> to vector<8x128xf32>
    %165 = arith.addf %162, %164 : vector<8x128xf32>
    %166 = math.tanh %165 : vector<8x128xf32>
    %167 = tpu.concatenate %166, %133 in 1 : vector<8x128xf32>, vector<8x128xf32> -> vector<8x256xf32>
    %c3_81 = arith.constant 3 : index
    %c0_82 = arith.constant 0 : index
    %c0_83 = arith.constant 0 : index
    %168 = vector.load %arg3[%c3_81, %c0_82, %c0_83] : memref<4x256x128xf32, #tpu.memory_space<vmem>>, vector<1x256x128xf32>
    %169 = vector.shape_cast %168 : vector<1x256x128xf32> to vector<256x128xf32>
    %cst_84 = arith.constant dense<0.000000e+00> : vector<8x128xf32>
    %170 = tpu.matmul %167, %169, %cst_84 {dimension_numbers = #tpu.dot_dimension_numbers<[1], [0], [0], [1], [0, 0, 1, 1], [], []>} : vector<8x256xf32>, vector<256x128xf32>, vector<8x128xf32> -> vector<8x128xf32>
    %171 = vector.extract_strided_slice %5 {offsets = [4, 0, 0], sizes = [1, 8, 128], strides = [1, 1, 1]} : vector<5x8x128xf32> to vector<1x8x128xf32>
    %172 = vector.shape_cast %171 : vector<1x8x128xf32> to vector<8x128xf32>
    %173 = arith.addf %170, %172 : vector<8x128xf32>
    %174 = math.tanh %173 : vector<8x128xf32>
    %175 = vector.extract_strided_slice %4 {offsets = [4, 0, 0], sizes = [1, 8, 128], strides = [1, 1, 1]} : vector<8x8x128xf32> to vector<1x8x128xf32>
    %176 = vector.shape_cast %175 : vector<1x8x128xf32> to vector<8x128xf32>
    %c0_85 = arith.constant 0 : index
    %c0_86 = arith.constant 0 : index
    %177 = vector.load %arg2[%c0_85, %c0_86] : memref<128x128xf32, #tpu.memory_space<vmem>>, vector<128x128xf32>
    %cst_87 = arith.constant dense<0.000000e+00> : vector<8x128xf32>
    %178 = tpu.matmul %142, %177, %cst_87 {dimension_numbers = #tpu.dot_dimension_numbers<[1], [0], [0], [1], [0, 0, 1, 1], [], []>} : vector<8x128xf32>, vector<128x128xf32>, vector<8x128xf32> -> vector<8x128xf32>
    %179 = arith.addf %176, %178 : vector<8x128xf32>
    %180 = vector.extract_strided_slice %5 {offsets = [0, 0, 0], sizes = [1, 8, 128], strides = [1, 1, 1]} : vector<5x8x128xf32> to vector<1x8x128xf32>
    %181 = vector.shape_cast %180 : vector<1x8x128xf32> to vector<8x128xf32>
    %182 = arith.addf %179, %181 : vector<8x128xf32>
    %183 = math.tanh %182 : vector<8x128xf32>
    %184 = tpu.concatenate %183, %150 in 1 : vector<8x128xf32>, vector<8x128xf32> -> vector<8x256xf32>
    %c0_88 = arith.constant 0 : index
    %c0_89 = arith.constant 0 : index
    %c0_90 = arith.constant 0 : index
    %185 = vector.load %arg3[%c0_88, %c0_89, %c0_90] : memref<4x256x128xf32, #tpu.memory_space<vmem>>, vector<1x256x128xf32>
    %186 = vector.shape_cast %185 : vector<1x256x128xf32> to vector<256x128xf32>
    %cst_91 = arith.constant dense<0.000000e+00> : vector<8x128xf32>
    %187 = tpu.matmul %184, %186, %cst_91 {dimension_numbers = #tpu.dot_dimension_numbers<[1], [0], [0], [1], [0, 0, 1, 1], [], []>} : vector<8x256xf32>, vector<256x128xf32>, vector<8x128xf32> -> vector<8x128xf32>
    %188 = vector.extract_strided_slice %5 {offsets = [1, 0, 0], sizes = [1, 8, 128], strides = [1, 1, 1]} : vector<5x8x128xf32> to vector<1x8x128xf32>
    %189 = vector.shape_cast %188 : vector<1x8x128xf32> to vector<8x128xf32>
    %190 = arith.addf %187, %189 : vector<8x128xf32>
    %191 = math.tanh %190 : vector<8x128xf32>
    %192 = tpu.concatenate %191, %158 in 1 : vector<8x128xf32>, vector<8x128xf32> -> vector<8x256xf32>
    %c1_92 = arith.constant 1 : index
    %c0_93 = arith.constant 0 : index
    %c0_94 = arith.constant 0 : index
    %193 = vector.load %arg3[%c1_92, %c0_93, %c0_94] : memref<4x256x128xf32, #tpu.memory_space<vmem>>, vector<1x256x128xf32>
    %194 = vector.shape_cast %193 : vector<1x256x128xf32> to vector<256x128xf32>
    %cst_95 = arith.constant dense<0.000000e+00> : vector<8x128xf32>
    %195 = tpu.matmul %192, %194, %cst_95 {dimension_numbers = #tpu.dot_dimension_numbers<[1], [0], [0], [1], [0, 0, 1, 1], [], []>} : vector<8x256xf32>, vector<256x128xf32>, vector<8x128xf32> -> vector<8x128xf32>
    %196 = vector.extract_strided_slice %5 {offsets = [2, 0, 0], sizes = [1, 8, 128], strides = [1, 1, 1]} : vector<5x8x128xf32> to vector<1x8x128xf32>
    %197 = vector.shape_cast %196 : vector<1x8x128xf32> to vector<8x128xf32>
    %198 = arith.addf %195, %197 : vector<8x128xf32>
    %199 = math.tanh %198 : vector<8x128xf32>
    %200 = tpu.concatenate %199, %166 in 1 : vector<8x128xf32>, vector<8x128xf32> -> vector<8x256xf32>
    %c2_96 = arith.constant 2 : index
    %c0_97 = arith.constant 0 : index
    %c0_98 = arith.constant 0 : index
    %201 = vector.load %arg3[%c2_96, %c0_97, %c0_98] : memref<4x256x128xf32, #tpu.memory_space<vmem>>, vector<1x256x128xf32>
    %202 = vector.shape_cast %201 : vector<1x256x128xf32> to vector<256x128xf32>
    %cst_99 = arith.constant dense<0.000000e+00> : vector<8x128xf32>
    %203 = tpu.matmul %200, %202, %cst_99 {dimension_numbers = #tpu.dot_dimension_numbers<[1], [0], [0], [1], [0, 0, 1, 1], [], []>} : vector<8x256xf32>, vector<256x128xf32>, vector<8x128xf32> -> vector<8x128xf32>
    %204 = vector.extract_strided_slice %5 {offsets = [3, 0, 0], sizes = [1, 8, 128], strides = [1, 1, 1]} : vector<5x8x128xf32> to vector<1x8x128xf32>
    %205 = vector.shape_cast %204 : vector<1x8x128xf32> to vector<8x128xf32>
    %206 = arith.addf %203, %205 : vector<8x128xf32>
    %207 = math.tanh %206 : vector<8x128xf32>
    %208 = tpu.concatenate %207, %174 in 1 : vector<8x128xf32>, vector<8x128xf32> -> vector<8x256xf32>
    %c3_100 = arith.constant 3 : index
    %c0_101 = arith.constant 0 : index
    %c0_102 = arith.constant 0 : index
    %209 = vector.load %arg3[%c3_100, %c0_101, %c0_102] : memref<4x256x128xf32, #tpu.memory_space<vmem>>, vector<1x256x128xf32>
    %210 = vector.shape_cast %209 : vector<1x256x128xf32> to vector<256x128xf32>
    %cst_103 = arith.constant dense<0.000000e+00> : vector<8x128xf32>
    %211 = tpu.matmul %208, %210, %cst_103 {dimension_numbers = #tpu.dot_dimension_numbers<[1], [0], [0], [1], [0, 0, 1, 1], [], []>} : vector<8x256xf32>, vector<256x128xf32>, vector<8x128xf32> -> vector<8x128xf32>
    %212 = vector.extract_strided_slice %5 {offsets = [4, 0, 0], sizes = [1, 8, 128], strides = [1, 1, 1]} : vector<5x8x128xf32> to vector<1x8x128xf32>
    %213 = vector.shape_cast %212 : vector<1x8x128xf32> to vector<8x128xf32>
    %214 = arith.addf %211, %213 : vector<8x128xf32>
    %215 = math.tanh %214 : vector<8x128xf32>
    %216 = vector.extract_strided_slice %4 {offsets = [5, 0, 0], sizes = [1, 8, 128], strides = [1, 1, 1]} : vector<8x8x128xf32> to vector<1x8x128xf32>
    %217 = vector.shape_cast %216 : vector<1x8x128xf32> to vector<8x128xf32>
    %c0_104 = arith.constant 0 : index
    %c0_105 = arith.constant 0 : index
    %218 = vector.load %arg2[%c0_104, %c0_105] : memref<128x128xf32, #tpu.memory_space<vmem>>, vector<128x128xf32>
    %cst_106 = arith.constant dense<0.000000e+00> : vector<8x128xf32>
    %219 = tpu.matmul %183, %218, %cst_106 {dimension_numbers = #tpu.dot_dimension_numbers<[1], [0], [0], [1], [0, 0, 1, 1], [], []>} : vector<8x128xf32>, vector<128x128xf32>, vector<8x128xf32> -> vector<8x128xf32>
    %220 = arith.addf %217, %219 : vector<8x128xf32>
    %221 = vector.extract_strided_slice %5 {offsets = [0, 0, 0], sizes = [1, 8, 128], strides = [1, 1, 1]} : vector<5x8x128xf32> to vector<1x8x128xf32>
    %222 = vector.shape_cast %221 : vector<1x8x128xf32> to vector<8x128xf32>
    %223 = arith.addf %220, %222 : vector<8x128xf32>
    %224 = math.tanh %223 : vector<8x128xf32>
    %225 = tpu.concatenate %224, %191 in 1 : vector<8x128xf32>, vector<8x128xf32> -> vector<8x256xf32>
    %c0_107 = arith.constant 0 : index
    %c0_108 = arith.constant 0 : index
    %c0_109 = arith.constant 0 : index
    %226 = vector.load %arg3[%c0_107, %c0_108, %c0_109] : memref<4x256x128xf32, #tpu.memory_space<vmem>>, vector<1x256x128xf32>
    %227 = vector.shape_cast %226 : vector<1x256x128xf32> to vector<256x128xf32>
    %cst_110 = arith.constant dense<0.000000e+00> : vector<8x128xf32>
    %228 = tpu.matmul %225, %227, %cst_110 {dimension_numbers = #tpu.dot_dimension_numbers<[1], [0], [0], [1], [0, 0, 1, 1], [], []>} : vector<8x256xf32>, vector<256x128xf32>, vector<8x128xf32> -> vector<8x128xf32>
    %229 = vector.extract_strided_slice %5 {offsets = [1, 0, 0], sizes = [1, 8, 128], strides = [1, 1, 1]} : vector<5x8x128xf32> to vector<1x8x128xf32>
    %230 = vector.shape_cast %229 : vector<1x8x128xf32> to vector<8x128xf32>
    %231 = arith.addf %228, %230 : vector<8x128xf32>
    %232 = math.tanh %231 : vector<8x128xf32>
    %233 = tpu.concatenate %232, %199 in 1 : vector<8x128xf32>, vector<8x128xf32> -> vector<8x256xf32>
    %c1_111 = arith.constant 1 : index
    %c0_112 = arith.constant 0 : index
    %c0_113 = arith.constant 0 : index
    %234 = vector.load %arg3[%c1_111, %c0_112, %c0_113] : memref<4x256x128xf32, #tpu.memory_space<vmem>>, vector<1x256x128xf32>
    %235 = vector.shape_cast %234 : vector<1x256x128xf32> to vector<256x128xf32>
    %cst_114 = arith.constant dense<0.000000e+00> : vector<8x128xf32>
    %236 = tpu.matmul %233, %235, %cst_114 {dimension_numbers = #tpu.dot_dimension_numbers<[1], [0], [0], [1], [0, 0, 1, 1], [], []>} : vector<8x256xf32>, vector<256x128xf32>, vector<8x128xf32> -> vector<8x128xf32>
    %237 = vector.extract_strided_slice %5 {offsets = [2, 0, 0], sizes = [1, 8, 128], strides = [1, 1, 1]} : vector<5x8x128xf32> to vector<1x8x128xf32>
    %238 = vector.shape_cast %237 : vector<1x8x128xf32> to vector<8x128xf32>
    %239 = arith.addf %236, %238 : vector<8x128xf32>
    %240 = math.tanh %239 : vector<8x128xf32>
    %241 = tpu.concatenate %240, %207 in 1 : vector<8x128xf32>, vector<8x128xf32> -> vector<8x256xf32>
    %c2_115 = arith.constant 2 : index
    %c0_116 = arith.constant 0 : index
    %c0_117 = arith.constant 0 : index
    %242 = vector.load %arg3[%c2_115, %c0_116, %c0_117] : memref<4x256x128xf32, #tpu.memory_space<vmem>>, vector<1x256x128xf32>
    %243 = vector.shape_cast %242 : vector<1x256x128xf32> to vector<256x128xf32>
    %cst_118 = arith.constant dense<0.000000e+00> : vector<8x128xf32>
    %244 = tpu.matmul %241, %243, %cst_118 {dimension_numbers = #tpu.dot_dimension_numbers<[1], [0], [0], [1], [0, 0, 1, 1], [], []>} : vector<8x256xf32>, vector<256x128xf32>, vector<8x128xf32> -> vector<8x128xf32>
    %245 = vector.extract_strided_slice %5 {offsets = [3, 0, 0], sizes = [1, 8, 128], strides = [1, 1, 1]} : vector<5x8x128xf32> to vector<1x8x128xf32>
    %246 = vector.shape_cast %245 : vector<1x8x128xf32> to vector<8x128xf32>
    %247 = arith.addf %244, %246 : vector<8x128xf32>
    %248 = math.tanh %247 : vector<8x128xf32>
    %249 = tpu.concatenate %248, %215 in 1 : vector<8x128xf32>, vector<8x128xf32> -> vector<8x256xf32>
    %c3_119 = arith.constant 3 : index
    %c0_120 = arith.constant 0 : index
    %c0_121 = arith.constant 0 : index
    %250 = vector.load %arg3[%c3_119, %c0_120, %c0_121] : memref<4x256x128xf32, #tpu.memory_space<vmem>>, vector<1x256x128xf32>
    %251 = vector.shape_cast %250 : vector<1x256x128xf32> to vector<256x128xf32>
    %cst_122 = arith.constant dense<0.000000e+00> : vector<8x128xf32>
    %252 = tpu.matmul %249, %251, %cst_122 {dimension_numbers = #tpu.dot_dimension_numbers<[1], [0], [0], [1], [0, 0, 1, 1], [], []>} : vector<8x256xf32>, vector<256x128xf32>, vector<8x128xf32> -> vector<8x128xf32>
    %253 = vector.extract_strided_slice %5 {offsets = [4, 0, 0], sizes = [1, 8, 128], strides = [1, 1, 1]} : vector<5x8x128xf32> to vector<1x8x128xf32>
    %254 = vector.shape_cast %253 : vector<1x8x128xf32> to vector<8x128xf32>
    %255 = arith.addf %252, %254 : vector<8x128xf32>
    %256 = math.tanh %255 : vector<8x128xf32>
    %257 = vector.extract_strided_slice %4 {offsets = [6, 0, 0], sizes = [1, 8, 128], strides = [1, 1, 1]} : vector<8x8x128xf32> to vector<1x8x128xf32>
    %258 = vector.shape_cast %257 : vector<1x8x128xf32> to vector<8x128xf32>
    %c0_123 = arith.constant 0 : index
    %c0_124 = arith.constant 0 : index
    %259 = vector.load %arg2[%c0_123, %c0_124] : memref<128x128xf32, #tpu.memory_space<vmem>>, vector<128x128xf32>
    %cst_125 = arith.constant dense<0.000000e+00> : vector<8x128xf32>
    %260 = tpu.matmul %224, %259, %cst_125 {dimension_numbers = #tpu.dot_dimension_numbers<[1], [0], [0], [1], [0, 0, 1, 1], [], []>} : vector<8x128xf32>, vector<128x128xf32>, vector<8x128xf32> -> vector<8x128xf32>
    %261 = arith.addf %258, %260 : vector<8x128xf32>
    %262 = vector.extract_strided_slice %5 {offsets = [0, 0, 0], sizes = [1, 8, 128], strides = [1, 1, 1]} : vector<5x8x128xf32> to vector<1x8x128xf32>
    %263 = vector.shape_cast %262 : vector<1x8x128xf32> to vector<8x128xf32>
    %264 = arith.addf %261, %263 : vector<8x128xf32>
    %265 = math.tanh %264 : vector<8x128xf32>
    %266 = tpu.concatenate %265, %232 in 1 : vector<8x128xf32>, vector<8x128xf32> -> vector<8x256xf32>
    %c0_126 = arith.constant 0 : index
    %c0_127 = arith.constant 0 : index
    %c0_128 = arith.constant 0 : index
    %267 = vector.load %arg3[%c0_126, %c0_127, %c0_128] : memref<4x256x128xf32, #tpu.memory_space<vmem>>, vector<1x256x128xf32>
    %268 = vector.shape_cast %267 : vector<1x256x128xf32> to vector<256x128xf32>
    %cst_129 = arith.constant dense<0.000000e+00> : vector<8x128xf32>
    %269 = tpu.matmul %266, %268, %cst_129 {dimension_numbers = #tpu.dot_dimension_numbers<[1], [0], [0], [1], [0, 0, 1, 1], [], []>} : vector<8x256xf32>, vector<256x128xf32>, vector<8x128xf32> -> vector<8x128xf32>
    %270 = vector.extract_strided_slice %5 {offsets = [1, 0, 0], sizes = [1, 8, 128], strides = [1, 1, 1]} : vector<5x8x128xf32> to vector<1x8x128xf32>
    %271 = vector.shape_cast %270 : vector<1x8x128xf32> to vector<8x128xf32>
    %272 = arith.addf %269, %271 : vector<8x128xf32>
    %273 = math.tanh %272 : vector<8x128xf32>
    %274 = tpu.concatenate %273, %240 in 1 : vector<8x128xf32>, vector<8x128xf32> -> vector<8x256xf32>
    %c1_130 = arith.constant 1 : index
    %c0_131 = arith.constant 0 : index
    %c0_132 = arith.constant 0 : index
    %275 = vector.load %arg3[%c1_130, %c0_131, %c0_132] : memref<4x256x128xf32, #tpu.memory_space<vmem>>, vector<1x256x128xf32>
    %276 = vector.shape_cast %275 : vector<1x256x128xf32> to vector<256x128xf32>
    %cst_133 = arith.constant dense<0.000000e+00> : vector<8x128xf32>
    %277 = tpu.matmul %274, %276, %cst_133 {dimension_numbers = #tpu.dot_dimension_numbers<[1], [0], [0], [1], [0, 0, 1, 1], [], []>} : vector<8x256xf32>, vector<256x128xf32>, vector<8x128xf32> -> vector<8x128xf32>
    %278 = vector.extract_strided_slice %5 {offsets = [2, 0, 0], sizes = [1, 8, 128], strides = [1, 1, 1]} : vector<5x8x128xf32> to vector<1x8x128xf32>
    %279 = vector.shape_cast %278 : vector<1x8x128xf32> to vector<8x128xf32>
    %280 = arith.addf %277, %279 : vector<8x128xf32>
    %281 = math.tanh %280 : vector<8x128xf32>
    %282 = tpu.concatenate %281, %248 in 1 : vector<8x128xf32>, vector<8x128xf32> -> vector<8x256xf32>
    %c2_134 = arith.constant 2 : index
    %c0_135 = arith.constant 0 : index
    %c0_136 = arith.constant 0 : index
    %283 = vector.load %arg3[%c2_134, %c0_135, %c0_136] : memref<4x256x128xf32, #tpu.memory_space<vmem>>, vector<1x256x128xf32>
    %284 = vector.shape_cast %283 : vector<1x256x128xf32> to vector<256x128xf32>
    %cst_137 = arith.constant dense<0.000000e+00> : vector<8x128xf32>
    %285 = tpu.matmul %282, %284, %cst_137 {dimension_numbers = #tpu.dot_dimension_numbers<[1], [0], [0], [1], [0, 0, 1, 1], [], []>} : vector<8x256xf32>, vector<256x128xf32>, vector<8x128xf32> -> vector<8x128xf32>
    %286 = vector.extract_strided_slice %5 {offsets = [3, 0, 0], sizes = [1, 8, 128], strides = [1, 1, 1]} : vector<5x8x128xf32> to vector<1x8x128xf32>
    %287 = vector.shape_cast %286 : vector<1x8x128xf32> to vector<8x128xf32>
    %288 = arith.addf %285, %287 : vector<8x128xf32>
    %289 = math.tanh %288 : vector<8x128xf32>
    %290 = tpu.concatenate %289, %256 in 1 : vector<8x128xf32>, vector<8x128xf32> -> vector<8x256xf32>
    %c3_138 = arith.constant 3 : index
    %c0_139 = arith.constant 0 : index
    %c0_140 = arith.constant 0 : index
    %291 = vector.load %arg3[%c3_138, %c0_139, %c0_140] : memref<4x256x128xf32, #tpu.memory_space<vmem>>, vector<1x256x128xf32>
    %292 = vector.shape_cast %291 : vector<1x256x128xf32> to vector<256x128xf32>
    %cst_141 = arith.constant dense<0.000000e+00> : vector<8x128xf32>
    %293 = tpu.matmul %290, %292, %cst_141 {dimension_numbers = #tpu.dot_dimension_numbers<[1], [0], [0], [1], [0, 0, 1, 1], [], []>} : vector<8x256xf32>, vector<256x128xf32>, vector<8x128xf32> -> vector<8x128xf32>
    %294 = vector.extract_strided_slice %5 {offsets = [4, 0, 0], sizes = [1, 8, 128], strides = [1, 1, 1]} : vector<5x8x128xf32> to vector<1x8x128xf32>
    %295 = vector.shape_cast %294 : vector<1x8x128xf32> to vector<8x128xf32>
    %296 = arith.addf %293, %295 : vector<8x128xf32>
    %297 = math.tanh %296 : vector<8x128xf32>
    %298 = vector.extract_strided_slice %4 {offsets = [7, 0, 0], sizes = [1, 8, 128], strides = [1, 1, 1]} : vector<8x8x128xf32> to vector<1x8x128xf32>
    %299 = vector.shape_cast %298 : vector<1x8x128xf32> to vector<8x128xf32>
    %c0_142 = arith.constant 0 : index
    %c0_143 = arith.constant 0 : index
    %300 = vector.load %arg2[%c0_142, %c0_143] : memref<128x128xf32, #tpu.memory_space<vmem>>, vector<128x128xf32>
    %cst_144 = arith.constant dense<0.000000e+00> : vector<8x128xf32>
    %301 = tpu.matmul %265, %300, %cst_144 {dimension_numbers = #tpu.dot_dimension_numbers<[1], [0], [0], [1], [0, 0, 1, 1], [], []>} : vector<8x128xf32>, vector<128x128xf32>, vector<8x128xf32> -> vector<8x128xf32>
    %302 = arith.addf %299, %301 : vector<8x128xf32>
    %303 = vector.extract_strided_slice %5 {offsets = [0, 0, 0], sizes = [1, 8, 128], strides = [1, 1, 1]} : vector<5x8x128xf32> to vector<1x8x128xf32>
    %304 = vector.shape_cast %303 : vector<1x8x128xf32> to vector<8x128xf32>
    %305 = arith.addf %302, %304 : vector<8x128xf32>
    %306 = math.tanh %305 : vector<8x128xf32>
    %307 = tpu.concatenate %306, %273 in 1 : vector<8x128xf32>, vector<8x128xf32> -> vector<8x256xf32>
    %c0_145 = arith.constant 0 : index
    %c0_146 = arith.constant 0 : index
    %c0_147 = arith.constant 0 : index
    %308 = vector.load %arg3[%c0_145, %c0_146, %c0_147] : memref<4x256x128xf32, #tpu.memory_space<vmem>>, vector<1x256x128xf32>
    %309 = vector.shape_cast %308 : vector<1x256x128xf32> to vector<256x128xf32>
    %cst_148 = arith.constant dense<0.000000e+00> : vector<8x128xf32>
    %310 = tpu.matmul %307, %309, %cst_148 {dimension_numbers = #tpu.dot_dimension_numbers<[1], [0], [0], [1], [0, 0, 1, 1], [], []>} : vector<8x256xf32>, vector<256x128xf32>, vector<8x128xf32> -> vector<8x128xf32>
    %311 = vector.extract_strided_slice %5 {offsets = [1, 0, 0], sizes = [1, 8, 128], strides = [1, 1, 1]} : vector<5x8x128xf32> to vector<1x8x128xf32>
    %312 = vector.shape_cast %311 : vector<1x8x128xf32> to vector<8x128xf32>
    %313 = arith.addf %310, %312 : vector<8x128xf32>
    %314 = math.tanh %313 : vector<8x128xf32>
    %315 = tpu.concatenate %314, %281 in 1 : vector<8x128xf32>, vector<8x128xf32> -> vector<8x256xf32>
    %c1_149 = arith.constant 1 : index
    %c0_150 = arith.constant 0 : index
    %c0_151 = arith.constant 0 : index
    %316 = vector.load %arg3[%c1_149, %c0_150, %c0_151] : memref<4x256x128xf32, #tpu.memory_space<vmem>>, vector<1x256x128xf32>
    %317 = vector.shape_cast %316 : vector<1x256x128xf32> to vector<256x128xf32>
    %cst_152 = arith.constant dense<0.000000e+00> : vector<8x128xf32>
    %318 = tpu.matmul %315, %317, %cst_152 {dimension_numbers = #tpu.dot_dimension_numbers<[1], [0], [0], [1], [0, 0, 1, 1], [], []>} : vector<8x256xf32>, vector<256x128xf32>, vector<8x128xf32> -> vector<8x128xf32>
    %319 = vector.extract_strided_slice %5 {offsets = [2, 0, 0], sizes = [1, 8, 128], strides = [1, 1, 1]} : vector<5x8x128xf32> to vector<1x8x128xf32>
    %320 = vector.shape_cast %319 : vector<1x8x128xf32> to vector<8x128xf32>
    %321 = arith.addf %318, %320 : vector<8x128xf32>
    %322 = math.tanh %321 : vector<8x128xf32>
    %323 = tpu.concatenate %322, %289 in 1 : vector<8x128xf32>, vector<8x128xf32> -> vector<8x256xf32>
    %c2_153 = arith.constant 2 : index
    %c0_154 = arith.constant 0 : index
    %c0_155 = arith.constant 0 : index
    %324 = vector.load %arg3[%c2_153, %c0_154, %c0_155] : memref<4x256x128xf32, #tpu.memory_space<vmem>>, vector<1x256x128xf32>
    %325 = vector.shape_cast %324 : vector<1x256x128xf32> to vector<256x128xf32>
    %cst_156 = arith.constant dense<0.000000e+00> : vector<8x128xf32>
    %326 = tpu.matmul %323, %325, %cst_156 {dimension_numbers = #tpu.dot_dimension_numbers<[1], [0], [0], [1], [0, 0, 1, 1], [], []>} : vector<8x256xf32>, vector<256x128xf32>, vector<8x128xf32> -> vector<8x128xf32>
    %327 = vector.extract_strided_slice %5 {offsets = [3, 0, 0], sizes = [1, 8, 128], strides = [1, 1, 1]} : vector<5x8x128xf32> to vector<1x8x128xf32>
    %328 = vector.shape_cast %327 : vector<1x8x128xf32> to vector<8x128xf32>
    %329 = arith.addf %326, %328 : vector<8x128xf32>
    %330 = math.tanh %329 : vector<8x128xf32>
    %331 = tpu.concatenate %330, %297 in 1 : vector<8x128xf32>, vector<8x128xf32> -> vector<8x256xf32>
    %c3_157 = arith.constant 3 : index
    %c0_158 = arith.constant 0 : index
    %c0_159 = arith.constant 0 : index
    %332 = vector.load %arg3[%c3_157, %c0_158, %c0_159] : memref<4x256x128xf32, #tpu.memory_space<vmem>>, vector<1x256x128xf32>
    %333 = vector.shape_cast %332 : vector<1x256x128xf32> to vector<256x128xf32>
    %cst_160 = arith.constant dense<0.000000e+00> : vector<8x128xf32>
    %334 = tpu.matmul %331, %333, %cst_160 {dimension_numbers = #tpu.dot_dimension_numbers<[1], [0], [0], [1], [0, 0, 1, 1], [], []>} : vector<8x256xf32>, vector<256x128xf32>, vector<8x128xf32> -> vector<8x128xf32>
    %335 = vector.extract_strided_slice %5 {offsets = [4, 0, 0], sizes = [1, 8, 128], strides = [1, 1, 1]} : vector<5x8x128xf32> to vector<1x8x128xf32>
    %336 = vector.shape_cast %335 : vector<1x8x128xf32> to vector<8x128xf32>
    %337 = arith.addf %334, %336 : vector<8x128xf32>
    %338 = math.tanh %337 : vector<8x128xf32>
    %c0_161 = arith.constant 0 : index
    %c0_162 = arith.constant 0 : index
    %339 = vector.load %arg5[%c0_161, %c0_162] : memref<128x128xf32, #tpu.memory_space<vmem>>, vector<128x128xf32>
    %cst_163 = arith.constant dense<0.000000e+00> : vector<8x128xf32>
    %340 = tpu.matmul %338, %339, %cst_163 {dimension_numbers = #tpu.dot_dimension_numbers<[1], [0], [0], [1], [0, 0, 1, 1], [], []>} : vector<8x128xf32>, vector<128x128xf32>, vector<8x128xf32> -> vector<8x128xf32>
    %c0_164 = arith.constant 0 : index
    %c0_165 = arith.constant 0 : index
    %341 = vector.load %arg6[%c0_164, %c0_165] : memref<8x128xf32, #tpu.memory_space<vmem>>, vector<8x128xf32>
    %342 = arith.addf %340, %341 : vector<8x128xf32>
    %c0_166 = arith.constant 0 : index
    %c0_167 = arith.constant 0 : index
    %343 = vector.load %arg7[%c0_166, %c0_167] : memref<8x128xf32, #tpu.memory_space<vmem>>, vector<8x128xf32>
    tpu.vector_store %arg7[%c0_166, %c0_167], %342 {strides = array<i32>} : memref<8x128xf32, #tpu.memory_space<vmem>>, vector<8x128xf32>,
    return
  }
}

</mosaic_0001>

<bundles_post_ra>
// kernel: rnn_classifier_forward.1
= control target key start
LH: loop header
LB: loop body
LE: loop exit
PB: predicated region body
PF: predicated region fallthrough
CT: control target
= control target key end

     0   :  { %12 = vsyncpa [#allocation3], 0  ;;  %s7549_s0 = inlined_call_operand.vmem [shape: f32[8,8,128], index: 0, kind: input, shape index: {}]   ;;  %s7550_s1 = inlined_call_operand.vmem [shape: f32[128,128], index: 1, kind: input, shape index: {}]   ;;  %s7551_s2 = inlined_call_operand.hbm [shape: f32[128,128], index: 2, kind: input, shape index: {}]   ;;  %s7552_s3 = inlined_call_operand.hbm [shape: f32[4,256,128], index: 3, kind: input, shape index: {}]   ;;  %s7553_s4 = inlined_call_operand.vmem [shape: f32[5,8,128], index: 4, kind: input, shape index: {}]   ;;  %s7554_s5 = inlined_call_operand.hbm [shape: f32[128,128], index: 5, kind: input, shape index: {}]   ;;  %s7555_s6 = inlined_call_operand.vmem [shape: f32[8,128], index: 6, kind: input, shape index: {}]   ;;  %s7556_s7 = inlined_call_operand.vmem [shape: f32[8,128], index: 7, kind: output, shape index: {}]  }
   0x1   :  { %13 = vsyncpa [#allocation5], 0  ;;  %s6389_s24 = smov [#allocation4]   ;;  %s6390_s26 = smov [#allocation2]  }
   0x2   :  { %s35_s25 = sshll.u32 %s6389_s24, 4  ;;  %s23_s27 = sshll.u32 %s6390_s26, 4  ;;  %s36_s25 = int_to_ptr.vmem [resolvable:$true] %s35_s25  ;;  %s6437_s27 = int_to_ptr.vmem [resolvable:$true] %s23_s27 }
   0x3   :  { %s6319_s30 = scalar_lea.hbm %s7552_s3, 16384 }
   0x4   :  { %p6320_p0 = scmp.ne.s32.totalorder %s7552_s3, %s6319_s30  ;;  %p6323_p1 = scmp.lt.u32.totalorder %s6319_s30, %s7552_s3 }
   0x6   :  { %p6325_p2 = pnand %p6323_p1, %p6320_p0 }
   0x8   :  { %6328 = shalt.err (!%p6325_p2)
}
   0x9   :  { %s6329_s12 = scalar_lea.vmem %s36_s25, 16384  ;;  %p6334_p4 = scmp.lt.s32.totalorder %s36_s25, %s36_s25 }
   0xa   :  { %p6330_p3 = scmp.ne.s32.totalorder %s36_s25, %s6329_s12  ;;  %p6335_p5 = scmp.lt.s32.totalorder %s6329_s12, %s6329_s12 }
   0xc   :  { %p6336_p6 = por %p6335_p5, %p6334_p4 }
   0xe   :  { %p6337_p7 = pnand %p6336_p6, %p6330_p3 }
  0x10   :  { %6340 = shalt.err (!%p6337_p7)
}
  0x11   :  { %s6391_s13 = smov 128   ;;  %s6392_s14 = smov 8  }
  0x12   :  { %41 = dma.hbm_to_vmem [thread:$0]  %s7552_s3, 16384, %s36_s25, [#allocation5], %s6391_s13, %s6391_s13, %s6392_s14  }
  0x13   :  { %s6341_s19 = scalar_lea.hbm %s7551_s2, 2048 }
  0x14   :  { %p6342_p8 = scmp.ne.s32.totalorder %s7551_s2, %s6341_s19  ;;  %p6345_p9 = scmp.lt.u32.totalorder %s6341_s19, %s7551_s2 }
  0x16   :  { %p6347_p10 = pnand %p6345_p9, %p6342_p8 }
  0x18   :  { %6350 = shalt.err (!%p6347_p10)
}
  0x19   :  { %s6351_s24 = scalar_lea.vmem %s6437_s27, 2048  ;;  %p6356_p12 = scmp.lt.s32.totalorder %s6437_s27, %s6437_s27 }
  0x1a   :  { %p6352_p11 = scmp.ne.s32.totalorder %s6437_s27, %s6351_s24  ;;  %p6357_p13 = scmp.lt.s32.totalorder %s6351_s24, %s6351_s24 }
  0x1c   :  { %p6358_p0 = por %p6357_p13, %p6356_p12 }
  0x1e   :  { %p6359_p1 = pnand %p6358_p0, %p6352_p11 }
  0x20   :  { %6362 = shalt.err (!%p6359_p1)
}
  0x21   :  { %29 = dma.hbm_to_vmem [thread:$0]  %s7551_s2, 2048, %s6437_s27, [#allocation3], %s6391_s13, %s6391_s13, %s6392_s14  }
  0x22   :  { %s6393_s26 = smov [#allocation6]   ;;  %s6363_s8 = scalar_lea.hbm %s7554_s5, 2048 }
  0x23   :  { %s49_s28 = sshll.u32 %s6393_s26, 4  ;;  %p6364_p2 = scmp.ne.s32.totalorder %s7554_s5, %s6363_s8  ;;  %s50_s28 = int_to_ptr.vmem [resolvable:$true] %s49_s28 }
  0x24   :  { %p6367_p3 = scmp.lt.u32.totalorder %s6363_s8, %s7554_s5 }
  0x26   :  { %p6369_p4 = pnand %p6367_p3, %p6364_p2 }
  0x28   :  { %6372 = shalt.err (!%p6369_p4)
}
  0x29   :  { %s6373_s15 = scalar_lea.vmem %s50_s28, 2048  ;;  %p6378_p6 = scmp.lt.s32.totalorder %s50_s28, %s50_s28 }
  0x2a   :  { %p6374_p5 = scmp.ne.s32.totalorder %s50_s28, %s6373_s15  ;;  %p6379_p7 = scmp.lt.s32.totalorder %s6373_s15, %s6373_s15 }
  0x2c   :  { %p6380_p8 = por %p6379_p7, %p6378_p6 }
  0x2e   :  { %p6381_p9 = pnand %p6380_p8, %p6374_p5 }
  0x30   :  { %6384 = shalt.err (!%p6381_p9)
}
  0x31   :  { %55 = dma.hbm_to_vmem [thread:$0]  %s7554_s5, 2048, %s50_s28, [#allocation5], %s6391_s13, %s6391_s13, %s6392_s14  }
  0x32   :  { %6385 = dma.done.wait [#allocation3], 2048  }
  0x33   :  { %6386 = vsyncadd [#allocation3], 4294965248 }
  0x34   :  { %6387 = dma.done.wait [#allocation5], 18432  }
  0x35   :  { %6388 = vsyncadd [#allocation5], 4294948864  ;;  %v7557_v0 = vmov 0.0|0.0   ;;  %vm6395_vm0 = vmmov 0   ;;  %v7559_v1 = vmov 0.0   ;;  %v75_v2 = vld [vmem:[%s7550_s1] sm:$0xff] }
  0x36   :  { %4986 = vmatprep.subr.bf16.mxu1 %v7557_v0  ;;  %4671 = vmatprep.mubr.msk.f32.mxu1 %vm6395_vm0, %v7559_v1  ;;  %v76_v3 = vld [vmem:[%s7550_s1 + $0x8] sm:$0xff]  ;;  %v201_v4 = vld [vmem:[#allocation2] sm:$0xff]  ;;  %v77_v7 = vld [vmem:[%s7550_s1 + $0x10] sm:$0xff] }
  0x37   :  { %v4954_v5 = vpack.c.bf16 %v76_v3, %v75_v2  ;;  %v202_v6 = vld [vmem:[#allocation2 + $0x8] sm:$0xff]  ;;  %v78_v8 = vld [vmem:[%s7550_s1 + $0x18] sm:$0xff]  ;;  %v203_v11 = vld [vmem:[#allocation2 + $0x10] sm:$0xff] }
  0x38   :  { %v6504_v9 = vpack.c.bf16 %v202_v6, %v201_v4  ;;  %v4958_v10 = vpack.c.bf16 %v78_v8, %v77_v7  ;;  %v204_v12 = vld [vmem:[#allocation2 + $0x18] sm:$0xff]  ;;  %v79_v13 = vld [vmem:[%s7550_s1 + $0x20] sm:$0xff]  ;;  %v80_v14 = vld [vmem:[%s7550_s1 + $0x28] sm:$0xff] }
  0x39   :  { %4955 = vmatprep.subr.bf16.mxu0 %v4954_v5  ;;  %v6513_v15 = vpack.c.bf16 %v204_v12, %v203_v11  ;;  %v4962_v16 = vpack.c.bf16 %v80_v14, %v79_v13  ;;  %v205_v17 = vld [vmem:[#allocation2 + $0x20] sm:$0xff]  ;;  %v206_v18 = vld [vmem:[#allocation2 + $0x28] sm:$0xff]  ;;  %v81_v19 = vld [vmem:[%s7550_s1 + $0x30] sm:$0xff] }
  0x3a   :  { %4957 = vmatpush3.bf16.msra.mxu0 %v4954_v5  ;;  %4988 = vmatpush3.bf16.msra.mxu1 %v6504_v9  ;;  %v82_v20 = vld [vmem:[%s7550_s1 + $0x38] sm:$0xff]  ;;  %v6523_v21 = vpack.c.bf16 %v206_v18, %v205_v17  ;;  %v207_v23 = vld [vmem:[#allocation2 + $0x30] sm:$0xff]  ;;  %v83_v25 = vld [vmem:[%s7550_s1 + $0x40] sm:$0xff] }
  0x3b   :  { %4959 = vmatprep.subr.bf16.mxu0 %v4958_v10  ;;  %4989 = vmatprep.subr.bf16.mxu1 %v7557_v0  ;;  %v4966_v22 = vpack.c.bf16 %v82_v20, %v81_v19  ;;  %v208_v24 = vld [vmem:[#allocation2 + $0x38] sm:$0xff]  ;;  %v84_v26 = vld [vmem:[%s7550_s1 + $0x48] sm:$0xff]  ;;  %v67_v27 = vld [vmem:[%s7549_s0] sm:$0xff] }
  0x3c   :  { %4627 = vmatprep.mubr.f32.mxu0 %v67_v27  ;;  %v6536_v28 = vpack.c.bf16 %v208_v24, %v207_v23  ;;  %v4970_v29 = vpack.c.bf16 %v84_v26, %v83_v25  ;;  %v209_v30 = vld [vmem:[#allocation2 + $0x40] sm:$0xff]  ;;  %v210_v31 = vld [vmem:[#allocation2 + $0x48] sm:$0xff]  ;;  %v85_v32 = vld [vmem:[%s7550_s1 + $0x50] sm:$0xff] }
  0x3d   :  { %v86_v33 = vld [vmem:[%s7550_s1 + $0x58] sm:$0xff]  ;;  %v6546_v34 = vpack.c.bf16 %v210_v31, %v209_v30  ;;  %v211_v36 = vld [vmem:[#allocation2 + $0x50] sm:$0xff]  ;;  %v87_v38 = vld [vmem:[%s7550_s1 + $0x60] sm:$0xff] }
  0x3e   :  { %4961 = vmatpush3.bf16.msra.mxu0 %v4958_v10  ;;  %4991 = vmatpush3.bf16.msra.mxu1 %v6513_v15  ;;  %v4974_v35 = vpack.c.bf16 %v86_v33, %v85_v32  ;;  %v212_v37 = vld [vmem:[#allocation2 + $0x58] sm:$0xff]  ;;  %v88_v39 = vld [vmem:[%s7550_s1 + $0x68] sm:$0xff]  ;;  %v213_v42 = vld [vmem:[#allocation2 + $0x60] sm:$0xff] }
  0x3f   :  { %4963 = vmatprep.subr.bf16.mxu0 %v4962_v16  ;;  %4992 = vmatprep.subr.bf16.mxu1 %v7557_v0  ;;  %v6556_v40 = vpack.c.bf16 %v212_v37, %v211_v36  ;;  %v4978_v41 = vpack.c.bf16 %v88_v39, %v87_v38  ;;  %v214_v43 = vld [vmem:[#allocation2 + $0x68] sm:$0xff]  ;;  %v89_v44 = vld [vmem:[%s7550_s1 + $0x70] sm:$0xff]  ;;  %v90_v45 = vld [vmem:[%s7550_s1 + $0x78] sm:$0xff] }
  0x40   :  { %v6566_v46 = vpack.c.bf16 %v214_v43, %v213_v42  ;;  %v4982_v47 = vpack.c.bf16 %v90_v45, %v89_v44  ;;  %v215_v48 = vld [vmem:[#allocation2 + $0x70] sm:$0xff]  ;;  %v216_v49 = vld [vmem:[#allocation2 + $0x78] sm:$0xff]  ;;  %v306_v50 = vld [vmem:[#allocation4 + $0x80] sm:$0xff] }
  0x41   :  { %v307_v51 = vld [vmem:[#allocation4 + $0x88] sm:$0xff]  ;;  %v6570_v52 = vpack.c.bf16 %v216_v49, %v215_v48  ;;  %v290_v54 = vld [vmem:[#allocation4] sm:$0xff]  ;;  %v308_v56 = vld [vmem:[#allocation4 + $0x90] sm:$0xff] }
  0x42   :  { %4965 = vmatpush3.bf16.msra.mxu0 %v4962_v16  ;;  %4994 = vmatpush3.bf16.msra.mxu1 %v6523_v21  ;;  %v6573_v53 = vpack.c.bf16 %v307_v51, %v306_v50  ;;  %v291_v55 = vld [vmem:[#allocation4 + $0x8] sm:$0xff]  ;;  %v309_v57 = vld [vmem:[#allocation4 + $0x98] sm:$0xff]  ;;  %v292_v61 = vld [vmem:[#allocation4 + $0x10] sm:$0xff] }
  0x43   :  { %4967 = vmatprep.subr.bf16.mxu0 %v4966_v22  ;;  %4995 = vmatprep.subr.bf16.mxu1 %v7557_v0  ;;  %v68_v58 = vld [vmem:[%s7549_s0 + $0x8] sm:$0xff]  ;;  %v6579_v59 = vpack.c.bf16 %v291_v55, %v290_v54  ;;  %v6582_v60 = vpack.c.bf16 %v309_v57, %v308_v56  ;;  %v293_v62 = vld [vmem:[#allocation4 + $0x18] sm:$0xff]  ;;  %v310_v63 = vld [vmem:[#allocation4 + $0xa0] sm:$0xff] }
  0x44   :  { %v311_v2 = vld [vmem:[#allocation4 + $0xa8] sm:$0xff]  ;;  %v6586_v3 = vpack.c.bf16 %v293_v62, %v292_v61  ;;  %v294_v5 = vld [vmem:[#allocation4 + $0x20] sm:$0xff]  ;;  %v312_v7 = vld [vmem:[#allocation4 + $0xb0] sm:$0xff] }
  0x45   :  { %7665 = vst [vmem:[#allocation9_spill] sm:$0xff] %v6579_v59  ;;  %7666 = vst [vmem:[#allocation10_spill] sm:$0xff] %v6582_v60  ;;  %v6590_v4 = vpack.c.bf16 %v311_v2, %v310_v63  ;;  %v295_v6 = vld [vmem:[#allocation4 + $0x28] sm:$0xff]  ;;  %v313_v8 = vld [vmem:[#allocation4 + $0xb8] sm:$0xff] }
  0x46   :  { %4969 = vmatpush3.bf16.msra.mxu0 %v4966_v22  ;;  %4997 = vmatpush3.bf16.msra.mxu1 %v6536_v28  ;;  %7667 = vst [vmem:[#allocation11_spill] sm:$0xff] %v6586_v3  ;;  %v6593_v10 = vpack.c.bf16 %v295_v6, %v294_v5  ;;  %v6596_v11 = vpack.c.bf16 %v313_v8, %v312_v7  ;;  %v296_v12 = vld [vmem:[#allocation4 + $0x30] sm:$0xff]  ;;  %v297_v13 = vld [vmem:[#allocation4 + $0x38] sm:$0xff]  ;;  %v314_v16 = vld [vmem:[#allocation4 + $0xc0] sm:$0xff] }
  0x47   :  { %4971 = vmatprep.subr.bf16.mxu0 %v4970_v29  ;;  %4998 = vmatprep.subr.bf16.mxu1 %v7557_v0  ;;  %7668 = vst [vmem:[#allocation12_spill] sm:$0xff] %v6590_v4  ;;  %v6599_v14 = vpack.c.bf16 %v297_v13, %v296_v12  ;;  %v315_v17 = vld [vmem:[#allocation4 + $0xc8] sm:$0xff]  ;;  %v298_v19 = vld [vmem:[#allocation4 + $0x40] sm:$0xff]  ;;  %v69_v23 = vld [vmem:[%s7549_s0 + $0x10] sm:$0xff] }
  0x48   :  { %7669 = vst [vmem:[#allocation13_spill] sm:$0xff] %v6593_v10  ;;  %7670 = vst [vmem:[#allocation14_spill] sm:$0xff] %v6596_v11  ;;  %v6603_v18 = vpack.c.bf16 %v315_v17, %v314_v16  ;;  %v299_v20 = vld [vmem:[#allocation4 + $0x48] sm:$0xff]  ;;  %v316_v24 = vld [vmem:[#allocation4 + $0xd0] sm:$0xff] }
  0x49   :  { %7671 = vst [vmem:[#allocation15_spill] sm:$0xff] %v6599_v14  ;;  %v6605_v22 = vpack.c.bf16 %v299_v20, %v298_v19  ;;  %v317_v25 = vld [vmem:[#allocation4 + $0xd8] sm:$0xff]  ;;  %v71_v32 = vld [vmem:[%s7549_s0 + $0x20] sm:$0xff]  ;;  %v72_v33 = vld [vmem:[%s7549_s0 + $0x28] sm:$0xff] }
  0x4a   :  { %4973 = vmatpush3.bf16.msra.mxu0 %v4970_v29  ;;  %5000 = vmatpush3.bf16.msra.mxu1 %v6546_v34  ;;  %7672 = vst [vmem:[#allocation16_spill] sm:$0xff] %v6603_v18  ;;  %v70_v26 = vld [vmem:[%s7549_s0 + $0x18] sm:$0xff]  ;;  %v6615_v27 = vpack.c.bf16 %v317_v25, %v316_v24  ;;  %v300_v29 = vld [vmem:[#allocation4 + $0x50] sm:$0xff]  ;;  %v319_v36 = vld [vmem:[#allocation4 + $0xe8] sm:$0xff] }
  0x4b   :  { %4975 = vmatprep.subr.bf16.mxu0 %v4974_v35  ;;  %5001 = vmatprep.subr.bf16.mxu1 %v7557_v0  ;;  %7673 = vst [vmem:[#allocation17_spill] sm:$0xff] %v6605_v22  ;;  %v301_v30 = vld [vmem:[#allocation4 + $0x58] sm:$0xff]  ;;  %v302_v37 = vld [vmem:[#allocation4 + $0x60] sm:$0xff]  ;;  %v303_v38 = vld [vmem:[#allocation4 + $0x68] sm:$0xff] }
  0x4c   :  { %7674 = vst [vmem:[#allocation18_spill] sm:$0xff] %v6615_v27  ;;  %v6617_v31 = vpack.c.bf16 %v301_v30, %v300_v29  ;;  %v73_v42 = vld [vmem:[%s7549_s0 + $0x30] sm:$0xff]  ;;  %v74_v43 = vld [vmem:[%s7549_s0 + $0x38] sm:$0xff]  ;;  %v410_v51 = vld [vmem:[#allocation4 + $0x180] sm:$0xff] }
  0x4d   :  { %v320_v44 = vld [vmem:[#allocation4 + $0xf0] sm:$0xff]  ;;  %v321_v45 = vld [vmem:[#allocation4 + $0xf8] sm:$0xff]  ;;  %v411_v54 = vld [vmem:[#allocation4 + $0x188] sm:$0xff] }
  0x4e   :  { %4977 = vmatpush3.bf16.msra.mxu0 %v4974_v35  ;;  %5003 = vmatpush3.bf16.msra.mxu1 %v6556_v40  ;;  %7675 = vst [vmem:[#allocation19_spill] sm:$0xff] %v6617_v31  ;;  %v318_v35 = vld [vmem:[#allocation4 + $0xe0] sm:$0xff]  ;;  %v305_v48 = vld [vmem:[#allocation4 + $0x78] sm:$0xff]  ;;  %v6638_v49 = vpack.c.bf16 %v321_v45, %v320_v44  ;;  %v6646_v56 = vpack.c.bf16 %v411_v54, %v410_v51  ;;  %v395_v57 = vld [vmem:[#allocation4 + $0x108] sm:$0xff] }
  0x4f   :  { %4979 = vmatprep.subr.bf16.mxu0 %v4978_v41  ;;  %5004 = vmatprep.subr.bf16.mxu1 %v7557_v0  ;;  %v6627_v39 = vpack.c.bf16 %v319_v36, %v318_v35  ;;  %v394_v55 = vld [vmem:[#allocation4 + $0x100] sm:$0xff]  ;;  %v412_v61 = vld [vmem:[#allocation4 + $0x190] sm:$0xff]  ;;  %v413_v62 = vld [vmem:[#allocation4 + $0x198] sm:$0xff] }
  0x50   :  { %7678 = vst [vmem:[#allocation22_spill] sm:$0xff] %v6638_v49  ;;  %v396_v63 = vld [vmem:[#allocation4 + $0x110] sm:$0xff]  ;;  %v6652_v2 = vpack.c.bf16 %v413_v62, %v412_v61  ;;  %v397_v5 = vld [vmem:[#allocation4 + $0x118] sm:$0xff]  ;;  %v414_v7 = vld [vmem:[#allocation4 + $0x1a0] sm:$0xff] }
  0x51   :  { %7676 = vst [vmem:[#allocation20_spill] sm:$0xff] %v6627_v39  ;;  %v6654_v6 = vpack.c.bf16 %v397_v5, %v396_v63  ;;  %v415_v8 = vld [vmem:[#allocation4 + $0x1a8] sm:$0xff]  ;;  %v398_v12 = vld [vmem:[#allocation4 + $0x120] sm:$0xff]  ;;  %v416_v19 = vld [vmem:[#allocation4 + $0x1b0] sm:$0xff] }
  0x52   :  { %4981 = vmatpush3.bf16.msra.mxu0 %v4978_v41  ;;  %5006 = vmatpush3.bf16.msra.mxu1 %v6566_v46  ;;  %v6629_v41 = vpack.c.bf16 %v303_v38, %v302_v37  ;;  %v6658_v13 = vpack.c.bf16 %v415_v8, %v414_v7  ;;  %v399_v16 = vld [vmem:[#allocation4 + $0x128] sm:$0xff]  ;;  %v417_v20 = vld [vmem:[#allocation4 + $0x1b8] sm:$0xff]  ;;  %v418_v51 = vld [vmem:[#allocation4 + $0x1c0] sm:$0xff] }
  0x53   :  { %4983 = vmatprep.subr.bf16.mxu0 %v4982_v47  ;;  %5007 = vmatprep.subr.bf16.mxu1 %v7557_v0  ;;  %v6660_v17 = vpack.c.bf16 %v399_v16, %v398_v12  ;;  %v6664_v24 = vpack.c.bf16 %v417_v20, %v416_v19  ;;  %v401_v25 = vld [vmem:[#allocation4 + $0x138] sm:$0xff]  ;;  %v419_v54 = vld [vmem:[#allocation4 + $0x1c8] sm:$0xff]  ;;  %v420_v63 = vld [vmem:[#allocation4 + $0x1d0] sm:$0xff] }
  0x54   :  { %7677 = vst [vmem:[#allocation21_spill] sm:$0xff] %v6629_v41  ;;  %v403_v61 = vld [vmem:[#allocation4 + $0x148] sm:$0xff]  ;;  %v421_v5 = vld [vmem:[#allocation4 + $0x1d8] sm:$0xff]  ;;  %v404_v8 = vld [vmem:[#allocation4 + $0x150] sm:$0xff] }
  0x55   :  { %7680 = vst [vmem:[#allocation24_spill] sm:$0xff] %v6664_v24  ;;  %v6700_v7 = vpack.c.bf16 %v421_v5, %v420_v63  ;;  %v405_v12 = vld [vmem:[#allocation4 + $0x158] sm:$0xff]  ;;  %v422_v19 = vld [vmem:[#allocation4 + $0x1e0] sm:$0xff]  ;;  %v423_v20 = vld [vmem:[#allocation4 + $0x1e8] sm:$0xff] }
  0x56   :  { %4985 = vmatpush3.bf16.msra.mxu0 %v4982_v47  ;;  %5009 = vmatpush3.bf16.msra.mxu1 %v6570_v52  ;;  %v304_v47 = vld [vmem:[#allocation4 + $0x70] sm:$0xff]  ;;  %v6702_v16 = vpack.c.bf16 %v405_v12, %v404_v8  ;;  %v515_v63 = vld [vmem:[#allocation4 + $0x288] sm:$0xff]  ;;  %v498_v5 = vld [vmem:[#allocation4 + $0x200] sm:$0xff] }
  0x57   :  { %5011 = vmatprep.subr.bf16.mxu0 %v6573_v53  ;;  %v6641_v50 = vpack.c.bf16 %v305_v48, %v304_v47  ;;  %5043 = vmatprep.subr.bf16.mxu1 %v6646_v56  ;;  %7690 = vst [vmem:[#allocation34_spill] sm:$0xff] %v6700_v7  ;;  %v499_v12 = vld [vmem:[#allocation4 + $0x208] sm:$0xff] }
  0x58   :  { %7691 = vst [vmem:[#allocation35_spill] sm:$0xff] %v6702_v16 }
  0x59   :  { %4628 = vmatmul.mubr.f32.vlgmr.msra.gmra.mrb[0].mxu0 %v68_v58  ;;  %4672 = vmatmul.mubr.f32.vlgmr.msra.gmra.mrb[0].mxu1 %v7559_v1  ;;  %7679 = vst [vmem:[#allocation23_spill] sm:$0xff] %v6641_v50  ;;  %v6648_v58 = vpack.c.bf16 %v395_v57, %v394_v55  ;;  %v6694_v55 = vpack.c.bf16 %v419_v54, %v418_v51  ;;  %v402_v57 = vld [vmem:[#allocation4 + $0x140] sm:$0xff]  ;;  %v408_v51 = vld [vmem:[#allocation4 + $0x170] sm:$0xff]  ;;  %v409_v54 = vld [vmem:[#allocation4 + $0x178] sm:$0xff] }
  0x5a   :  { %5013 = vmatpush3.bf16.msra.mxu0 %v6579_v59  ;;  %490 = vmatprep.mubr.f32.mxu1 %v7559_v1  ;;  %v6696_v62 = vpack.c.bf16 %v403_v61, %v402_v57  ;;  %v6714_v57 = vpack.c.bf16 %v409_v54, %v408_v51  ;;  %v514_v61 = vld [vmem:[#allocation4 + $0x280] sm:$0xff]  ;;  %v519_v54 = vld [vmem:[#allocation4 + $0x2a8] sm:$0xff] }
  0x5b   :  { %5015 = vmatprep.subr.bf16.mxu0 %v6582_v60  ;;  %4630 = vmatprep.mubr.f32.mxu0 %v69_v23  ;;  %v400_v23 = vld [vmem:[#allocation4 + $0x130] sm:$0xff]  ;;  %7688 = vst [vmem:[#allocation32_spill] sm:$0xff] %v6694_v55  ;;  %v6718_v8 = vpack.c.bf16 %v515_v63, %v514_v61  ;;  %v518_v51 = vld [vmem:[#allocation4 + $0x2a0] sm:$0xff] }
  0x5c   :  { %5045 = vmatpush3.bf16.msra.mxu1 %v6648_v58  ;;  %7689 = vst [vmem:[#allocation33_spill] sm:$0xff] %v6696_v62  ;;  %7695 = vst [vmem:[#allocation39_spill] sm:$0xff] %v6714_v57  ;;  %v6729_v61 = vpack.c.bf16 %v519_v54, %v518_v51  ;;  %v502_v63 = vld [vmem:[#allocation4 + $0x220] sm:$0xff] }
  0x5d   :  { %4631 = vmatmul.mubr.f32.gmra.mrb[2].mxu0 %v70_v26  ;;  %5047 = vmatprep.subr.bf16.mxu1 %v6652_v2  ;;  %v6666_v26 = vpack.c.bf16 %v401_v25, %v400_v23  ;;  %v406_v23 = vld [vmem:[#allocation4 + $0x160] sm:$0xff]  ;;  %v6706_v25 = vpack.c.bf16 %v423_v20, %v422_v19  ;;  %7696 = vst [vmem:[#allocation40_spill] sm:$0xff] %v6718_v8  ;;  %v516_v19 = vld [vmem:[#allocation4 + $0x290] sm:$0xff]  ;;  %v517_v20 = vld [vmem:[#allocation4 + $0x298] sm:$0xff] }
  0x5e   :  { %5017 = vmatpush3.bf16.msra.mxu0 %v6586_v3  ;;  %4633 = vmatprep.mubr.f32.mxu0 %v71_v32  ;;  %7700 = vst [vmem:[#allocation44_spill] sm:$0xff] %v6729_v61 }
  0x5f   :  { %5019 = vmatprep.subr.bf16.mxu0 %v6590_v4  ;;  %7681 = vst [vmem:[#allocation25_spill] sm:$0xff] %v6666_v26  ;;  %7692 = vst [vmem:[#allocation36_spill] sm:$0xff] %v6706_v25 }
  0x60   :  { %5049 = vmatpush3.bf16.msra.mxu1 %v6654_v6 }
  0x61   :  { %4634 = vmatmul.mubr.f32.gmra.mrb[4].mxu0 %v72_v33  ;;  %5051 = vmatprep.subr.bf16.mxu1 %v6658_v13  ;;  %v6675_v33 = vld [vmem:[%s7553_s4] sm:$0xff] }
  0x62   :  { %5021 = vmatpush3.bf16.msra.mxu0 %v6593_v10  ;;  %4636 = vmatprep.mubr.f32.mxu0 %v73_v42 }
  0x63   :  { %5023 = vmatprep.subr.bf16.mxu0 %v6596_v11 }
  0x64   :  { %5053 = vmatpush3.bf16.msra.mxu1 %v6660_v17 }
  0x65   :  { %4637 = vmatmul.mubr.f32.gmra.mrb[6].mxu0 %v74_v43  ;;  %5055 = vmatprep.subr.bf16.mxu1 %v6664_v24 }
  0x66   :  { %5025 = vmatpush3.bf16.msra.mxu0 %v6599_v14  ;;  %386 = vmatprep.mubr.f32.mxu0 %v7559_v1 }
  0x67   :  { %5027 = vmatprep.subr.bf16.mxu0 %v6603_v18 }
  0x68   :  { %5057 = vmatpush3.bf16.msra.mxu1 %v6666_v26 }
  0x69   :  { %5059 = vmatprep.subr.bf16.mxu1 %v6694_v55 }
  0x6a   :  { %5029 = vmatpush3.bf16.msra.mxu0 %v6605_v22 }
  0x6b   :  { %5031 = vmatprep.subr.bf16.mxu0 %v6615_v27 }
  0x6c   :  { %5061 = vmatpush3.bf16.msra.mxu1 %v6696_v62 }
  0x6d   :  { %5063 = vmatprep.subr.bf16.mxu1 %v6700_v7 }
  0x6e   :  { %5033 = vmatpush3.bf16.msra.mxu0 %v6617_v31 }
  0x6f   :  { %5035 = vmatprep.subr.bf16.mxu0 %v6627_v39 }
  0x70   :  { %5065 = vmatpush3.bf16.msra.mxu1 %v6702_v16 }
  0x71   :  { %5067 = vmatprep.subr.bf16.mxu1 %v6706_v25 }
  0x72   :  { %5037 = vmatpush3.bf16.msra.mxu0 %v6629_v41 }
  0x73   :  { %5039 = vmatprep.subr.bf16.mxu0 %v6638_v49 }
  0x76   :  { %5041 = vmatpush3.bf16.msra.mxu0 %v6641_v50 }
  0x77   :  { %5075 = vmatprep.subr.bf16.mxu0 %v6718_v8 }
 0x12c   :  { %v6670_v29 = vpop.f32.mrb[0].mxu0  ;;  %v283_v30 = vpop.f32.mrb[0].mxu1 }
 0x12d   :  { %v157_v32 = vpop.f32.mrb[1].mxu0  ;;  %v4673_v35 = vpop.f32.mrb[1].mxu1 }
 0x12e   :  { %v287_v36 = vadd.f32 %v283_v30, %v157_v32  ;;  %v407_v30 = vld [vmem:[#allocation4 + $0x168] sm:$0xff]  ;;  %v424_v32 = vld [vmem:[#allocation4 + $0x1f0] sm:$0xff]  ;;  %v425_v35 = vld [vmem:[#allocation4 + $0x1f8] sm:$0xff] }
 0x130   :  { %v288_v37 = vadd.f32 %v287_v36, %v6675_v33  ;;  %v6682_v42 = vpop.f32.mrb[2].mxu0  ;;  %v6708_v36 = vpack.c.bf16 %v407_v30, %v406_v23  ;;  %v6720_v23 = vpack.c.bf16 %v499_v12, %v498_v5  ;;  %v6722_v30 = vpack.c.bf16 %v517_v20, %v516_v19  ;;  %v520_v5 = vld [vmem:[#allocation4 + $0x2b0] sm:$0xff]  ;;  %v521_v12 = vld [vmem:[#allocation4 + $0x2b8] sm:$0xff] }
 0x131   :  { %7682 = vst [vmem:[#allocation26_spill] sm:$0xff] %v6682_v42  ;;  %v6684_v43 = vpop.f32.mrb[3].mxu0  ;;  %v6735_v20 = vpack.c.bf16 %v521_v12, %v520_v5  ;;  %v523_v12 = vld [vmem:[#allocation4 + $0x2c8] sm:$0xff] }
 0x132   :  { %6234 = vtanh.f32 %v288_v37  ;;  %7683 = vst [vmem:[#allocation27_spill] sm:$0xff] %v6684_v43  ;;  %7693 = vst [vmem:[#allocation37_spill] sm:$0xff] %v6708_v36  ;;  %v6710_v37 = vpack.c.bf16 %v425_v35, %v424_v32  ;;  %5069 = vmatpush3.bf16.msra.mxu1 %v6708_v36  ;;  %v500_v32 = vld [vmem:[#allocation4 + $0x210] sm:$0xff]  ;;  %v501_v35 = vld [vmem:[#allocation4 + $0x218] sm:$0xff] }
 0x133   :  { %7697 = vst [vmem:[#allocation41_spill] sm:$0xff] %v6720_v23  ;;  %7698 = vst [vmem:[#allocation42_spill] sm:$0xff] %v6722_v30  ;;  %v6726_v0 = vpack.c.bf16 %v501_v35, %v500_v32  ;;  %v507_v42 = vld [vmem:[#allocation4 + $0x248] sm:$0xff] }
 0x134   :  { %v6686_v44 = vpop.f32.mrb[4].mxu0  ;;  %7694 = vst [vmem:[#allocation38_spill] sm:$0xff] %v6710_v37  ;;  %5071 = vmatprep.subr.bf16.mxu1 %v6710_v37  ;;  %7702 = vst [vmem:[#allocation46_spill] sm:$0xff] %v6735_v20 }
 0x135   :  { %7684 = vst [vmem:[#allocation28_spill] sm:$0xff] %v6686_v44  ;;  %v6688_v45 = vpop.f32.mrb[5].mxu0  ;;  %7699 = vst [vmem:[#allocation43_spill] sm:$0xff] %v6726_v0 }
 0x136   :  { %7685 = vst [vmem:[#allocation29_spill] sm:$0xff] %v6688_v45  ;;  %5073 = vmatpush3.bf16.msra.mxu1 %v6714_v57  ;;  %v506_v45 = vld [vmem:[#allocation4 + $0x240] sm:$0xff] }
 0x137   :  { %v6754_v43 = vpack.c.bf16 %v507_v42, %v506_v45  ;;  %v510_v45 = vld [vmem:[#allocation4 + $0x260] sm:$0xff] }
 0x138   :  { %v6690_v47 = vpop.f32.mrb[6].mxu0 }
 0x139   :  { %7686 = vst [vmem:[#allocation30_spill] sm:$0xff] %v6690_v47  ;;  %v6692_v48 = vpop.f32.mrb[7].mxu0  ;;  %v504_v47 = vld [vmem:[#allocation4 + $0x230] sm:$0xff]  ;;  %7707 = vst [vmem:[#allocation50_spill] sm:$0xff] %v6754_v43 }
 0x13a   :  { %7687 = vst [vmem:[#allocation31_spill] sm:$0xff] %v6692_v48  ;;  %v505_v48 = vld [vmem:[#allocation4 + $0x238] sm:$0xff] }
 0x13b   :  { %v6738_v32 = vpack.c.bf16 %v505_v48, %v504_v47  ;;  %v7705_v47 = vmov 0.0   ;;  %v522_v48 = vld [vmem:[#allocation4 + $0x2c0] sm:$0xff] }
 0x13c   :  { %v6678_v38 = vpop.eup %6234  ;;  %v6752_v44 = vpack.c.bf16 %v523_v12, %v522_v48  ;;  %v526_v48 = vld [vmem:[#allocation4 + $0x2e0] sm:$0xff]  ;;  %v527_v12 = vld [vmem:[#allocation4 + $0x2e8] sm:$0xff] }
 0x13d   :  { %387 = vmatmul.mubr.f32.vlgmr.msra.gmra.mrb[8].mxu0 %v6678_v38  ;;  %7703 = vst [vmem:[#allocation47_spill] sm:$0xff] %v6738_v32  ;;  %v6764_v42 = vpack.c.bf16 %v527_v12, %v526_v48  ;;  %v7714_v48 = vmov 0.0|0.0   ;;  %v618_v12 = vld [vmem:[#allocation4 + $0x380] sm:$0xff] }
 0x13e   :  { %594 = vmatprep.mubr.f32.mxu0 %v7559_v1  ;;  %5077 = vmatpush3.bf16.msra.mxu0 %v6720_v23  ;;  %v503_v1 = vld [vmem:[#allocation4 + $0x228] sm:$0xff]  ;;  %7706 = vst [vmem:[#allocation49_spill] sm:$0xff] %v6752_v44 }
 0x13f   :  { %5079 = vmatprep.subr.bf16.mxu0 %v6722_v30  ;;  %v6732_v19 = vpack.c.bf16 %v503_v1, %v502_v63  ;;  %v6745_v1 = vld [vmem:[%s7553_s4 + $0x8] sm:$0xff]  ;;  %7710 = vst [vmem:[#allocation53_spill] sm:$0xff] %v6764_v42  ;;  %v608_v30 = vld [vmem:[#allocation4 + $0x330] sm:$0xff] }
 0x140   :  { %7704 = vst [vmem:[#allocation48_spill] sm:$0xff] %v6745_v1 }
 0x141   :  { %7701 = vst [vmem:[#allocation45_spill] sm:$0xff] %v6732_v19 }
 0x142   :  { %5081 = vmatpush3.bf16.msra.mxu0 %v6726_v0  ;;  %v607_v0 = vld [vmem:[#allocation4 + $0x328] sm:$0xff] }
 0x143   :  { %5083 = vmatprep.subr.bf16.mxu0 %v6729_v61  ;;  %v620_v61 = vld [vmem:[#allocation4 + $0x390] sm:$0xff] }
 0x146   :  { %5085 = vmatpush3.bf16.msra.mxu0 %v6732_v19  ;;  %v529_v19 = vld [vmem:[#allocation4 + $0x2f8] sm:$0xff] }
 0x147   :  { %5087 = vmatprep.subr.bf16.mxu0 %v6735_v20  ;;  %v528_v20 = vld [vmem:[#allocation4 + $0x2f0] sm:$0xff] }
 0x14a   :  { %5089 = vmatpush3.bf16.msra.mxu0 %v6738_v32 }
 0x14b   :  { %5091 = vmatprep.subr.bf16.mxu0 %v6752_v44  ;;  %v511_v44 = vld [vmem:[#allocation4 + $0x268] sm:$0xff] }
 0x14e   :  { %5093 = vmatpush3.bf16.msra.mxu0 %v6754_v43  ;;  %v6766_v43 = vpack.c.bf16 %v511_v44, %v510_v45  ;;  %v619_v44 = vld [vmem:[#allocation4 + $0x388] sm:$0xff]  ;;  %v602_v45 = vld [vmem:[#allocation4 + $0x300] sm:$0xff] }
 0x150   :  { %7711 = vst [vmem:[#allocation54_spill] sm:$0xff] %v6766_v43 }
 0x210   :  { %v3371_v35 = vpop.f32.mrb[8].mxu0 }
 0x211   :  { %v3372_v51 = vpop.f32.mrb[9].mxu0 }
 0x212   :  { %v3373_v54 = vadd.f32 %v3372_v51, %v3371_v35  ;;  %v524_v35 = vld [vmem:[#allocation4 + $0x2d0] sm:$0xff]  ;;  %v525_v51 = vld [vmem:[#allocation4 + $0x2d8] sm:$0xff] }
 0x214   :  { %v389_v63 = vadd.f32 %v3373_v54, %v6745_v1  ;;  %v6758_v54 = vpack.c.bf16 %v525_v51, %v524_v35  ;;  %v509_v1 = vld [vmem:[#allocation4 + $0x258] sm:$0xff]  ;;  %v512_v35 = vld [vmem:[#allocation4 + $0x270] sm:$0xff] }
 0x215   :  { %v513_v51 = vld [vmem:[#allocation4 + $0x278] sm:$0xff] }
 0x216   :  { %6236 = vtanh.f32 %v389_v63  ;;  %7708 = vst [vmem:[#allocation51_spill] sm:$0xff] %v6758_v54  ;;  %v508_v63 = vld [vmem:[#allocation4 + $0x250] sm:$0xff]  ;;  %5095 = vmatprep.subr.bf16.mxu0 %v6758_v54  ;;  %v603_v54 = vld [vmem:[#allocation4 + $0x308] sm:$0xff] }
 0x217   :  { %v6760_v32 = vpack.c.bf16 %v509_v1, %v508_v63  ;;  %v6769_v1 = vpack.c.bf16 %v529_v19, %v528_v20  ;;  %v6772_v63 = vpack.c.bf16 %v513_v51, %v512_v35  ;;  %v6779_v19 = vpack.c.bf16 %v603_v54, %v602_v45  ;;  %v604_v35 = vld [vmem:[#allocation4 + $0x310] sm:$0xff]  ;;  %v605_v51 = vld [vmem:[#allocation4 + $0x318] sm:$0xff] }
 0x218   :  { %v624_v54 = vld [vmem:[#allocation4 + $0x3b0] sm:$0xff]  ;;  %v625_v45 = vld [vmem:[#allocation4 + $0x3b8] sm:$0xff] }
 0x219   :  { %7709 = vst [vmem:[#allocation52_spill] sm:$0xff] %v6760_v32  ;;  %5097 = vmatpush3.bf16.msra.mxu0 %v6760_v32  ;;  %7712 = vst [vmem:[#allocation55_spill] sm:$0xff] %v6769_v1  ;;  %v6777_v32 = vpack.c.bf16 %v619_v44, %v618_v12  ;;  %v606_v44 = vld [vmem:[#allocation4 + $0x320] sm:$0xff] }
 0x21a   :  { %5099 = vmatprep.subr.bf16.mxu0 %v6764_v42  ;;  %7713 = vst [vmem:[#allocation56_spill] sm:$0xff] %v6772_v63  ;;  %v621_v42 = vld [vmem:[#allocation4 + $0x398] sm:$0xff]  ;;  %7716 = vst [vmem:[#allocation58_spill] sm:$0xff] %v6779_v19 }
 0x21b   :  { %7715 = vst [vmem:[#allocation57_spill] sm:$0xff] %v6777_v32  ;;  %v6781_v20 = vpack.c.bf16 %v621_v42, %v620_v61  ;;  %5107 = vmatprep.subr.bf16.mxu1 %v6777_v32  ;;  %v6791_v61 = vpack.c.bf16 %v607_v0, %v606_v44  ;;  %v6794_v42 = vpack.c.bf16 %v625_v45, %v624_v54  ;;  %v6804_v0 = vld [vmem:[%s7553_s4 + $0x10] sm:$0xff]  ;;  %v610_v45 = vld [vmem:[#allocation4 + $0x340] sm:$0xff] }
 0x21d   :  { %5101 = vmatpush3.bf16.msra.mxu0 %v6766_v43  ;;  %v622_v43 = vld [vmem:[#allocation4 + $0x3a0] sm:$0xff] }
 0x21e   :  { %5103 = vmatprep.subr.bf16.mxu0 %v6769_v1  ;;  %v6785_v1 = vpack.c.bf16 %v605_v51, %v604_v35 }
 0x220   :  { %v6748_v5 = vpop.eup %6236 }
 0x221   :  { %491 = vmatmul.mubr.f32.vlgmr.msra.gmra.mrb[2].mxu1 %v6748_v5  ;;  %5105 = vmatpush3.bf16.msra.mxu0 %v6772_v63  ;;  %v623_v63 = vld [vmem:[#allocation4 + $0x3a8] sm:$0xff] }
 0x222   :  { %698 = vmatprep.mubr.f32.mxu1 %v7705_v47  ;;  %5138 = vmatprep.subr.bf16.mxu0 %v7714_v48  ;;  %v6788_v12 = vpack.c.bf16 %v623_v63, %v622_v43 }
 0x223   :  { %5109 = vmatpush3.bf16.msra.mxu1 %v6779_v19  ;;  %v609_v19 = vld [vmem:[#allocation4 + $0x338] sm:$0xff] }
 0x224   :  { %5111 = vmatprep.subr.bf16.mxu1 %v6781_v20  ;;  %v6797_v35 = vpack.c.bf16 %v609_v19, %v608_v30  ;;  %v627_v30 = vld [vmem:[#allocation4 + $0x3c8] sm:$0xff] }
 0x227   :  { %5113 = vmatpush3.bf16.msra.mxu1 %v6785_v1 }
 0x228   :  { %5115 = vmatprep.subr.bf16.mxu1 %v6788_v12 }
 0x22b   :  { %5117 = vmatpush3.bf16.msra.mxu1 %v6791_v61 }
 0x22c   :  { %5119 = vmatprep.subr.bf16.mxu1 %v6794_v42 }
 0x22f   :  { %5121 = vmatpush3.bf16.msra.mxu1 %v6797_v35 }
 0x2f4   :  { %v3406_v43 = vpop.f32.mrb[2].mxu1 }
 0x2f5   :  { %v3407_v63 = vpop.f32.mrb[3].mxu1 }
 0x2f6   :  { %v3408_v51 = vadd.f32 %v3407_v63, %v3406_v43  ;;  %v611_v43 = vld [vmem:[#allocation4 + $0x348] sm:$0xff] }
 0x2f7   :  { %v6844_v63 = vpack.c.bf16 %v611_v43, %v610_v45  ;;  %v614_v45 = vld [vmem:[#allocation4 + $0x360] sm:$0xff] }
 0x2f8   :  { %v493_v44 = vadd.f32 %v3408_v51, %v6804_v0  ;;  %v628_v51 = vld [vmem:[#allocation4 + $0x3d0] sm:$0xff] }
 0x2fa   :  { %6238 = vtanh.f32 %v493_v44  ;;  %v629_v44 = vld [vmem:[#allocation4 + $0x3d8] sm:$0xff] }
 0x304   :  { %v6239_v54 = vpop.eup %6238 }
 0x305   :  { %595 = vmatmul.mubr.f32.vlgmr.msra.gmra.mrb[10].mxu0 %v6239_v54 }
 0x306   :  { %5140 = vmatpush3.bf16.msra.mxu0 %v6504_v9  ;;  %4706 = vmatprep.mubr.msk.f32.mxu0 %vm6395_vm0, %v7705_v47 }
 0x307   :  { %5141 = vmatprep.subr.bf16.mxu0 %v7714_v48 }
 0x30a   :  { %5143 = vmatpush3.bf16.msra.mxu0 %v6513_v15 }
 0x30b   :  { %5144 = vmatprep.subr.bf16.mxu0 %v7714_v48 }
 0x30e   :  { %5146 = vmatpush3.bf16.msra.mxu0 %v6523_v21 }
 0x30f   :  { %5147 = vmatprep.subr.bf16.mxu0 %v7714_v48 }
 0x312   :  { %5149 = vmatpush3.bf16.msra.mxu0 %v6536_v28 }
 0x313   :  { %5150 = vmatprep.subr.bf16.mxu0 %v7714_v48 }
 0x316   :  { %5152 = vmatpush3.bf16.msra.mxu0 %v6546_v34 }
 0x317   :  { %5153 = vmatprep.subr.bf16.mxu0 %v7714_v48 }
 0x31a   :  { %5155 = vmatpush3.bf16.msra.mxu0 %v6556_v40 }
 0x31b   :  { %5156 = vmatprep.subr.bf16.mxu0 %v7714_v48 }
 0x31e   :  { %5158 = vmatpush3.bf16.msra.mxu0 %v6566_v46 }
 0x31f   :  { %5159 = vmatprep.subr.bf16.mxu0 %v7714_v48 }
 0x322   :  { %5161 = vmatpush3.bf16.msra.mxu0 %v6570_v52 }
 0x323   :  { %5195 = vmatprep.subr.bf16.mxu0 %v6646_v56 }
 0x325   :  { %4707 = vmatmul.mubr.f32.vlgmr.msra.gmra.mrb[12].mxu0 %v6678_v38  ;;  %v626_v38 = vld [vmem:[#allocation4 + $0x3c0] sm:$0xff] }
 0x326   :  { %913 = vmatprep.mubr.f32.mxu0 %v6239_v54  ;;  %5197 = vmatpush3.bf16.msra.mxu0 %v6648_v58  ;;  %v6842_v19 = vpack.c.bf16 %v627_v30, %v626_v38  ;;  %v6848_v54 = vpack.c.bf16 %v629_v44, %v628_v51  ;;  %v630_v38 = vld [vmem:[#allocation4 + $0x3e0] sm:$0xff]  ;;  %v631_v30 = vld [vmem:[#allocation4 + $0x3e8] sm:$0xff]  ;;  %v616_v44 = vld [vmem:[#allocation4 + $0x370] sm:$0xff] }
 0x327   :  { %5199 = vmatprep.subr.bf16.mxu0 %v6652_v2  ;;  %v6854_v43 = vpack.c.bf16 %v631_v30, %v630_v38 }
 0x328   :  { %5123 = vmatprep.subr.bf16.mxu1 %v6842_v19 }
 0x329   :  { %5125 = vmatpush3.bf16.msra.mxu1 %v6844_v63 }
 0x32a   :  { %5201 = vmatpush3.bf16.msra.mxu0 %v6654_v6  ;;  %5127 = vmatprep.subr.bf16.mxu1 %v6848_v54 }
 0x32b   :  { %5203 = vmatprep.subr.bf16.mxu0 %v6658_v13 }
 0x32e   :  { %5205 = vmatpush3.bf16.msra.mxu0 %v6660_v17 }
 0x32f   :  { %5207 = vmatprep.subr.bf16.mxu0 %v6664_v24 }
 0x332   :  { %5209 = vmatpush3.bf16.msra.mxu0 %v6666_v26 }
 0x333   :  { %5211 = vmatprep.subr.bf16.mxu0 %v6694_v55 }
 0x336   :  { %5213 = vmatpush3.bf16.msra.mxu0 %v6696_v62  ;;  %v617_v62 = vld [vmem:[#allocation4 + $0x378] sm:$0xff] }
 0x337   :  { %5215 = vmatprep.subr.bf16.mxu0 %v6700_v7 }
 0x33a   :  { %5217 = vmatpush3.bf16.msra.mxu0 %v6702_v16  ;;  %v633_v16 = vld [vmem:[#allocation4 + $0x3f8] sm:$0xff] }
 0x33b   :  { %5219 = vmatprep.subr.bf16.mxu0 %v6706_v25  ;;  %v632_v25 = vld [vmem:[#allocation4 + $0x3f0] sm:$0xff] }
 0x33c   :  { %v6858_v51 = vpack.c.bf16 %v633_v16, %v632_v25  ;;  %v6870_v16 = vld [vmem:[%s7553_s4 + $0x18] sm:$0xff] }
 0x33e   :  { %5221 = vmatpush3.bf16.msra.mxu0 %v6708_v36 }
 0x33f   :  { %5223 = vmatprep.subr.bf16.mxu0 %v6710_v37  ;;  %v612_v37 = vld [vmem:[#allocation4 + $0x350] sm:$0xff] }
 0x342   :  { %5225 = vmatpush3.bf16.msra.mxu0 %v6714_v57  ;;  %v613_v57 = vld [vmem:[#allocation4 + $0x358] sm:$0xff] }
 0x343   :  { %5259 = vmatprep.subr.bf16.mxu0 %v6777_v32  ;;  %v6850_v36 = vpack.c.bf16 %v613_v57, %v612_v37  ;;  %v615_v32 = vld [vmem:[#allocation4 + $0x368] sm:$0xff]  ;;  %v6862_v37 = vpack.c.bf16 %v617_v62, %v616_v44 }
 0x344   :  { %v6856_v7 = vpack.c.bf16 %v615_v32, %v614_v45 }
 0x345   :  { %5129 = vmatpush3.bf16.msra.mxu1 %v6850_v36 }
 0x346   :  { %5131 = vmatprep.subr.bf16.mxu1 %v6854_v43 }
 0x349   :  { %5133 = vmatpush3.bf16.msra.mxu1 %v6856_v7 }
 0x34a   :  { %5135 = vmatprep.subr.bf16.mxu1 %v6858_v51 }
 0x34d   :  { %5137 = vmatpush3.bf16.msra.mxu1 %v6862_v37 }
 0x34e   :  { %5163 = vmatprep.subr.bf16.mxu1 %v6573_v53 }
 0x3d8   :  { %v3441_v57 = vpop.f32.mrb[10].mxu0 }
 0x3d9   :  { %v3442_v25 = vpop.f32.mrb[11].mxu0 }
 0x3da   :  { %v3443_v32 = vadd.f32 %v3442_v25, %v3441_v57  ;;  %v7718_v25 = vld [vmem:[#allocation43_spill] sm:$0xff] }
 0x3dc   :  { %v597_v38 = vadd.f32 %v3443_v32, %v6870_v16  ;;  %v7719_v32 = vld [vmem:[#allocation44_spill] sm:$0xff] }
 0x3de   :  { %6240 = vtanh.f32 %v597_v38  ;;  %v7720_v38 = vld [vmem:[#allocation45_spill] sm:$0xff] }
 0x3e8   :  { %v6241_v30 = vpop.eup %6240 }
 0x3e9   :  { %699 = vmatmul.mubr.f32.vlgmr.msra.gmra.mrb[4].mxu1 %v6241_v30 }
 0x3ea   :  { %5165 = vmatpush3.bf16.msra.mxu1 %v6579_v59  ;;  %842 = vmatprep.mubr.f32.mxu1 %v6748_v5 }
 0x3eb   :  { %5167 = vmatprep.subr.bf16.mxu1 %v6582_v60 }
 0x3ee   :  { %5169 = vmatpush3.bf16.msra.mxu1 %v6586_v3 }
 0x3ef   :  { %5171 = vmatprep.subr.bf16.mxu1 %v6590_v4 }
 0x3f2   :  { %5173 = vmatpush3.bf16.msra.mxu1 %v6593_v10 }
 0x3f3   :  { %5175 = vmatprep.subr.bf16.mxu1 %v6596_v11 }
 0x3f6   :  { %5177 = vmatpush3.bf16.msra.mxu1 %v6599_v14 }
 0x3f7   :  { %5179 = vmatprep.subr.bf16.mxu1 %v6603_v18 }
 0x3f8   :  { %v771_v62 = vpop.f32.mrb[12].mxu0 }
 0x3f9   :  { %v775_v45 = vadd.f32 %v6670_v29, %v771_v62  ;;  %v4708_v44 = vpop.f32.mrb[13].mxu0  ;;  %v7717_v29 = vld [vmem:[#allocation42_spill] sm:$0xff] }
 0x3fa   :  { %5181 = vmatpush3.bf16.msra.mxu1 %v6605_v22  ;;  %v7721_v62 = vld [vmem:[#allocation46_spill] sm:$0xff]  ;;  %v7723_v44 = vld [vmem:[#allocation49_spill] sm:$0xff] }
 0x3fb   :  { %v776_v5 = vadd.f32 %v775_v45, %v6675_v33  ;;  %5183 = vmatprep.subr.bf16.mxu1 %v6615_v27  ;;  %v7722_v45 = vld [vmem:[#allocation47_spill] sm:$0xff] }
 0x3fd   :  { %6242 = vtanh.f32 %v776_v5  ;;  %v7724_v5 = vld [vmem:[#allocation50_spill] sm:$0xff] }
 0x3fe   :  { %5185 = vmatpush3.bf16.msra.mxu1 %v6617_v31 }
 0x3ff   :  { %5187 = vmatprep.subr.bf16.mxu1 %v6627_v39 }
 0x402   :  { %5189 = vmatpush3.bf16.msra.mxu1 %v6629_v41 }
 0x403   :  { %5191 = vmatprep.subr.bf16.mxu1 %v6638_v49 }
 0x406   :  { %5193 = vmatpush3.bf16.msra.mxu1 %v6641_v50 }
 0x407   :  { %v6891_v57 = vpop.eup %6242  ;;  %5227 = vmatprep.subr.bf16.mxu1 %v6718_v8  ;;  %v7725_v8 = vld [vmem:[#allocation51_spill] sm:$0xff] }
 0x409   :  { %843 = vmatmul.mubr.f32.vlgmr.msra.gmra.mrb[6].mxu1 %v6891_v57 }
 0x40a   :  { %984 = vmatprep.mubr.f32.mxu1 %v6241_v30  ;;  %5229 = vmatpush3.bf16.msra.mxu1 %v6720_v23  ;;  %v7726_v30 = vld [vmem:[#allocation52_spill] sm:$0xff]  ;;  %v7727_v23 = vld [vmem:[#allocation53_spill] sm:$0xff] }
 0x40b   :  { %5231 = vmatprep.subr.bf16.mxu1 %v7717_v29  ;;  %v7728_v29 = vld [vmem:[#allocation54_spill] sm:$0xff] }
 0x40e   :  { %5233 = vmatpush3.bf16.msra.mxu1 %v7718_v25  ;;  %v7729_v25 = vld [vmem:[#allocation55_spill] sm:$0xff] }
 0x40f   :  { %5235 = vmatprep.subr.bf16.mxu1 %v7719_v32  ;;  %v7730_v32 = vld [vmem:[#allocation56_spill] sm:$0xff] }
 0x412   :  { %5237 = vmatpush3.bf16.msra.mxu1 %v7720_v38 }
 0x413   :  { %5239 = vmatprep.subr.bf16.mxu1 %v7721_v62 }
 0x416   :  { %5241 = vmatpush3.bf16.msra.mxu1 %v7722_v45 }
 0x417   :  { %5243 = vmatprep.subr.bf16.mxu1 %v7723_v44 }
 0x41a   :  { %5245 = vmatpush3.bf16.msra.mxu1 %v7724_v5  ;;  %v6914_v5 = vld [vmem:[%s7553_s4 + $0x20] sm:$0xff] }
 0x41b   :  { %5247 = vmatprep.subr.bf16.mxu1 %v7725_v8 }
 0x41e   :  { %5249 = vmatpush3.bf16.msra.mxu1 %v7726_v30 }
 0x41f   :  { %5251 = vmatprep.subr.bf16.mxu1 %v7727_v23 }
 0x422   :  { %5253 = vmatpush3.bf16.msra.mxu1 %v7728_v29  ;;  %v7731_v29 = vld [vmem:[#allocation48_spill] sm:$0xff] }
 0x423   :  { %5255 = vmatprep.subr.bf16.mxu1 %v7729_v25 }
 0x426   :  { %5257 = vmatpush3.bf16.msra.mxu1 %v7730_v32 }
 0x427   :  { %5290 = vmatprep.subr.bf16.mxu1 %v7714_v48 }
 0x4bc   :  { %v3476_v62 = vpop.f32.mrb[4].mxu1 }
 0x4bd   :  { %v3477_v45 = vpop.f32.mrb[5].mxu1 }
 0x4be   :  { %v3478_v38 = vadd.f32 %v3477_v45, %v3476_v62  ;;  %v7732_v62 = vld [vmem:[#allocation58_spill] sm:$0xff]  ;;  %v7733_v45 = vld [vmem:[#allocation33_spill] sm:$0xff] }
 0x4c0   :  { %v701_v23 = vadd.f32 %v3478_v38, %v6914_v5 }
 0x4dc   :  { %v3528_v8 = vpop.f32.mrb[6].mxu1 }
 0x4dd   :  { %v3529_v30 = vpop.f32.mrb[7].mxu1 }
 0x4de   :  { %v3530_v44 = vadd.f32 %v3529_v30, %v3528_v8  ;;  %v7736_v30 = vld [vmem:[#allocation36_spill] sm:$0xff] }
 0x4e0   :  { %v845_v50 = vadd.f32 %v3530_v44, %v7731_v29  ;;  %v7735_v44 = vld [vmem:[#allocation35_spill] sm:$0xff] }
 0x4e2   :  { %6244 = vtanh.f32 %v845_v50 }
 0x4e3   :  { %6246 = vtanh.f32 %v701_v23 }
 0x4ec   :  { %v6918_v32 = vpop.eup %6244 }
 0x4ed   :  { %v6247_v25 = vpop.eup %6246  ;;  %914 = vmatmul.mubr.f32.vlgmr.msra.gmra.mrb[14].mxu0 %v6918_v32 }
 0x4ee   :  { %1055 = vmatprep.mubr.f32.mxu0 %v6247_v25  ;;  %5261 = vmatpush3.bf16.msra.mxu0 %v7732_v62 }
 0x4ef   :  { %5263 = vmatprep.subr.bf16.mxu0 %v6781_v20 }
 0x4f2   :  { %5265 = vmatpush3.bf16.msra.mxu0 %v6785_v1 }
 0x4f3   :  { %5267 = vmatprep.subr.bf16.mxu0 %v6788_v12 }
 0x4f6   :  { %5269 = vmatpush3.bf16.msra.mxu0 %v6791_v61 }
 0x4f7   :  { %5271 = vmatprep.subr.bf16.mxu0 %v6794_v42 }
 0x4fa   :  { %5273 = vmatpush3.bf16.msra.mxu0 %v6797_v35 }
 0x4fb   :  { %5275 = vmatprep.subr.bf16.mxu0 %v6842_v19 }
 0x4fe   :  { %5277 = vmatpush3.bf16.msra.mxu0 %v6844_v63 }
 0x4ff   :  { %5279 = vmatprep.subr.bf16.mxu0 %v6848_v54 }
 0x502   :  { %5281 = vmatpush3.bf16.msra.mxu0 %v6850_v36 }
 0x503   :  { %5283 = vmatprep.subr.bf16.mxu0 %v6854_v43 }
 0x506   :  { %5285 = vmatpush3.bf16.msra.mxu0 %v6856_v7 }
 0x507   :  { %5287 = vmatprep.subr.bf16.mxu0 %v6858_v51 }
 0x50a   :  { %5289 = vmatpush3.bf16.msra.mxu0 %v6862_v37 }
 0x50b   :  { %5315 = vmatprep.subr.bf16.mxu0 %v6573_v53 }
 0x5c0   :  { %v3563_v50 = vpop.f32.mrb[14].mxu0 }
 0x5c1   :  { %v3564_v8 = vpop.f32.mrb[15].mxu0 }
 0x5c2   :  { %v3565_v23 = vadd.f32 %v3564_v8, %v3563_v50  ;;  %v7737_v50 = vld [vmem:[#allocation37_spill] sm:$0xff]  ;;  %v7738_v8 = vld [vmem:[#allocation38_spill] sm:$0xff] }
 0x5c4   :  { %v916_v25 = vadd.f32 %v3565_v23, %v6804_v0  ;;  %v7739_v23 = vld [vmem:[#allocation39_spill] sm:$0xff] }
 0x5c6   :  { %6248 = vtanh.f32 %v916_v25  ;;  %v7740_v25 = vld [vmem:[#allocation57_spill] sm:$0xff] }
 0x5d0   :  { %v6249_v38 = vpop.eup %6248 }
 0x5d1   :  { %985 = vmatmul.mubr.f32.vlgmr.msra.gmra.mrb[8].mxu1 %v6249_v38 }
 0x5d2   :  { %5292 = vmatpush3.bf16.msra.mxu1 %v6504_v9  ;;  %4741 = vmatprep.mubr.msk.f32.mxu1 %vm6395_vm0, %v7705_v47 }
 0x5d3   :  { %5293 = vmatprep.subr.bf16.mxu1 %v7714_v48 }
 0x5d6   :  { %5295 = vmatpush3.bf16.msra.mxu1 %v6513_v15 }
 0x5d7   :  { %5296 = vmatprep.subr.bf16.mxu1 %v7714_v48 }
 0x5da   :  { %5298 = vmatpush3.bf16.msra.mxu1 %v6523_v21 }
 0x5db   :  { %5299 = vmatprep.subr.bf16.mxu1 %v7714_v48 }
 0x5de   :  { %5301 = vmatpush3.bf16.msra.mxu1 %v6536_v28 }
 0x5df   :  { %5302 = vmatprep.subr.bf16.mxu1 %v7714_v48 }
 0x5e2   :  { %5304 = vmatpush3.bf16.msra.mxu1 %v6546_v34 }
 0x5e3   :  { %5305 = vmatprep.subr.bf16.mxu1 %v7714_v48 }
 0x5e6   :  { %5307 = vmatpush3.bf16.msra.mxu1 %v6556_v40 }
 0x5e7   :  { %5308 = vmatprep.subr.bf16.mxu1 %v7714_v48 }
 0x5ea   :  { %5310 = vmatpush3.bf16.msra.mxu1 %v6566_v46 }
 0x5eb   :  { %5311 = vmatprep.subr.bf16.mxu1 %v7714_v48 }
 0x5ee   :  { %5313 = vmatpush3.bf16.msra.mxu1 %v6570_v52 }
 0x5ef   :  { %5347 = vmatprep.subr.bf16.mxu1 %v6646_v56 }
 0x5f1   :  { %4742 = vmatmul.mubr.f32.vlgmr.msra.gmra.mrb[10].mxu1 %v6891_v57  ;;  %v7734_v57 = vld [vmem:[#allocation34_spill] sm:$0xff] }
 0x5f2   :  { %1270 = vmatprep.mubr.f32.mxu1 %v6249_v38  ;;  %5349 = vmatpush3.bf16.msra.mxu1 %v6648_v58 }
 0x5f3   :  { %5351 = vmatprep.subr.bf16.mxu1 %v6652_v2 }
 0x5f6   :  { %5353 = vmatpush3.bf16.msra.mxu1 %v6654_v6 }
 0x5f7   :  { %5355 = vmatprep.subr.bf16.mxu1 %v6658_v13 }
 0x5fa   :  { %5357 = vmatpush3.bf16.msra.mxu1 %v6660_v17 }
 0x5fb   :  { %5359 = vmatprep.subr.bf16.mxu1 %v6664_v24 }
 0x5fe   :  { %5361 = vmatpush3.bf16.msra.mxu1 %v6666_v26 }
 0x5ff   :  { %5363 = vmatprep.subr.bf16.mxu1 %v6694_v55 }
 0x602   :  { %5365 = vmatpush3.bf16.msra.mxu1 %v7733_v45 }
 0x603   :  { %5367 = vmatprep.subr.bf16.mxu1 %v7734_v57 }
 0x606   :  { %5369 = vmatpush3.bf16.msra.mxu1 %v7735_v44 }
 0x607   :  { %5371 = vmatprep.subr.bf16.mxu1 %v7736_v30 }
 0x60a   :  { %5373 = vmatpush3.bf16.msra.mxu1 %v7737_v50 }
 0x60b   :  { %5375 = vmatprep.subr.bf16.mxu1 %v7738_v8 }
 0x60e   :  { %5377 = vmatpush3.bf16.msra.mxu1 %v7739_v23 }
 0x60f   :  { %5411 = vmatprep.subr.bf16.mxu1 %v7740_v25 }
 0x6a4   :  { %v3598_v38 = vpop.f32.mrb[8].mxu1 }
 0x6a5   :  { %v3599_v26 = vpop.f32.mrb[9].mxu1 }
 0x6a6   :  { %v3600_v24 = vadd.f32 %v3599_v26, %v3598_v38  ;;  %v7741_v26 = vld [vmem:[#allocation27_spill] sm:$0xff] }
 0x6a8   :  { %v987_v55 = vadd.f32 %v3600_v24, %v6870_v16 }
 0x6aa   :  { %6250 = vtanh.f32 %v987_v55 }
 0x6b4   :  { %v6251_v45 = vpop.eup %6250 }
 0x6b5   :  { %1056 = vmatmul.mubr.f32.vlgmr.msra.gmra.mrb[16].mxu0 %v6251_v45 }
 0x6b6   :  { %5317 = vmatpush3.bf16.msra.mxu0 %v6579_v59  ;;  %1199 = vmatprep.mubr.f32.mxu0 %v6918_v32 }
 0x6b7   :  { %5319 = vmatprep.subr.bf16.mxu0 %v6582_v60 }
 0x6ba   :  { %5321 = vmatpush3.bf16.msra.mxu0 %v6586_v3 }
 0x6bb   :  { %5323 = vmatprep.subr.bf16.mxu0 %v6590_v4 }
 0x6be   :  { %5325 = vmatpush3.bf16.msra.mxu0 %v6593_v10 }
 0x6bf   :  { %5327 = vmatprep.subr.bf16.mxu0 %v6596_v11 }
 0x6c2   :  { %5329 = vmatpush3.bf16.msra.mxu0 %v6599_v14 }
 0x6c3   :  { %5331 = vmatprep.subr.bf16.mxu0 %v6603_v18  ;;  %v7742_v18 = vld [vmem:[#allocation23_spill] sm:$0xff] }
 0x6c4   :  { %v1128_v24 = vpop.f32.mrb[10].mxu1 }
 0x6c5   :  { %v1132_v55 = vadd.f32 %v1128_v24, %v7741_v26  ;;  %v4743_v38 = vpop.f32.mrb[11].mxu1  ;;  %v7743_v24 = vld [vmem:[#allocation40_spill] sm:$0xff]  ;;  %v7744_v26 = vld [vmem:[#allocation41_spill] sm:$0xff] }
 0x6c6   :  { %5333 = vmatpush3.bf16.msra.mxu0 %v6605_v22  ;;  %v7746_v38 = vld [vmem:[#allocation43_spill] sm:$0xff] }
 0x6c7   :  { %v1133_v32 = vadd.f32 %v1132_v55, %v6675_v33  ;;  %5335 = vmatprep.subr.bf16.mxu0 %v6615_v27  ;;  %v7745_v55 = vld [vmem:[#allocation42_spill] sm:$0xff] }
 0x6c9   :  { %6252 = vtanh.f32 %v1133_v32  ;;  %v7747_v32 = vld [vmem:[#allocation44_spill] sm:$0xff] }
 0x6ca   :  { %5337 = vmatpush3.bf16.msra.mxu0 %v6617_v31  ;;  %v7753_v31 = vld [vmem:[#allocation51_spill] sm:$0xff] }
 0x6cb   :  { %5339 = vmatprep.subr.bf16.mxu0 %v6627_v39  ;;  %v7751_v39 = vld [vmem:[#allocation49_spill] sm:$0xff] }
 0x6ce   :  { %5341 = vmatpush3.bf16.msra.mxu0 %v6629_v41  ;;  %v7748_v41 = vld [vmem:[#allocation45_spill] sm:$0xff] }
 0x6cf   :  { %5343 = vmatprep.subr.bf16.mxu0 %v6638_v49  ;;  %v7749_v49 = vld [vmem:[#allocation46_spill] sm:$0xff] }
 0x6d2   :  { %5345 = vmatpush3.bf16.msra.mxu0 %v7742_v18  ;;  %v7750_v18 = vld [vmem:[#allocation47_spill] sm:$0xff] }
 0x6d3   :  { %v6992_v14 = vpop.eup %6252  ;;  %5379 = vmatprep.subr.bf16.mxu0 %v7743_v24  ;;  %v7752_v24 = vld [vmem:[#allocation50_spill] sm:$0xff] }
 0x6d5   :  { %1200 = vmatmul.mubr.f32.vlgmr.msra.gmra.mrb[18].mxu0 %v6992_v14 }
 0x6d6   :  { %1341 = vmatprep.mubr.f32.mxu0 %v6251_v45  ;;  %5381 = vmatpush3.bf16.msra.mxu0 %v7744_v26  ;;  %v7754_v45 = vld [vmem:[#allocation52_spill] sm:$0xff]  ;;  %v7755_v26 = vld [vmem:[#allocation53_spill] sm:$0xff] }
 0x6d7   :  { %5383 = vmatprep.subr.bf16.mxu0 %v7745_v55  ;;  %v7756_v55 = vld [vmem:[#allocation54_spill] sm:$0xff] }
 0x6da   :  { %5385 = vmatpush3.bf16.msra.mxu0 %v7746_v38  ;;  %v7757_v38 = vld [vmem:[#allocation55_spill] sm:$0xff] }
 0x6db   :  { %5387 = vmatprep.subr.bf16.mxu0 %v7747_v32  ;;  %v7758_v32 = vld [vmem:[#allocation56_spill] sm:$0xff] }
 0x6de   :  { %5389 = vmatpush3.bf16.msra.mxu0 %v7748_v41 }
 0x6df   :  { %5391 = vmatprep.subr.bf16.mxu0 %v7749_v49 }
 0x6e2   :  { %5393 = vmatpush3.bf16.msra.mxu0 %v7750_v18 }
 0x6e3   :  { %5395 = vmatprep.subr.bf16.mxu0 %v7751_v39 }
 0x6e6   :  { %5397 = vmatpush3.bf16.msra.mxu0 %v7752_v24 }
 0x6e7   :  { %5399 = vmatprep.subr.bf16.mxu0 %v7753_v31 }
 0x6ea   :  { %5401 = vmatpush3.bf16.msra.mxu0 %v7754_v45 }
 0x6eb   :  { %5403 = vmatprep.subr.bf16.mxu0 %v7755_v26 }
 0x6ee   :  { %5405 = vmatpush3.bf16.msra.mxu0 %v7756_v55 }
 0x6ef   :  { %5407 = vmatprep.subr.bf16.mxu0 %v7757_v38 }
 0x6f2   :  { %5409 = vmatpush3.bf16.msra.mxu0 %v7758_v32 }
 0x6f3   :  { %5442 = vmatprep.subr.bf16.mxu0 %v7714_v48 }
 0x788   :  { %v3633_v49 = vpop.f32.mrb[16].mxu0 }
 0x789   :  { %v3634_v18 = vpop.f32.mrb[17].mxu0 }
 0x78a   :  { %v3635_v41 = vadd.f32 %v3634_v18, %v3633_v49  ;;  %v7759_v49 = vld [vmem:[#allocation24_spill] sm:$0xff] }
 0x78c   :  { %v1058_v31 = vadd.f32 %v3635_v41, %v6914_v5 }
 0x7a8   :  { %v3685_v39 = vpop.f32.mrb[18].mxu0 }
 0x7a9   :  { %v3686_v27 = vpop.f32.mrb[19].mxu0 }
 0x7aa   :  { %v3687_v24 = vadd.f32 %v3686_v27, %v3685_v39 }
 0x7ac   :  { %v1202_v45 = vadd.f32 %v3687_v24, %v7731_v29  ;;  %v7760_v24 = vld [vmem:[#allocation25_spill] sm:$0xff] }
 0x7ae   :  { %6254 = vtanh.f32 %v1202_v45  ;;  %v7762_v45 = vld [vmem:[#allocation33_spill] sm:$0xff] }
 0x7af   :  { %6256 = vtanh.f32 %v1058_v31 }
 0x7b8   :  { %v7014_v26 = vpop.eup %6254 }
 0x7b9   :  { %v6257_v55 = vpop.eup %6256  ;;  %1271 = vmatmul.mubr.f32.vlgmr.msra.gmra.mrb[12].mxu1 %v7014_v26 }
 0x7ba   :  { %1412 = vmatprep.mubr.f32.mxu1 %v6257_v55  ;;  %5413 = vmatpush3.bf16.msra.mxu1 %v7732_v62  ;;  %v7761_v55 = vld [vmem:[#allocation32_spill] sm:$0xff] }
 0x7bb   :  { %5415 = vmatprep.subr.bf16.mxu1 %v6781_v20 }
 0x7be   :  { %5417 = vmatpush3.bf16.msra.mxu1 %v6785_v1 }
 0x7bf   :  { %5419 = vmatprep.subr.bf16.mxu1 %v6788_v12 }
 0x7c2   :  { %5421 = vmatpush3.bf16.msra.mxu1 %v6791_v61 }
 0x7c3   :  { %5423 = vmatprep.subr.bf16.mxu1 %v6794_v42 }
 0x7c6   :  { %5425 = vmatpush3.bf16.msra.mxu1 %v6797_v35 }
 0x7c7   :  { %5427 = vmatprep.subr.bf16.mxu1 %v6842_v19 }
 0x7ca   :  { %5429 = vmatpush3.bf16.msra.mxu1 %v6844_v63 }
 0x7cb   :  { %5431 = vmatprep.subr.bf16.mxu1 %v6848_v54 }
 0x7ce   :  { %5433 = vmatpush3.bf16.msra.mxu1 %v6850_v36 }
 0x7cf   :  { %5435 = vmatprep.subr.bf16.mxu1 %v6854_v43 }
 0x7d2   :  { %5437 = vmatpush3.bf16.msra.mxu1 %v6856_v7 }
 0x7d3   :  { %5439 = vmatprep.subr.bf16.mxu1 %v6858_v51 }
 0x7d6   :  { %5441 = vmatpush3.bf16.msra.mxu1 %v6862_v37 }
 0x7d7   :  { %5467 = vmatprep.subr.bf16.mxu1 %v6573_v53 }
 0x88c   :  { %v3720_v18 = vpop.f32.mrb[12].mxu1 }
 0x88d   :  { %v3721_v27 = vpop.f32.mrb[13].mxu1 }
 0x88e   :  { %v3722_v31 = vadd.f32 %v3721_v27, %v3720_v18 }
 0x890   :  { %v1273_v39 = vadd.f32 %v3722_v31, %v6804_v0 }
 0x892   :  { %6258 = vtanh.f32 %v1273_v39 }
 0x89c   :  { %v6259_v41 = vpop.eup %6258 }
 0x89d   :  { %1342 = vmatmul.mubr.f32.vlgmr.msra.gmra.mrb[20].mxu0 %v6259_v41 }
 0x89e   :  { %5444 = vmatpush3.bf16.msra.mxu0 %v6504_v9  ;;  %4776 = vmatprep.mubr.msk.f32.mxu0 %vm6395_vm0, %v7705_v47 }
 0x89f   :  { %5445 = vmatprep.subr.bf16.mxu0 %v7714_v48 }
 0x8a2   :  { %5447 = vmatpush3.bf16.msra.mxu0 %v6513_v15 }
 0x8a3   :  { %5448 = vmatprep.subr.bf16.mxu0 %v7714_v48 }
 0x8a6   :  { %5450 = vmatpush3.bf16.msra.mxu0 %v6523_v21 }
 0x8a7   :  { %5451 = vmatprep.subr.bf16.mxu0 %v7714_v48 }
 0x8aa   :  { %5453 = vmatpush3.bf16.msra.mxu0 %v6536_v28 }
 0x8ab   :  { %5454 = vmatprep.subr.bf16.mxu0 %v7714_v48 }
 0x8ae   :  { %5456 = vmatpush3.bf16.msra.mxu0 %v6546_v34 }
 0x8af   :  { %5457 = vmatprep.subr.bf16.mxu0 %v7714_v48 }
 0x8b2   :  { %5459 = vmatpush3.bf16.msra.mxu0 %v6556_v40 }
 0x8b3   :  { %5460 = vmatprep.subr.bf16.mxu0 %v7714_v48 }
 0x8b6   :  { %5462 = vmatpush3.bf16.msra.mxu0 %v6566_v46 }
 0x8b7   :  { %5463 = vmatprep.subr.bf16.mxu0 %v7714_v48 }
 0x8ba   :  { %5465 = vmatpush3.bf16.msra.mxu0 %v6570_v52 }
 0x8bb   :  { %5499 = vmatprep.subr.bf16.mxu0 %v6646_v56 }
 0x8bd   :  { %4777 = vmatmul.mubr.f32.vlgmr.msra.gmra.mrb[22].mxu0 %v6992_v14 }
 0x8be   :  { %1627 = vmatprep.mubr.f32.mxu0 %v6259_v41  ;;  %5501 = vmatpush3.bf16.msra.mxu0 %v6648_v58  ;;  %v7763_v41 = vld [vmem:[#allocation15_spill] sm:$0xff] }
 0x8bf   :  { %5503 = vmatprep.subr.bf16.mxu0 %v6652_v2 }
 0x8c2   :  { %5505 = vmatpush3.bf16.msra.mxu0 %v6654_v6 }
 0x8c3   :  { %5507 = vmatprep.subr.bf16.mxu0 %v6658_v13 }
 0x8c6   :  { %5509 = vmatpush3.bf16.msra.mxu0 %v6660_v17 }
 0x8c7   :  { %5511 = vmatprep.subr.bf16.mxu0 %v7759_v49 }
 0x8ca   :  { %5513 = vmatpush3.bf16.msra.mxu0 %v7760_v24 }
 0x8cb   :  { %5515 = vmatprep.subr.bf16.mxu0 %v7761_v55 }
 0x8ce   :  { %5517 = vmatpush3.bf16.msra.mxu0 %v7762_v45 }
 0x8cf   :  { %5519 = vmatprep.subr.bf16.mxu0 %v7734_v57 }
 0x8d2   :  { %5521 = vmatpush3.bf16.msra.mxu0 %v7735_v44 }
 0x8d3   :  { %5523 = vmatprep.subr.bf16.mxu0 %v7736_v30 }
 0x8d6   :  { %5525 = vmatpush3.bf16.msra.mxu0 %v7737_v50 }
 0x8d7   :  { %5527 = vmatprep.subr.bf16.mxu0 %v7738_v8 }
 0x8da   :  { %5529 = vmatpush3.bf16.msra.mxu0 %v7739_v23 }
 0x8db   :  { %5563 = vmatprep.subr.bf16.mxu0 %v7740_v25 }
 0x970   :  { %v3755_v14 = vpop.f32.mrb[20].mxu0 }
 0x971   :  { %v3756_v18 = vpop.f32.mrb[21].mxu0 }
 0x972   :  { %v3757_v27 = vadd.f32 %v3756_v18, %v3755_v14  ;;  %v7764_v14 = vld [vmem:[#allocation16_spill] sm:$0xff] }
 0x974   :  { %v1344_v31 = vadd.f32 %v3757_v27, %v6870_v16  ;;  %v7765_v27 = vld [vmem:[#allocation26_spill] sm:$0xff] }
 0x976   :  { %6260 = vtanh.f32 %v1344_v31 }
 0x980   :  { %v6261_v39 = vpop.eup %6260 }
 0x981   :  { %1413 = vmatmul.mubr.f32.vlgmr.msra.gmra.mrb[14].mxu1 %v6261_v39 }
 0x982   :  { %5469 = vmatpush3.bf16.msra.mxu1 %v6579_v59  ;;  %1556 = vmatprep.mubr.f32.mxu1 %v7014_v26 }
 0x983   :  { %5471 = vmatprep.subr.bf16.mxu1 %v6582_v60  ;;  %v7766_v60 = vld [vmem:[#allocation18_spill] sm:$0xff] }
 0x986   :  { %5473 = vmatpush3.bf16.msra.mxu1 %v6586_v3 }
 0x987   :  { %5475 = vmatprep.subr.bf16.mxu1 %v6590_v4  ;;  %v7767_v4 = vld [vmem:[#allocation19_spill] sm:$0xff] }
 0x98a   :  { %5477 = vmatpush3.bf16.msra.mxu1 %v6593_v10  ;;  %v7768_v10 = vld [vmem:[#allocation20_spill] sm:$0xff] }
 0x98b   :  { %5479 = vmatprep.subr.bf16.mxu1 %v6596_v11  ;;  %v7769_v11 = vld [vmem:[#allocation21_spill] sm:$0xff] }
 0x98e   :  { %5481 = vmatpush3.bf16.msra.mxu1 %v7763_v41  ;;  %v7770_v41 = vld [vmem:[#allocation22_spill] sm:$0xff] }
 0x98f   :  { %5483 = vmatprep.subr.bf16.mxu1 %v7764_v14  ;;  %v7771_v14 = vld [vmem:[#allocation23_spill] sm:$0xff] }
 0x990   :  { %v1485_v18 = vpop.f32.mrb[22].mxu0 }
 0x991   :  { %v1489_v31 = vadd.f32 %v7765_v27, %v1485_v18  ;;  %v4778_v59 = vpop.f32.mrb[23].mxu0  ;;  %v7774_v18 = vld [vmem:[#allocation42_spill] sm:$0xff]  ;;  %v7775_v27 = vld [vmem:[#allocation43_spill] sm:$0xff] }
 0x992   :  { %5485 = vmatpush3.bf16.msra.mxu1 %v6605_v22  ;;  %v7772_v59 = vld [vmem:[#allocation40_spill] sm:$0xff] }
 0x993   :  { %v1490_v26 = vadd.f32 %v1489_v31, %v6675_v33  ;;  %5487 = vmatprep.subr.bf16.mxu1 %v7766_v60  ;;  %v7773_v33 = vld [vmem:[#allocation41_spill] sm:$0xff]  ;;  %v7776_v31 = vld [vmem:[#allocation44_spill] sm:$0xff] }
 0x995   :  { %6262 = vtanh.f32 %v1490_v26  ;;  %v7777_v26 = vld [vmem:[#allocation45_spill] sm:$0xff] }
 0x996   :  { %5489 = vmatpush3.bf16.msra.mxu1 %v7767_v4 }
 0x997   :  { %5491 = vmatprep.subr.bf16.mxu1 %v7768_v10  ;;  %v7782_v10 = vld [vmem:[#allocation51_spill] sm:$0xff] }
 0x99a   :  { %5493 = vmatpush3.bf16.msra.mxu1 %v7769_v11  ;;  %v7780_v11 = vld [vmem:[#allocation49_spill] sm:$0xff] }
 0x99b   :  { %5495 = vmatprep.subr.bf16.mxu1 %v7770_v41  ;;  %v7778_v41 = vld [vmem:[#allocation46_spill] sm:$0xff] }
 0x99e   :  { %5497 = vmatpush3.bf16.msra.mxu1 %v7771_v14  ;;  %v7779_v14 = vld [vmem:[#allocation47_spill] sm:$0xff] }
 0x99f   :  { %v7088_v3 = vpop.eup %6262  ;;  %5531 = vmatprep.subr.bf16.mxu1 %v7772_v59  ;;  %v7781_v59 = vld [vmem:[#allocation50_spill] sm:$0xff] }
 0x9a1   :  { %1557 = vmatmul.mubr.f32.vlgmr.msra.gmra.mrb[16].mxu1 %v7088_v3 }
 0x9a2   :  { %1698 = vmatprep.mubr.f32.mxu1 %v6261_v39  ;;  %5533 = vmatpush3.bf16.msra.mxu1 %v7773_v33  ;;  %v7783_v39 = vld [vmem:[#allocation52_spill] sm:$0xff]  ;;  %v7784_v33 = vld [vmem:[#allocation53_spill] sm:$0xff] }
 0x9a3   :  { %5535 = vmatprep.subr.bf16.mxu1 %v7774_v18  ;;  %v7785_v18 = vld [vmem:[#allocation54_spill] sm:$0xff] }
 0x9a6   :  { %5537 = vmatpush3.bf16.msra.mxu1 %v7775_v27 }
 0x9a7   :  { %5539 = vmatprep.subr.bf16.mxu1 %v7776_v31 }
 0x9aa   :  { %5541 = vmatpush3.bf16.msra.mxu1 %v7777_v26 }
 0x9ab   :  { %5543 = vmatprep.subr.bf16.mxu1 %v7778_v41 }
 0x9ae   :  { %5545 = vmatpush3.bf16.msra.mxu1 %v7779_v14 }
 0x9af   :  { %5547 = vmatprep.subr.bf16.mxu1 %v7780_v11 }
 0x9b2   :  { %5549 = vmatpush3.bf16.msra.mxu1 %v7781_v59 }
 0x9b3   :  { %5551 = vmatprep.subr.bf16.mxu1 %v7782_v10 }
 0x9b6   :  { %5553 = vmatpush3.bf16.msra.mxu1 %v7783_v39 }
 0x9b7   :  { %5555 = vmatprep.subr.bf16.mxu1 %v7784_v33 }
 0x9ba   :  { %5557 = vmatpush3.bf16.msra.mxu1 %v7785_v18 }
 0x9bb   :  { %5559 = vmatprep.subr.bf16.mxu1 %v7757_v38 }
 0x9be   :  { %5561 = vmatpush3.bf16.msra.mxu1 %v7758_v32 }
 0x9bf   :  { %5594 = vmatprep.subr.bf16.mxu1 %v7714_v48 }
 0xa54   :  { %v3790_v41 = vpop.f32.mrb[14].mxu1 }
 0xa55   :  { %v3791_v14 = vpop.f32.mrb[15].mxu1 }
 0xa56   :  { %v3792_v26 = vadd.f32 %v3791_v14, %v3790_v41 }
 0xa58   :  { %v1415_v10 = vadd.f32 %v3792_v26, %v6914_v5  ;;  %v7786_v26 = vld [vmem:[#allocation9_spill] sm:$0xff] }
 0xa74   :  { %v3842_v11 = vpop.f32.mrb[16].mxu1 }
 0xa75   :  { %v3843_v31 = vpop.f32.mrb[17].mxu1 }
 0xa76   :  { %v3844_v59 = vadd.f32 %v3843_v31, %v3842_v11 }
 0xa78   :  { %v1559_v39 = vadd.f32 %v3844_v59, %v7731_v29 }
 0xa7a   :  { %6264 = vtanh.f32 %v1559_v39  ;;  %v7787_v39 = vld [vmem:[#allocation10_spill] sm:$0xff] }
 0xa7b   :  { %6266 = vtanh.f32 %v1415_v10 }
 0xa84   :  { %v7110_v33 = vpop.eup %6264 }
 0xa85   :  { %v6267_v18 = vpop.eup %6266  ;;  %1628 = vmatmul.mubr.f32.vlgmr.msra.gmra.mrb[24].mxu0 %v7110_v33 }
 0xa86   :  { %1769 = vmatprep.mubr.f32.mxu0 %v6267_v18  ;;  %5565 = vmatpush3.bf16.msra.mxu0 %v7732_v62 }
 0xa87   :  { %5567 = vmatprep.subr.bf16.mxu0 %v6781_v20 }
 0xa8a   :  { %5569 = vmatpush3.bf16.msra.mxu0 %v6785_v1 }
 0xa8b   :  { %5571 = vmatprep.subr.bf16.mxu0 %v6788_v12 }
 0xa8e   :  { %5573 = vmatpush3.bf16.msra.mxu0 %v6791_v61 }
 0xa8f   :  { %5575 = vmatprep.subr.bf16.mxu0 %v6794_v42 }
 0xa92   :  { %5577 = vmatpush3.bf16.msra.mxu0 %v6797_v35 }
 0xa93   :  { %5579 = vmatprep.subr.bf16.mxu0 %v6842_v19 }
 0xa96   :  { %5581 = vmatpush3.bf16.msra.mxu0 %v6844_v63 }
 0xa97   :  { %5583 = vmatprep.subr.bf16.mxu0 %v6848_v54 }
 0xa9a   :  { %5585 = vmatpush3.bf16.msra.mxu0 %v6850_v36 }
 0xa9b   :  { %5587 = vmatprep.subr.bf16.mxu0 %v6854_v43 }
 0xa9e   :  { %5589 = vmatpush3.bf16.msra.mxu0 %v6856_v7 }
 0xa9f   :  { %5591 = vmatprep.subr.bf16.mxu0 %v6858_v51 }
 0xaa2   :  { %5593 = vmatpush3.bf16.msra.mxu0 %v6862_v37 }
 0xaa3   :  { %5619 = vmatprep.subr.bf16.mxu0 %v6573_v53 }
 0xb58   :  { %v3877_v10 = vpop.f32.mrb[24].mxu0 }
 0xb59   :  { %v3878_v11 = vpop.f32.mrb[25].mxu0 }
 0xb5a   :  { %v3879_v29 = vadd.f32 %v3878_v11, %v3877_v10  ;;  %v7788_v10 = vld [vmem:[#allocation11_spill] sm:$0xff]  ;;  %v7789_v11 = vld [vmem:[#allocation12_spill] sm:$0xff] }
 0xb5c   :  { %v1630_v41 = vadd.f32 %v3879_v29, %v6804_v0  ;;  %v7790_v29 = vld [vmem:[#allocation13_spill] sm:$0xff] }
 0xb5e   :  { %6268 = vtanh.f32 %v1630_v41  ;;  %v7791_v41 = vld [vmem:[#allocation14_spill] sm:$0xff] }
 0xb68   :  { %v6269_v14 = vpop.eup %6268 }
 0xb69   :  { %1699 = vmatmul.mubr.f32.vlgmr.msra.gmra.mrb[18].mxu1 %v6269_v14 }
 0xb6a   :  { %5596 = vmatpush3.bf16.msra.mxu1 %v6504_v9  ;;  %4811 = vmatprep.mubr.msk.f32.mxu1 %vm6395_vm0, %v7705_v47 }
 0xb6b   :  { %5597 = vmatprep.subr.bf16.mxu1 %v7714_v48 }
 0xb6e   :  { %5599 = vmatpush3.bf16.msra.mxu1 %v6513_v15 }
 0xb6f   :  { %5600 = vmatprep.subr.bf16.mxu1 %v7714_v48 }
 0xb72   :  { %5602 = vmatpush3.bf16.msra.mxu1 %v6523_v21 }
 0xb73   :  { %5603 = vmatprep.subr.bf16.mxu1 %v7714_v48 }
 0xb76   :  { %5605 = vmatpush3.bf16.msra.mxu1 %v6536_v28 }
 0xb77   :  { %5606 = vmatprep.subr.bf16.mxu1 %v7714_v48 }
 0xb7a   :  { %5608 = vmatpush3.bf16.msra.mxu1 %v6546_v34 }
 0xb7b   :  { %5609 = vmatprep.subr.bf16.mxu1 %v7714_v48 }
 0xb7e   :  { %5611 = vmatpush3.bf16.msra.mxu1 %v6556_v40 }
 0xb7f   :  { %5612 = vmatprep.subr.bf16.mxu1 %v7714_v48 }
 0xb82   :  { %5614 = vmatpush3.bf16.msra.mxu1 %v6566_v46 }
 0xb83   :  { %5615 = vmatprep.subr.bf16.mxu1 %v7714_v48 }
 0xb86   :  { %5617 = vmatpush3.bf16.msra.mxu1 %v6570_v52 }
 0xb87   :  { %5651 = vmatprep.subr.bf16.mxu1 %v6646_v56 }
 0xb89   :  { %4812 = vmatmul.mubr.f32.vlgmr.msra.gmra.mrb[20].mxu1 %v7088_v3 }
 0xb8a   :  { %1984 = vmatprep.mubr.f32.mxu1 %v6269_v14  ;;  %5653 = vmatpush3.bf16.msra.mxu1 %v6648_v58  ;;  %v7792_v14 = vld [vmem:[#allocation15_spill] sm:$0xff] }
 0xb8b   :  { %5655 = vmatprep.subr.bf16.mxu1 %v6652_v2 }
 0xb8e   :  { %5657 = vmatpush3.bf16.msra.mxu1 %v6654_v6 }
 0xb8f   :  { %5659 = vmatprep.subr.bf16.mxu1 %v6658_v13 }
 0xb92   :  { %5661 = vmatpush3.bf16.msra.mxu1 %v6660_v17 }
 0xb93   :  { %5663 = vmatprep.subr.bf16.mxu1 %v7759_v49 }
 0xb96   :  { %5665 = vmatpush3.bf16.msra.mxu1 %v7760_v24 }
 0xb97   :  { %5667 = vmatprep.subr.bf16.mxu1 %v7761_v55 }
 0xb9a   :  { %5669 = vmatpush3.bf16.msra.mxu1 %v7762_v45 }
 0xb9b   :  { %5671 = vmatprep.subr.bf16.mxu1 %v7734_v57 }
 0xb9e   :  { %5673 = vmatpush3.bf16.msra.mxu1 %v7735_v44 }
 0xb9f   :  { %5675 = vmatprep.subr.bf16.mxu1 %v7736_v30 }
 0xba2   :  { %5677 = vmatpush3.bf16.msra.mxu1 %v7737_v50 }
 0xba3   :  { %5679 = vmatprep.subr.bf16.mxu1 %v7738_v8 }
 0xba6   :  { %5681 = vmatpush3.bf16.msra.mxu1 %v7739_v23 }
 0xba7   :  { %5715 = vmatprep.subr.bf16.mxu1 %v7740_v25 }
 0xc3c   :  { %v3912_v3 = vpop.f32.mrb[18].mxu1 }
 0xc3d   :  { %v3913_v0 = vpop.f32.mrb[19].mxu1 }
 0xc3e   :  { %v3914_v59 = vadd.f32 %v3913_v0, %v3912_v3  ;;  %v7793_v3 = vld [vmem:[#allocation16_spill] sm:$0xff] }
 0xc40   :  { %v1701_v18 = vadd.f32 %v3914_v59, %v6870_v16  ;;  %v7794_v59 = vld [vmem:[#allocation29_spill] sm:$0xff] }
 0xc42   :  { %6270 = vtanh.f32 %v1701_v18 }
 0xc4c   :  { %v6271_v31 = vpop.eup %6270 }
 0xc4d   :  { %1770 = vmatmul.mubr.f32.vlgmr.msra.gmra.mrb[26].mxu0 %v6271_v31 }
 0xc4e   :  { %5621 = vmatpush3.bf16.msra.mxu0 %v7786_v26  ;;  %1913 = vmatprep.mubr.f32.mxu0 %v7110_v33  ;;  %v7180_v33 = vld [vmem:[%s7553_s4] sm:$0xff] }
 0xc4f   :  { %5623 = vmatprep.subr.bf16.mxu0 %v7787_v39 }
 0xc52   :  { %5625 = vmatpush3.bf16.msra.mxu0 %v7788_v10 }
 0xc53   :  { %5627 = vmatprep.subr.bf16.mxu0 %v7789_v11 }
 0xc56   :  { %5629 = vmatpush3.bf16.msra.mxu0 %v7790_v29 }
 0xc57   :  { %5631 = vmatprep.subr.bf16.mxu0 %v7791_v41 }
 0xc5a   :  { %5633 = vmatpush3.bf16.msra.mxu0 %v7792_v14  ;;  %v7795_v14 = vld [vmem:[#allocation20_spill] sm:$0xff] }
 0xc5b   :  { %5635 = vmatprep.subr.bf16.mxu0 %v7793_v3  ;;  %v7796_v3 = vld [vmem:[#allocation21_spill] sm:$0xff] }
 0xc5c   :  { %v1842_v0 = vpop.f32.mrb[20].mxu1 }
 0xc5d   :  { %v1846_v18 = vadd.f32 %v1842_v0, %v7794_v59  ;;  %v4813_v26 = vpop.f32.mrb[21].mxu1  ;;  %v7797_v0 = vld [vmem:[#allocation22_spill] sm:$0xff] }
 0xc5e   :  { %5637 = vmatpush3.bf16.msra.mxu0 %v6605_v22  ;;  %v7798_v26 = vld [vmem:[#allocation23_spill] sm:$0xff]  ;;  %v7799_v22 = vld [vmem:[#allocation40_spill] sm:$0xff] }
 0xc5f   :  { %v1847_v11 = vadd.f32 %v7180_v33, %v1846_v18  ;;  %5639 = vmatprep.subr.bf16.mxu0 %v7766_v60  ;;  %v7800_v18 = vld [vmem:[#allocation41_spill] sm:$0xff]  ;;  %v7808_v60 = vld [vmem:[#allocation51_spill] sm:$0xff] }
 0xc61   :  { %6272 = vtanh.f32 %v1847_v11  ;;  %v7801_v11 = vld [vmem:[#allocation42_spill] sm:$0xff] }
 0xc62   :  { %5641 = vmatpush3.bf16.msra.mxu0 %v7767_v4  ;;  %v7806_v4 = vld [vmem:[#allocation49_spill] sm:$0xff] }
 0xc63   :  { %5643 = vmatprep.subr.bf16.mxu0 %v7795_v14  ;;  %v7802_v14 = vld [vmem:[#allocation44_spill] sm:$0xff] }
 0xc66   :  { %5645 = vmatpush3.bf16.msra.mxu0 %v7796_v3  ;;  %v7803_v3 = vld [vmem:[#allocation45_spill] sm:$0xff] }
 0xc67   :  { %5647 = vmatprep.subr.bf16.mxu0 %v7797_v0  ;;  %v7804_v0 = vld [vmem:[#allocation46_spill] sm:$0xff] }
 0xc6a   :  { %5649 = vmatpush3.bf16.msra.mxu0 %v7798_v26  ;;  %v7805_v26 = vld [vmem:[#allocation47_spill] sm:$0xff] }
 0xc6b   :  { %v7189_v59 = vpop.eup %6272  ;;  %5683 = vmatprep.subr.bf16.mxu0 %v7799_v22  ;;  %v7807_v22 = vld [vmem:[#allocation50_spill] sm:$0xff] }
 0xc6d   :  { %1914 = vmatmul.mubr.f32.vlgmr.msra.gmra.mrb[28].mxu0 %v7189_v59 }
 0xc6e   :  { %2055 = vmatprep.mubr.f32.mxu0 %v6271_v31  ;;  %5685 = vmatpush3.bf16.msra.mxu0 %v7800_v18  ;;  %v7809_v31 = vld [vmem:[#allocation52_spill] sm:$0xff]  ;;  %v7810_v18 = vld [vmem:[#allocation53_spill] sm:$0xff] }
 0xc6f   :  { %5687 = vmatprep.subr.bf16.mxu0 %v7801_v11  ;;  %v7811_v11 = vld [vmem:[#allocation54_spill] sm:$0xff] }
 0xc72   :  { %5689 = vmatpush3.bf16.msra.mxu0 %v7775_v27 }
 0xc73   :  { %5691 = vmatprep.subr.bf16.mxu0 %v7802_v14 }
 0xc76   :  { %5693 = vmatpush3.bf16.msra.mxu0 %v7803_v3 }
 0xc77   :  { %5695 = vmatprep.subr.bf16.mxu0 %v7804_v0 }
 0xc7a   :  { %5697 = vmatpush3.bf16.msra.mxu0 %v7805_v26 }
 0xc7b   :  { %5699 = vmatprep.subr.bf16.mxu0 %v7806_v4 }
 0xc7e   :  { %5701 = vmatpush3.bf16.msra.mxu0 %v7807_v22 }
 0xc7f   :  { %5703 = vmatprep.subr.bf16.mxu0 %v7808_v60 }
 0xc82   :  { %5705 = vmatpush3.bf16.msra.mxu0 %v7809_v31 }
 0xc83   :  { %5707 = vmatprep.subr.bf16.mxu0 %v7810_v18  ;;  %v7213_v18 = vld [vmem:[%s7553_s4 + $0x8] sm:$0xff] }
 0xc86   :  { %5709 = vmatpush3.bf16.msra.mxu0 %v7811_v11 }
 0xc87   :  { %5711 = vmatprep.subr.bf16.mxu0 %v7757_v38 }
 0xc8a   :  { %5713 = vmatpush3.bf16.msra.mxu0 %v7758_v32 }
 0xc8b   :  { %5746 = vmatprep.subr.bf16.mxu0 %v7714_v48 }
 0xd20   :  { %v3947_v0 = vpop.f32.mrb[26].mxu0 }
 0xd21   :  { %v3948_v26 = vpop.f32.mrb[27].mxu0 }
 0xd22   :  { %v3949_v3 = vadd.f32 %v3948_v26, %v3947_v0 }
 0xd24   :  { %v1772_v60 = vadd.f32 %v3949_v3, %v6914_v5 }
 0xd40   :  { %v3999_v4 = vpop.f32.mrb[28].mxu0 }
 0xd41   :  { %v4000_v14 = vpop.f32.mrb[29].mxu0 }
 0xd42   :  { %v4001_v22 = vadd.f32 %v4000_v14, %v3999_v4 }
 0xd44   :  { %v1916_v11 = vadd.f32 %v7213_v18, %v4001_v22 }
 0xd46   :  { %6274 = vtanh.f32 %v1916_v11 }
 0xd47   :  { %6276 = vtanh.f32 %v1772_v60 }
 0xd50   :  { %v7216_v32 = vpop.eup %6274 }
 0xd51   :  { %v6277_v38 = vpop.eup %6276  ;;  %1985 = vmatmul.mubr.f32.vlgmr.msra.gmra.mrb[22].mxu1 %v7216_v32 }
 0xd52   :  { %2126 = vmatprep.mubr.f32.mxu1 %v6277_v38  ;;  %5717 = vmatpush3.bf16.msra.mxu1 %v7732_v62  ;;  %v7238_v38 = vld [vmem:[%s7553_s4 + $0x10] sm:$0xff] }
 0xd53   :  { %5719 = vmatprep.subr.bf16.mxu1 %v6781_v20 }
 0xd56   :  { %5721 = vmatpush3.bf16.msra.mxu1 %v6785_v1 }
 0xd57   :  { %5723 = vmatprep.subr.bf16.mxu1 %v6788_v12 }
 0xd5a   :  { %5725 = vmatpush3.bf16.msra.mxu1 %v6791_v61 }
 0xd5b   :  { %5727 = vmatprep.subr.bf16.mxu1 %v6794_v42 }
 0xd5e   :  { %5729 = vmatpush3.bf16.msra.mxu1 %v6797_v35 }
 0xd5f   :  { %5731 = vmatprep.subr.bf16.mxu1 %v6842_v19 }
 0xd62   :  { %5733 = vmatpush3.bf16.msra.mxu1 %v6844_v63 }
 0xd63   :  { %5735 = vmatprep.subr.bf16.mxu1 %v6848_v54 }
 0xd66   :  { %5737 = vmatpush3.bf16.msra.mxu1 %v6850_v36 }
 0xd67   :  { %5739 = vmatprep.subr.bf16.mxu1 %v6854_v43 }
 0xd6a   :  { %5741 = vmatpush3.bf16.msra.mxu1 %v6856_v7 }
 0xd6b   :  { %5743 = vmatprep.subr.bf16.mxu1 %v6858_v51 }
 0xd6e   :  { %5745 = vmatpush3.bf16.msra.mxu1 %v6862_v37 }
 0xd6f   :  { %5771 = vmatprep.subr.bf16.mxu1 %v6573_v53 }
 0xe24   :  { %v4034_v60 = vpop.f32.mrb[22].mxu1 }
 0xe25   :  { %v4035_v4 = vpop.f32.mrb[23].mxu1 }
 0xe26   :  { %v4036_v22 = vadd.f32 %v4035_v4, %v4034_v60  ;;  %v7812_v4 = vld [vmem:[#allocation9_spill] sm:$0xff] }
 0xe28   :  { %v1987_v14 = vadd.f32 %v7238_v38, %v4036_v22  ;;  %v7813_v22 = vld [vmem:[#allocation12_spill] sm:$0xff] }
 0xe2a   :  { %6278 = vtanh.f32 %v1987_v14  ;;  %v7814_v14 = vld [vmem:[#allocation15_spill] sm:$0xff] }
 0xe34   :  { %v6279_v3 = vpop.eup %6278 }
 0xe35   :  { %2056 = vmatmul.mubr.f32.vlgmr.msra.gmra.mrb[30].mxu0 %v6279_v3 }
 0xe36   :  { %5748 = vmatpush3.bf16.msra.mxu0 %v6504_v9  ;;  %4846 = vmatprep.mubr.msk.f32.mxu0 %vm6395_vm0, %v7705_v47 }
 0xe37   :  { %5749 = vmatprep.subr.bf16.mxu0 %v7714_v48 }
 0xe3a   :  { %5751 = vmatpush3.bf16.msra.mxu0 %v6513_v15 }
 0xe3b   :  { %5752 = vmatprep.subr.bf16.mxu0 %v7714_v48 }
 0xe3e   :  { %5754 = vmatpush3.bf16.msra.mxu0 %v6523_v21 }
 0xe3f   :  { %5755 = vmatprep.subr.bf16.mxu0 %v7714_v48 }
 0xe42   :  { %5757 = vmatpush3.bf16.msra.mxu0 %v6536_v28 }
 0xe43   :  { %5758 = vmatprep.subr.bf16.mxu0 %v7714_v48 }
 0xe46   :  { %5760 = vmatpush3.bf16.msra.mxu0 %v6546_v34 }
 0xe47   :  { %5761 = vmatprep.subr.bf16.mxu0 %v7714_v48 }
 0xe4a   :  { %5763 = vmatpush3.bf16.msra.mxu0 %v6556_v40 }
 0xe4b   :  { %5764 = vmatprep.subr.bf16.mxu0 %v7714_v48 }
 0xe4e   :  { %5766 = vmatpush3.bf16.msra.mxu0 %v6566_v46 }
 0xe4f   :  { %5767 = vmatprep.subr.bf16.mxu0 %v7714_v48 }
 0xe52   :  { %5769 = vmatpush3.bf16.msra.mxu0 %v6570_v52 }
 0xe53   :  { %5803 = vmatprep.subr.bf16.mxu0 %v6646_v56 }
 0xe55   :  { %4847 = vmatmul.mubr.f32.vlgmr.msra.gmra.mrb[32].mxu0 %v7189_v59 }
 0xe56   :  { %2341 = vmatprep.mubr.f32.mxu0 %v6279_v3  ;;  %5805 = vmatpush3.bf16.msra.mxu0 %v6648_v58 }
 0xe57   :  { %5807 = vmatprep.subr.bf16.mxu0 %v6652_v2 }
 0xe5a   :  { %5809 = vmatpush3.bf16.msra.mxu0 %v6654_v6 }
 0xe5b   :  { %5811 = vmatprep.subr.bf16.mxu0 %v6658_v13 }
 0xe5e   :  { %5813 = vmatpush3.bf16.msra.mxu0 %v6660_v17 }
 0xe5f   :  { %5815 = vmatprep.subr.bf16.mxu0 %v7759_v49 }
 0xe62   :  { %5817 = vmatpush3.bf16.msra.mxu0 %v7760_v24 }
 0xe63   :  { %5819 = vmatprep.subr.bf16.mxu0 %v7761_v55 }
 0xe66   :  { %5821 = vmatpush3.bf16.msra.mxu0 %v7762_v45 }
 0xe67   :  { %5823 = vmatprep.subr.bf16.mxu0 %v7734_v57 }
 0xe6a   :  { %5825 = vmatpush3.bf16.msra.mxu0 %v7735_v44 }
 0xe6b   :  { %5827 = vmatprep.subr.bf16.mxu0 %v7736_v30 }
 0xe6e   :  { %5829 = vmatpush3.bf16.msra.mxu0 %v7737_v50 }
 0xe6f   :  { %5831 = vmatprep.subr.bf16.mxu0 %v7738_v8 }
 0xe72   :  { %5833 = vmatpush3.bf16.msra.mxu0 %v7739_v23 }
 0xe73   :  { %5867 = vmatprep.subr.bf16.mxu0 %v7740_v25 }
 0xf08   :  { %v4069_v0 = vpop.f32.mrb[30].mxu0 }
 0xf09   :  { %v4070_v26 = vpop.f32.mrb[31].mxu0 }
 0xf0a   :  { %v4071_v59 = vadd.f32 %v4070_v26, %v4069_v0  ;;  %v7816_v0 = vld [vmem:[#allocation28_spill] sm:$0xff] }
 0xf0c   :  { %v2058_v11 = vadd.f32 %v4071_v59, %v6870_v16  ;;  %v7815_v16 = vld [vmem:[#allocation16_spill] sm:$0xff] }
 0xf0e   :  { %6280 = vtanh.f32 %v2058_v11  ;;  %v7817_v11 = vld [vmem:[#allocation17_spill] sm:$0xff] }
 0xf18   :  { %v6281_v60 = vpop.eup %6280 }
 0xf19   :  { %2127 = vmatmul.mubr.f32.vlgmr.msra.gmra.mrb[24].mxu1 %v6281_v60 }
 0xf1a   :  { %5773 = vmatpush3.bf16.msra.mxu1 %v7812_v4  ;;  %2270 = vmatprep.mubr.f32.mxu1 %v7216_v32 }
 0xf1b   :  { %5775 = vmatprep.subr.bf16.mxu1 %v7787_v39  ;;  %v7818_v39 = vld [vmem:[#allocation18_spill] sm:$0xff] }
 0xf1e   :  { %5777 = vmatpush3.bf16.msra.mxu1 %v7788_v10 }
 0xf1f   :  { %5779 = vmatprep.subr.bf16.mxu1 %v7813_v22  ;;  %v7819_v22 = vld [vmem:[#allocation19_spill] sm:$0xff] }
 0xf22   :  { %5781 = vmatpush3.bf16.msra.mxu1 %v7790_v29  ;;  %v7820_v29 = vld [vmem:[#allocation20_spill] sm:$0xff] }
 0xf23   :  { %5783 = vmatprep.subr.bf16.mxu1 %v7791_v41  ;;  %v7821_v41 = vld [vmem:[#allocation21_spill] sm:$0xff] }
 0xf26   :  { %5785 = vmatpush3.bf16.msra.mxu1 %v7814_v14  ;;  %v7822_v14 = vld [vmem:[#allocation22_spill] sm:$0xff] }
 0xf27   :  { %5787 = vmatprep.subr.bf16.mxu1 %v7815_v16  ;;  %v7823_v16 = vld [vmem:[#allocation23_spill] sm:$0xff] }
 0xf28   :  { %v2199_v3 = vpop.f32.mrb[32].mxu0 }
 0xf29   :  { %v2203_v26 = vadd.f32 %v7816_v0, %v2199_v3  ;;  %v4848_v59 = vpop.f32.mrb[33].mxu0  ;;  %v7824_v3 = vld [vmem:[#allocation40_spill] sm:$0xff]  ;;  %v7825_v0 = vld [vmem:[#allocation41_spill] sm:$0xff] }
 0xf2a   :  { %5789 = vmatpush3.bf16.msra.mxu1 %v7817_v11  ;;  %v7827_v59 = vld [vmem:[#allocation44_spill] sm:$0xff] }
 0xf2b   :  { %v2204_v32 = vadd.f32 %v7180_v33, %v2203_v26  ;;  %5791 = vmatprep.subr.bf16.mxu1 %v7818_v39  ;;  %v7826_v26 = vld [vmem:[#allocation42_spill] sm:$0xff] }
 0xf2d   :  { %6282 = vtanh.f32 %v2204_v32  ;;  %v7828_v32 = vld [vmem:[#allocation45_spill] sm:$0xff] }
 0xf2e   :  { %5793 = vmatpush3.bf16.msra.mxu1 %v7819_v22 }
 0xf2f   :  { %5795 = vmatprep.subr.bf16.mxu1 %v7820_v29  ;;  %v7833_v29 = vld [vmem:[#allocation51_spill] sm:$0xff] }
 0xf32   :  { %5797 = vmatpush3.bf16.msra.mxu1 %v7821_v41  ;;  %v7831_v41 = vld [vmem:[#allocation49_spill] sm:$0xff] }
 0xf33   :  { %5799 = vmatprep.subr.bf16.mxu1 %v7822_v14  ;;  %v7829_v14 = vld [vmem:[#allocation46_spill] sm:$0xff] }
 0xf36   :  { %5801 = vmatpush3.bf16.msra.mxu1 %v7823_v16  ;;  %v7830_v16 = vld [vmem:[#allocation47_spill] sm:$0xff] }
 0xf37   :  { %v7295_v10 = vpop.eup %6282  ;;  %5835 = vmatprep.subr.bf16.mxu1 %v7824_v3  ;;  %v7832_v3 = vld [vmem:[#allocation50_spill] sm:$0xff] }
 0xf39   :  { %2271 = vmatmul.mubr.f32.vlgmr.msra.gmra.mrb[26].mxu1 %v7295_v10 }
 0xf3a   :  { %2412 = vmatprep.mubr.f32.mxu1 %v6281_v60  ;;  %5837 = vmatpush3.bf16.msra.mxu1 %v7825_v0  ;;  %v7834_v60 = vld [vmem:[#allocation53_spill] sm:$0xff] }
 0xf3b   :  { %5839 = vmatprep.subr.bf16.mxu1 %v7826_v26  ;;  %v7835_v26 = vld [vmem:[#allocation54_spill] sm:$0xff] }
 0xf3e   :  { %5841 = vmatpush3.bf16.msra.mxu1 %v7775_v27  ;;  %v7836_v27 = vld [vmem:[#allocation55_spill] sm:$0xff] }
 0xf3f   :  { %5843 = vmatprep.subr.bf16.mxu1 %v7827_v59  ;;  %v7837_v59 = vld [vmem:[#allocation56_spill] sm:$0xff] }
 0xf42   :  { %5845 = vmatpush3.bf16.msra.mxu1 %v7828_v32 }
 0xf43   :  { %5847 = vmatprep.subr.bf16.mxu1 %v7829_v14 }
 0xf46   :  { %5849 = vmatpush3.bf16.msra.mxu1 %v7830_v16 }
 0xf47   :  { %5851 = vmatprep.subr.bf16.mxu1 %v7831_v41 }
 0xf4a   :  { %5853 = vmatpush3.bf16.msra.mxu1 %v7832_v3 }
 0xf4b   :  { %5855 = vmatprep.subr.bf16.mxu1 %v7833_v29 }
 0xf4e   :  { %5857 = vmatpush3.bf16.msra.mxu1 %v7809_v31 }
 0xf4f   :  { %5859 = vmatprep.subr.bf16.mxu1 %v7834_v60 }
 0xf52   :  { %5861 = vmatpush3.bf16.msra.mxu1 %v7835_v26 }
 0xf53   :  { %5863 = vmatprep.subr.bf16.mxu1 %v7836_v27 }
 0xf56   :  { %5865 = vmatpush3.bf16.msra.mxu1 %v7837_v59 }
 0xf57   :  { %5898 = vmatprep.subr.bf16.mxu1 %v7714_v48 }
 0xfec   :  { %v4104_v14 = vpop.f32.mrb[24].mxu1 }
 0xfed   :  { %v4105_v16 = vpop.f32.mrb[25].mxu1 }
 0xfee   :  { %v4106_v32 = vadd.f32 %v4105_v16, %v4104_v14 }
 0xff0   :  { %v2129_v29 = vadd.f32 %v4106_v32, %v6914_v5 }
0x100c   :  { %v4156_v41 = vpop.f32.mrb[26].mxu1 }
0x100d   :  { %v4157_v0 = vpop.f32.mrb[27].mxu1 }
0x100e   :  { %v4158_v3 = vadd.f32 %v4157_v0, %v4156_v41  ;;  %v7375_v0 = vld [vmem:[%s7553_s4 + $0x18] sm:$0xff] }
0x100f   :  { %7838 = vst [vmem:[#allocation48_spill] sm:$0xff] %v7375_v0 }
0x1010   :  { %v2273_v31 = vadd.f32 %v7213_v18, %v4158_v3 }
0x1012   :  { %6284 = vtanh.f32 %v2273_v31 }
0x1013   :  { %6286 = vtanh.f32 %v2129_v29 }
0x101c   :  { %v7317_v60 = vpop.eup %6284 }
0x101d   :  { %v6287_v26 = vpop.eup %6286  ;;  %2342 = vmatmul.mubr.f32.vlgmr.msra.gmra.mrb[34].mxu0 %v7317_v60 }
0x101e   :  { %2483 = vmatprep.mubr.f32.mxu0 %v6287_v26  ;;  %5869 = vmatpush3.bf16.msra.mxu0 %v7732_v62 }
0x101f   :  { %5871 = vmatprep.subr.bf16.mxu0 %v6781_v20 }
0x1022   :  { %5873 = vmatpush3.bf16.msra.mxu0 %v6785_v1 }
0x1023   :  { %5875 = vmatprep.subr.bf16.mxu0 %v6788_v12 }
0x1026   :  { %5877 = vmatpush3.bf16.msra.mxu0 %v6791_v61 }
0x1027   :  { %5879 = vmatprep.subr.bf16.mxu0 %v6794_v42 }
0x102a   :  { %5881 = vmatpush3.bf16.msra.mxu0 %v6797_v35 }
0x102b   :  { %5883 = vmatprep.subr.bf16.mxu0 %v6842_v19 }
0x102e   :  { %5885 = vmatpush3.bf16.msra.mxu0 %v6844_v63 }
0x102f   :  { %5887 = vmatprep.subr.bf16.mxu0 %v6848_v54 }
0x1032   :  { %5889 = vmatpush3.bf16.msra.mxu0 %v6850_v36 }
0x1033   :  { %5891 = vmatprep.subr.bf16.mxu0 %v6854_v43 }
0x1036   :  { %5893 = vmatpush3.bf16.msra.mxu0 %v6856_v7 }
0x1037   :  { %5895 = vmatprep.subr.bf16.mxu0 %v6858_v51 }
0x103a   :  { %5897 = vmatpush3.bf16.msra.mxu0 %v6862_v37 }
0x103b   :  { %5923 = vmatprep.subr.bf16.mxu0 %v6573_v53 }
0x10f0   :  { %v4191_v5 = vpop.f32.mrb[34].mxu0 }
0x10f1   :  { %v4192_v29 = vpop.f32.mrb[35].mxu0 }
0x10f2   :  { %v4193_v41 = vadd.f32 %v4192_v29, %v4191_v5  ;;  %v7839_v5 = vld [vmem:[#allocation10_spill] sm:$0xff]  ;;  %v7840_v29 = vld [vmem:[#allocation11_spill] sm:$0xff] }
0x10f4   :  { %v2344_v31 = vadd.f32 %v7238_v38, %v4193_v41  ;;  %v7841_v41 = vld [vmem:[#allocation12_spill] sm:$0xff] }
0x10f6   :  { %6288 = vtanh.f32 %v2344_v31  ;;  %v7842_v31 = vld [vmem:[#allocation13_spill] sm:$0xff] }
0x1100   :  { %v6289_v14 = vpop.eup %6288 }
0x1101   :  { %2413 = vmatmul.mubr.f32.vlgmr.msra.gmra.mrb[28].mxu1 %v6289_v14 }
0x1102   :  { %5900 = vmatpush3.bf16.msra.mxu1 %v6504_v9  ;;  %4881 = vmatprep.mubr.msk.f32.mxu1 %vm6395_vm0, %v7705_v47 }
0x1103   :  { %5901 = vmatprep.subr.bf16.mxu1 %v7714_v48 }
0x1106   :  { %5903 = vmatpush3.bf16.msra.mxu1 %v6513_v15 }
0x1107   :  { %5904 = vmatprep.subr.bf16.mxu1 %v7714_v48 }
0x110a   :  { %5906 = vmatpush3.bf16.msra.mxu1 %v6523_v21 }
0x110b   :  { %5907 = vmatprep.subr.bf16.mxu1 %v7714_v48 }
0x110e   :  { %5909 = vmatpush3.bf16.msra.mxu1 %v6536_v28 }
0x110f   :  { %5910 = vmatprep.subr.bf16.mxu1 %v7714_v48 }
0x1112   :  { %5912 = vmatpush3.bf16.msra.mxu1 %v6546_v34 }
0x1113   :  { %5913 = vmatprep.subr.bf16.mxu1 %v7714_v48 }
0x1116   :  { %5915 = vmatpush3.bf16.msra.mxu1 %v6556_v40 }
0x1117   :  { %5916 = vmatprep.subr.bf16.mxu1 %v7714_v48 }
0x111a   :  { %5918 = vmatpush3.bf16.msra.mxu1 %v6566_v46 }
0x111b   :  { %5919 = vmatprep.subr.bf16.mxu1 %v7714_v48 }
0x111e   :  { %5921 = vmatpush3.bf16.msra.mxu1 %v6570_v52 }
0x111f   :  { %5955 = vmatprep.subr.bf16.mxu1 %v6646_v56 }
0x1121   :  { %4882 = vmatmul.mubr.f32.vlgmr.msra.gmra.mrb[30].mxu1 %v7295_v10 }
0x1122   :  { %2698 = vmatprep.mubr.f32.mxu1 %v6289_v14  ;;  %5957 = vmatpush3.bf16.msra.mxu1 %v6648_v58  ;;  %v7843_v14 = vld [vmem:[#allocation14_spill] sm:$0xff] }
0x1123   :  { %5959 = vmatprep.subr.bf16.mxu1 %v6652_v2 }
0x1126   :  { %5961 = vmatpush3.bf16.msra.mxu1 %v6654_v6 }
0x1127   :  { %5963 = vmatprep.subr.bf16.mxu1 %v6658_v13 }
0x112a   :  { %5965 = vmatpush3.bf16.msra.mxu1 %v6660_v17 }
0x112b   :  { %5967 = vmatprep.subr.bf16.mxu1 %v7759_v49 }
0x112e   :  { %5969 = vmatpush3.bf16.msra.mxu1 %v7760_v24 }
0x112f   :  { %5971 = vmatprep.subr.bf16.mxu1 %v7761_v55 }
0x1132   :  { %5973 = vmatpush3.bf16.msra.mxu1 %v7762_v45 }
0x1133   :  { %5975 = vmatprep.subr.bf16.mxu1 %v7734_v57 }
0x1136   :  { %5977 = vmatpush3.bf16.msra.mxu1 %v7735_v44 }
0x1137   :  { %5979 = vmatprep.subr.bf16.mxu1 %v7736_v30 }
0x113a   :  { %5981 = vmatpush3.bf16.msra.mxu1 %v7737_v50 }
0x113b   :  { %5983 = vmatprep.subr.bf16.mxu1 %v7738_v8 }
0x113e   :  { %5985 = vmatpush3.bf16.msra.mxu1 %v7739_v23 }
0x113f   :  { %6019 = vmatprep.subr.bf16.mxu1 %v7740_v25 }
0x11d4   :  { %v4226_v10 = vpop.f32.mrb[28].mxu1 }
0x11d5   :  { %v4227_v16 = vpop.f32.mrb[29].mxu1 }
0x11d6   :  { %v4228_v3 = vadd.f32 %v4227_v16, %v4226_v10  ;;  %v7844_v10 = vld [vmem:[#allocation15_spill] sm:$0xff]  ;;  %v7845_v16 = vld [vmem:[#allocation16_spill] sm:$0xff] }
0x11d8   :  { %v2415_v26 = vadd.f32 %v7375_v0, %v4228_v3 }
0x11da   :  { %6290 = vtanh.f32 %v2415_v26  ;;  %v7846_v26 = vld [vmem:[#allocation31_spill] sm:$0xff] }
0x11e4   :  { %v6291_v32 = vpop.eup %6290 }
0x11e5   :  { %2484 = vmatmul.mubr.f32.vlgmr.msra.gmra.mrb[36].mxu0 %v6291_v32 }
0x11e6   :  { %5925 = vmatpush3.bf16.msra.mxu0 %v7812_v4  ;;  %2627 = vmatprep.mubr.f32.mxu0 %v7317_v60 }
0x11e7   :  { %5927 = vmatprep.subr.bf16.mxu0 %v7839_v5 }
0x11ea   :  { %5929 = vmatpush3.bf16.msra.mxu0 %v7840_v29 }
0x11eb   :  { %5931 = vmatprep.subr.bf16.mxu0 %v7841_v41 }
0x11ee   :  { %5933 = vmatpush3.bf16.msra.mxu0 %v7842_v31  ;;  %v7847_v31 = vld [vmem:[#allocation20_spill] sm:$0xff] }
0x11ef   :  { %5935 = vmatprep.subr.bf16.mxu0 %v7843_v14  ;;  %v7848_v14 = vld [vmem:[#allocation21_spill] sm:$0xff] }
0x11f2   :  { %5937 = vmatpush3.bf16.msra.mxu0 %v7844_v10  ;;  %v7849_v10 = vld [vmem:[#allocation22_spill] sm:$0xff] }
0x11f3   :  { %5939 = vmatprep.subr.bf16.mxu0 %v7845_v16  ;;  %v7850_v16 = vld [vmem:[#allocation23_spill] sm:$0xff] }
0x11f4   :  { %v2556_v3 = vpop.f32.mrb[30].mxu1 }
0x11f5   :  { %v2560_v0 = vadd.f32 %v2556_v3, %v7846_v26  ;;  %v4883_v4 = vpop.f32.mrb[31].mxu1  ;;  %v7853_v3 = vld [vmem:[#allocation42_spill] sm:$0xff]  ;;  %v7854_v26 = vld [vmem:[#allocation43_spill] sm:$0xff] }
0x11f6   :  { %5941 = vmatpush3.bf16.msra.mxu0 %v7817_v11  ;;  %v7851_v4 = vld [vmem:[#allocation40_spill] sm:$0xff] }
0x11f7   :  { %v2561_v60 = vadd.f32 %v7180_v33, %v2560_v0  ;;  %5943 = vmatprep.subr.bf16.mxu0 %v7818_v39  ;;  %v7852_v0 = vld [vmem:[#allocation41_spill] sm:$0xff] }
0x11f9   :  { %6292 = vtanh.f32 %v2561_v60  ;;  %v7855_v60 = vld [vmem:[#allocation44_spill] sm:$0xff] }
0x11fa   :  { %5945 = vmatpush3.bf16.msra.mxu0 %v7819_v22  ;;  %v7861_v22 = vld [vmem:[#allocation51_spill] sm:$0xff] }
0x11fb   :  { %5947 = vmatprep.subr.bf16.mxu0 %v7847_v31  ;;  %v7859_v31 = vld [vmem:[#allocation49_spill] sm:$0xff] }
0x11fe   :  { %5949 = vmatpush3.bf16.msra.mxu0 %v7848_v14  ;;  %v7856_v14 = vld [vmem:[#allocation45_spill] sm:$0xff] }
0x11ff   :  { %5951 = vmatprep.subr.bf16.mxu0 %v7849_v10  ;;  %v7857_v10 = vld [vmem:[#allocation46_spill] sm:$0xff] }
0x1202   :  { %5953 = vmatpush3.bf16.msra.mxu0 %v7850_v16  ;;  %v7858_v16 = vld [vmem:[#allocation47_spill] sm:$0xff] }
0x1203   :  { %v7396_v41 = vpop.eup %6292  ;;  %5987 = vmatprep.subr.bf16.mxu0 %v7851_v4  ;;  %v7860_v4 = vld [vmem:[#allocation50_spill] sm:$0xff] }
0x1205   :  { %2628 = vmatmul.mubr.f32.vlgmr.msra.gmra.mrb[38].mxu0 %v7396_v41 }
0x1206   :  { %2769 = vmatprep.mubr.f32.mxu0 %v6291_v32  ;;  %5989 = vmatpush3.bf16.msra.mxu0 %v7852_v0  ;;  %v7862_v32 = vld [vmem:[#allocation52_spill] sm:$0xff]  ;;  %v7863_v0 = vld [vmem:[#allocation53_spill] sm:$0xff] }
0x1207   :  { %5991 = vmatprep.subr.bf16.mxu0 %v7853_v3  ;;  %v7864_v3 = vld [vmem:[#allocation54_spill] sm:$0xff] }
0x120a   :  { %5993 = vmatpush3.bf16.msra.mxu0 %v7854_v26 }
0x120b   :  { %5995 = vmatprep.subr.bf16.mxu0 %v7855_v60 }
0x120e   :  { %5997 = vmatpush3.bf16.msra.mxu0 %v7856_v14 }
0x120f   :  { %5999 = vmatprep.subr.bf16.mxu0 %v7857_v10 }
0x1212   :  { %6001 = vmatpush3.bf16.msra.mxu0 %v7858_v16 }
0x1213   :  { %6003 = vmatprep.subr.bf16.mxu0 %v7859_v31 }
0x1216   :  { %6005 = vmatpush3.bf16.msra.mxu0 %v7860_v4 }
0x1217   :  { %6007 = vmatprep.subr.bf16.mxu0 %v7861_v22 }
0x121a   :  { %6009 = vmatpush3.bf16.msra.mxu0 %v7862_v32  ;;  %v7419_v32 = vld [vmem:[%s7553_s4 + $0x20] sm:$0xff] }
0x121b   :  { %6011 = vmatprep.subr.bf16.mxu0 %v7863_v0 }
0x121e   :  { %6013 = vmatpush3.bf16.msra.mxu0 %v7864_v3 }
0x121f   :  { %6015 = vmatprep.subr.bf16.mxu0 %v7836_v27 }
0x1222   :  { %6017 = vmatpush3.bf16.msra.mxu0 %v7837_v59 }
0x1223   :  { %6050 = vmatprep.subr.bf16.mxu0 %v7714_v48 }
0x12b8   :  { %v4261_v10 = vpop.f32.mrb[36].mxu0 }
0x12b9   :  { %v4262_v16 = vpop.f32.mrb[37].mxu0 }
0x12ba   :  { %v4263_v14 = vadd.f32 %v4262_v16, %v4261_v10 }
0x12bc   :  { %v2486_v0 = vadd.f32 %v7419_v32, %v4263_v14 }
0x12d8   :  { %v4313_v31 = vpop.f32.mrb[38].mxu0 }
0x12d9   :  { %v4314_v60 = vpop.f32.mrb[39].mxu0 }
0x12da   :  { %v4315_v4 = vadd.f32 %v4314_v60, %v4313_v31 }
0x12dc   :  { %v2630_v3 = vadd.f32 %v7213_v18, %v4315_v4  ;;  %v7888_v4 = vld [vmem:[#allocation53_spill] sm:$0xff] }
0x12de   :  { %6294 = vtanh.f32 %v2630_v3  ;;  %v7890_v3 = vld [vmem:[#allocation55_spill] sm:$0xff] }
0x12df   :  { %6296 = vtanh.f32 %v2486_v0  ;;  %v7889_v0 = vld [vmem:[#allocation54_spill] sm:$0xff] }
0x12e8   :  { %v7423_v59 = vpop.eup %6294 }
0x12e9   :  { %v6297_v27 = vpop.eup %6296  ;;  %2699 = vmatmul.mubr.f32.vlgmr.msra.gmra.mrb[32].mxu1 %v7423_v59 }
0x12ea   :  { %2840 = vmatprep.mubr.f32.mxu1 %v6297_v27  ;;  %6021 = vmatpush3.bf16.msra.mxu1 %v7732_v62 }
0x12eb   :  { %6023 = vmatprep.subr.bf16.mxu1 %v6781_v20 }
0x12ee   :  { %6025 = vmatpush3.bf16.msra.mxu1 %v6785_v1 }
0x12ef   :  { %6027 = vmatprep.subr.bf16.mxu1 %v6788_v12 }
0x12f2   :  { %6029 = vmatpush3.bf16.msra.mxu1 %v6791_v61 }
0x12f3   :  { %6031 = vmatprep.subr.bf16.mxu1 %v6794_v42 }
0x12f6   :  { %6033 = vmatpush3.bf16.msra.mxu1 %v6797_v35 }
0x12f7   :  { %6035 = vmatprep.subr.bf16.mxu1 %v6842_v19 }
0x12fa   :  { %6037 = vmatpush3.bf16.msra.mxu1 %v6844_v63 }
0x12fb   :  { %6039 = vmatprep.subr.bf16.mxu1 %v6848_v54 }
0x12fe   :  { %6041 = vmatpush3.bf16.msra.mxu1 %v6850_v36 }
0x12ff   :  { %6043 = vmatprep.subr.bf16.mxu1 %v6854_v43 }
0x1302   :  { %6045 = vmatpush3.bf16.msra.mxu1 %v6856_v7 }
0x1303   :  { %6047 = vmatprep.subr.bf16.mxu1 %v6858_v51 }
0x1306   :  { %6049 = vmatpush3.bf16.msra.mxu1 %v6862_v37 }
0x1307   :  { %6075 = vmatprep.subr.bf16.mxu1 %v6573_v53  ;;  %v7868_v53 = vld [vmem:[#allocation13_spill] sm:$0xff] }
0x13bc   :  { %v4348_v27 = vpop.f32.mrb[32].mxu1 }
0x13bd   :  { %v4349_v31 = vpop.f32.mrb[33].mxu1 }
0x13be   :  { %v4350_v14 = vadd.f32 %v4349_v31, %v4348_v27 }
0x13c0   :  { %v2701_v10 = vadd.f32 %v7238_v38, %v4350_v14 }
0x13c2   :  { %6298 = vtanh.f32 %v2701_v10 }
0x13cc   :  { %v6299_v16 = vpop.eup %6298 }
0x13cd   :  { %2770 = vmatmul.mubr.f32.vlgmr.msra.gmra.mrb[40].mxu0 %v6299_v16 }
0x13ce   :  { %6052 = vmatpush3.bf16.msra.mxu0 %v6504_v9  ;;  %4916 = vmatprep.mubr.msk.f32.mxu0 %vm6395_vm0, %v7705_v47 }
0x13cf   :  { %6053 = vmatprep.subr.bf16.mxu0 %v7714_v48 }
0x13d2   :  { %6055 = vmatpush3.bf16.msra.mxu0 %v6513_v15 }
0x13d3   :  { %6056 = vmatprep.subr.bf16.mxu0 %v7714_v48 }
0x13d6   :  { %6058 = vmatpush3.bf16.msra.mxu0 %v6523_v21 }
0x13d7   :  { %6059 = vmatprep.subr.bf16.mxu0 %v7714_v48 }
0x13da   :  { %6061 = vmatpush3.bf16.msra.mxu0 %v6536_v28  ;;  %v7865_v28 = vld [vmem:[#allocation48_spill] sm:$0xff] }
0x13db   :  { %6062 = vmatprep.subr.bf16.mxu0 %v7714_v48 }
0x13de   :  { %6064 = vmatpush3.bf16.msra.mxu0 %v6546_v34 }
0x13df   :  { %6065 = vmatprep.subr.bf16.mxu0 %v7714_v48 }
0x13e2   :  { %6067 = vmatpush3.bf16.msra.mxu0 %v6556_v40 }
0x13e3   :  { %6068 = vmatprep.subr.bf16.mxu0 %v7714_v48 }
0x13e6   :  { %6070 = vmatpush3.bf16.msra.mxu0 %v6566_v46  ;;  %v7866_v46 = vld [vmem:[#allocation9_spill] sm:$0xff] }
0x13e7   :  { %6071 = vmatprep.subr.bf16.mxu0 %v7714_v48 }
0x13ea   :  { %6073 = vmatpush3.bf16.msra.mxu0 %v6570_v52  ;;  %v7867_v52 = vld [vmem:[#allocation12_spill] sm:$0xff] }
0x13eb   :  { %6107 = vmatprep.subr.bf16.mxu0 %v6646_v56  ;;  %v7869_v56 = vld [vmem:[#allocation14_spill] sm:$0xff] }
0x13ed   :  { %4917 = vmatmul.mubr.f32.vlgmr.msra.gmra.mrb[42].mxu0 %v7396_v41  ;;  %v7887_v41 = vld [vmem:[#allocation52_spill] sm:$0xff] }
0x13ee   :  { %3055 = vmatprep.mubr.f32.mxu0 %v6299_v16  ;;  %6109 = vmatpush3.bf16.msra.mxu0 %v6648_v58  ;;  %v7870_v58 = vld [vmem:[#allocation15_spill] sm:$0xff] }
0x13ef   :  { %6111 = vmatprep.subr.bf16.mxu0 %v6652_v2  ;;  %v7871_v2 = vld [vmem:[#allocation16_spill] sm:$0xff] }
0x13f2   :  { %6113 = vmatpush3.bf16.msra.mxu0 %v6654_v6 }
0x13f3   :  { %6115 = vmatprep.subr.bf16.mxu0 %v6658_v13  ;;  %v7872_v13 = vld [vmem:[#allocation30_spill] sm:$0xff] }
0x13f6   :  { %6117 = vmatpush3.bf16.msra.mxu0 %v6660_v17 }
0x13f7   :  { %6119 = vmatprep.subr.bf16.mxu0 %v7759_v49 }
0x13fa   :  { %6121 = vmatpush3.bf16.msra.mxu0 %v7760_v24  ;;  %v7878_v24 = vld [vmem:[#allocation40_spill] sm:$0xff] }
0x13fb   :  { %6123 = vmatprep.subr.bf16.mxu0 %v7761_v55  ;;  %v7879_v55 = vld [vmem:[#allocation41_spill] sm:$0xff] }
0x13fe   :  { %6125 = vmatpush3.bf16.msra.mxu0 %v7762_v45  ;;  %v7880_v45 = vld [vmem:[#allocation42_spill] sm:$0xff] }
0x13ff   :  { %6127 = vmatprep.subr.bf16.mxu0 %v7734_v57 }
0x1402   :  { %6129 = vmatpush3.bf16.msra.mxu0 %v7735_v44 }
0x1403   :  { %6131 = vmatprep.subr.bf16.mxu0 %v7736_v30  ;;  %v7873_v30 = vld [vmem:[#allocation19_spill] sm:$0xff] }
0x1406   :  { %6133 = vmatpush3.bf16.msra.mxu0 %v7737_v50  ;;  %v7874_v50 = vld [vmem:[#allocation20_spill] sm:$0xff] }
0x1407   :  { %6135 = vmatprep.subr.bf16.mxu0 %v7738_v8  ;;  %v7875_v8 = vld [vmem:[#allocation21_spill] sm:$0xff] }
0x140a   :  { %6137 = vmatpush3.bf16.msra.mxu0 %v7739_v23  ;;  %v7876_v23 = vld [vmem:[#allocation22_spill] sm:$0xff] }
0x140b   :  { %6171 = vmatprep.subr.bf16.mxu0 %v7740_v25  ;;  %v7877_v25 = vld [vmem:[#allocation23_spill] sm:$0xff] }
0x14a0   :  { %v4383_v9 = vpop.f32.mrb[40].mxu0 }
0x14a1   :  { %v4384_v15 = vpop.f32.mrb[41].mxu0 }
0x14a2   :  { %v4385_v21 = vadd.f32 %v4384_v15, %v4383_v9 }
0x14a4   :  { %v2772_v34 = vadd.f32 %v7865_v28, %v4385_v21 }
0x14a6   :  { %6300 = vtanh.f32 %v2772_v34 }
0x14b0   :  { %v6301_v40 = vpop.eup %6300 }
0x14b1   :  { %2841 = vmatmul.mubr.f32.vlgmr.msra.gmra.mrb[34].mxu1 %v6301_v40 }
0x14b2   :  { %6077 = vmatpush3.bf16.msra.mxu1 %v7866_v46  ;;  %2984 = vmatprep.mubr.f32.mxu1 %v7423_v59  ;;  %v7884_v59 = vld [vmem:[#allocation47_spill] sm:$0xff] }
0x14b3   :  { %6079 = vmatprep.subr.bf16.mxu1 %v7839_v5  ;;  %v7885_v5 = vld [vmem:[#allocation49_spill] sm:$0xff] }
0x14b6   :  { %6081 = vmatpush3.bf16.msra.mxu1 %v7840_v29  ;;  %v7886_v29 = vld [vmem:[#allocation50_spill] sm:$0xff] }
0x14b7   :  { %6083 = vmatprep.subr.bf16.mxu1 %v7867_v52 }
0x14ba   :  { %6085 = vmatpush3.bf16.msra.mxu1 %v7868_v53  ;;  %v3212_v53 = vld [vmem:[#allocation6 + $0x40] sm:$0xff] }
0x14bb   :  { %6087 = vmatprep.subr.bf16.mxu1 %v7869_v56  ;;  %v3213_v56 = vld [vmem:[#allocation6 + $0x48] sm:$0xff] }
0x14be   :  { %6089 = vmatpush3.bf16.msra.mxu1 %v7870_v58  ;;  %v6215_v58 = vpack.c.bf16 %v3213_v56, %v3212_v53 }
0x14bf   :  { %6091 = vmatprep.subr.bf16.mxu1 %v7871_v2  ;;  %v3214_v2 = vld [vmem:[#allocation6 + $0x50] sm:$0xff] }
0x14c0   :  { %v2913_v6 = vpop.f32.mrb[42].mxu0 }
0x14c1   :  { %v2917_v17 = vadd.f32 %v7872_v13, %v2913_v6  ;;  %v4918_v57 = vpop.f32.mrb[43].mxu0  ;;  %v3215_v6 = vld [vmem:[#allocation6 + $0x58] sm:$0xff] }
0x14c2   :  { %6093 = vmatpush3.bf16.msra.mxu1 %v7817_v11  ;;  %v7883_v11 = vld [vmem:[#allocation46_spill] sm:$0xff]  ;;  %v6218_v13 = vpack.c.bf16 %v3215_v6, %v3214_v2 }
0x14c3   :  { %v2918_v44 = vadd.f32 %v7180_v33, %v2917_v17  ;;  %6095 = vmatprep.subr.bf16.mxu1 %v7818_v39  ;;  %v7881_v39 = vld [vmem:[#allocation44_spill] sm:$0xff]  ;;  %v7882_v33 = vld [vmem:[#allocation45_spill] sm:$0xff]  ;;  %v3217_v57 = vld [vmem:[#allocation6 + $0x68] sm:$0xff] }
0x14c4   :  { %v3216_v17 = vld [vmem:[#allocation6 + $0x60] sm:$0xff] }
0x14c5   :  { %6302 = vtanh.f32 %v2918_v44  ;;  %v6221_v44 = vpack.c.bf16 %v3217_v57, %v3216_v17 }
0x14c6   :  { %6097 = vmatpush3.bf16.msra.mxu1 %v7873_v30  ;;  %v3218_v30 = vld [vmem:[#allocation6 + $0x70] sm:$0xff] }
0x14c7   :  { %6099 = vmatprep.subr.bf16.mxu1 %v7874_v50 }
0x14ca   :  { %6101 = vmatpush3.bf16.msra.mxu1 %v7875_v8 }
0x14cb   :  { %6103 = vmatprep.subr.bf16.mxu1 %v7876_v23 }
0x14ce   :  { %6105 = vmatpush3.bf16.msra.mxu1 %v7877_v25 }
0x14cf   :  { %v6303_v49 = vpop.eup %6302  ;;  %6139 = vmatprep.subr.bf16.mxu1 %v7878_v24 }
0x14d1   :  { %2985 = vmatmul.mubr.f32.vlgmr.msra.gmra.mrb[36].mxu1 %v6303_v49 }
0x14d2   :  { %3126 = vmatprep.mubr.f32.mxu1 %v6301_v40  ;;  %6141 = vmatpush3.bf16.msra.mxu1 %v7879_v55  ;;  %v3220_v55 = vld [vmem:[%s7555_s6] sm:$0xff] }
0x14d3   :  { %6143 = vmatprep.subr.bf16.mxu1 %v7880_v45 }
0x14d6   :  { %6145 = vmatpush3.bf16.msra.mxu1 %v7854_v26  ;;  %v7891_v26 = vld [vmem:[#allocation56_spill] sm:$0xff] }
0x14d7   :  { %6147 = vmatprep.subr.bf16.mxu1 %v7881_v39 }
0x14da   :  { %6149 = vmatpush3.bf16.msra.mxu1 %v7882_v33 }
0x14db   :  { %6151 = vmatprep.subr.bf16.mxu1 %v7883_v11 }
0x14de   :  { %6153 = vmatpush3.bf16.msra.mxu1 %v7884_v59 }
0x14df   :  { %6155 = vmatprep.subr.bf16.mxu1 %v7885_v5 }
0x14e2   :  { %6157 = vmatpush3.bf16.msra.mxu1 %v7886_v29 }
0x14e3   :  { %6159 = vmatprep.subr.bf16.mxu1 %v7861_v22 }
0x14e6   :  { %6161 = vmatpush3.bf16.msra.mxu1 %v7887_v41 }
0x14e7   :  { %6163 = vmatprep.subr.bf16.mxu1 %v7888_v4 }
0x14ea   :  { %6165 = vmatpush3.bf16.msra.mxu1 %v7889_v0 }
0x14eb   :  { %6167 = vmatprep.subr.bf16.mxu1 %v7890_v3 }
0x14ee   :  { %6169 = vmatpush3.bf16.msra.mxu1 %v7891_v26 }
0x14ef   :  { %6202 = vmatprep.subr.bf16.mxu1 %v7714_v48 }
0x1584   :  { %v4418_v60 = vpop.f32.mrb[34].mxu1 }
0x1585   :  { %v4419_v27 = vpop.f32.mrb[35].mxu1 }
0x1586   :  { %v4420_v31 = vadd.f32 %v4419_v27, %v4418_v60 }
0x1588   :  { %v2843_v22 = vadd.f32 %v7419_v32, %v4420_v31 }
0x15a4   :  { %v4470_v14 = vpop.f32.mrb[36].mxu1 }
0x15a5   :  { %v4471_v10 = vpop.f32.mrb[37].mxu1 }
0x15a6   :  { %v4472_v16 = vadd.f32 %v4471_v10, %v4470_v14 }
0x15a8   :  { %v2987_v9 = vadd.f32 %v7213_v18, %v4472_v16  ;;  %v3211_v18 = vld [vmem:[#allocation6 + $0x38] sm:$0xff] }
0x15aa   :  { %6304 = vtanh.f32 %v2987_v9 }
0x15ab   :  { %6306 = vtanh.f32 %v2843_v22 }
0x15b4   :  { %v6305_v15 = vpop.eup %6304 }
0x15b5   :  { %v6307_v21 = vpop.eup %6306  ;;  %3056 = vmatmul.mubr.f32.vlgmr.msra.gmra.mrb[44].mxu0 %v6305_v15 }
0x15b6   :  { %3197 = vmatprep.mubr.f32.mxu0 %v6307_v21  ;;  %6173 = vmatpush3.bf16.msra.mxu0 %v7732_v62  ;;  %v3210_v62 = vld [vmem:[#allocation6 + $0x30] sm:$0xff] }
0x15b7   :  { %6175 = vmatprep.subr.bf16.mxu0 %v6781_v20 }
0x15ba   :  { %6177 = vmatpush3.bf16.msra.mxu0 %v6785_v1 }
0x15bb   :  { %6179 = vmatprep.subr.bf16.mxu0 %v6788_v12 }
0x15be   :  { %6181 = vmatpush3.bf16.msra.mxu0 %v6791_v61 }
0x15bf   :  { %6183 = vmatprep.subr.bf16.mxu0 %v6794_v42 }
0x15c2   :  { %6185 = vmatpush3.bf16.msra.mxu0 %v6797_v35  ;;  %v3205_v35 = vld [vmem:[#allocation6 + $0x8] sm:$0xff] }
0x15c3   :  { %6187 = vmatprep.subr.bf16.mxu0 %v6842_v19  ;;  %v3206_v19 = vld [vmem:[#allocation6 + $0x10] sm:$0xff] }
0x15c6   :  { %6189 = vmatpush3.bf16.msra.mxu0 %v6844_v63 }
0x15c7   :  { %6191 = vmatprep.subr.bf16.mxu0 %v6848_v54 }
0x15ca   :  { %6193 = vmatpush3.bf16.msra.mxu0 %v6850_v36  ;;  %v3204_v36 = vld [vmem:[#allocation6] sm:$0xff] }
0x15cb   :  { %6195 = vmatprep.subr.bf16.mxu0 %v6854_v43  ;;  %v6203_v63 = vpack.c.bf16 %v3205_v35, %v3204_v36  ;;  %v3208_v43 = vld [vmem:[#allocation6 + $0x20] sm:$0xff] }
0x15ce   :  { %6197 = vmatpush3.bf16.msra.mxu0 %v6856_v7  ;;  %v3207_v7 = vld [vmem:[#allocation6 + $0x18] sm:$0xff] }
0x15cf   :  { %6199 = vmatprep.subr.bf16.mxu0 %v6858_v51  ;;  %v6206_v54 = vpack.c.bf16 %v3207_v7, %v3206_v19  ;;  %v3209_v51 = vld [vmem:[#allocation6 + $0x28] sm:$0xff] }
0x15d2   :  { %6201 = vmatpush3.bf16.msra.mxu0 %v6862_v37  ;;  %v6209_v37 = vpack.c.bf16 %v3209_v51, %v3208_v43 }
0x1688   :  { %v4505_v1 = vpop.f32.mrb[44].mxu0 }
0x1689   :  { %v4506_v20 = vpop.f32.mrb[45].mxu0 }
0x168a   :  { %v4507_v12 = vadd.f32 %v4506_v20, %v4505_v1 }
0x168c   :  { %v3058_v61 = vadd.f32 %v7238_v38, %v4507_v12  ;;  %v6212_v38 = vpack.c.bf16 %v3211_v18, %v3210_v62 }
0x168e   :  { %6308 = vtanh.f32 %v3058_v61 }
0x1698   :  { %v6309_v42 = vpop.eup %6308 }
0x1699   :  { %3127 = vmatmul.mubr.f32.vlgmr.msra.gmra.mrb[38].mxu1 %v6309_v42 }
0x169a   :  { %4951 = vmatprep.mubr.msk.f32.mxu1 %vm6395_vm0, %v7705_v47  ;;  %6204 = vmatpush3.bf16.msra.mxu1 %v6203_v63 }
0x169b   :  { %6205 = vmatprep.subr.bf16.mxu1 %v7714_v48 }
0x169e   :  { %6207 = vmatpush3.bf16.msra.mxu1 %v6206_v54 }
0x169f   :  { %6208 = vmatprep.subr.bf16.mxu1 %v7714_v48 }
0x16a2   :  { %6210 = vmatpush3.bf16.msra.mxu1 %v6209_v37 }
0x16a3   :  { %6211 = vmatprep.subr.bf16.mxu1 %v7714_v48 }
0x16a6   :  { %6213 = vmatpush3.bf16.msra.mxu1 %v6212_v38 }
0x16a7   :  { %6214 = vmatprep.subr.bf16.mxu1 %v7714_v48 }
0x16aa   :  { %6216 = vmatpush3.bf16.msra.mxu1 %v6215_v58 }
0x16ab   :  { %6217 = vmatprep.subr.bf16.mxu1 %v7714_v48 }
0x16ae   :  { %6219 = vmatpush3.bf16.msra.mxu1 %v6218_v13 }
0x16af   :  { %6220 = vmatprep.subr.bf16.mxu1 %v7714_v48 }
0x16b2   :  { %6222 = vmatpush3.bf16.msra.mxu1 %v6221_v44 }
0x16b3   :  { %6223 = vmatprep.subr.bf16.mxu1 %v7714_v48 }
0x176c   :  { %v4540_v47 = vpop.f32.mrb[38].mxu1 }
0x176d   :  { %v4541_v34 = vpop.f32.mrb[39].mxu1 }
0x176e   :  { %v4542_v40 = vadd.f32 %v4541_v34, %v4540_v47 }
0x1770   :  { %v3129_v46 = vadd.f32 %v7865_v28, %v4542_v40  ;;  %v3219_v28 = vld [vmem:[#allocation6 + $0x78] sm:$0xff] }
0x1771   :  { %v6224_v50 = vpack.c.bf16 %v3219_v28, %v3218_v30 }
0x1772   :  { %6310 = vtanh.f32 %v3129_v46 }
0x1773   :  { %6225 = vmatpush3.bf16.msra.mxu1 %v6224_v50 }
0x177c   :  { %v6311_v52 = vpop.eup %6310 }
0x177d   :  { %3198 = vmatmul.mubr.f32.vlgmr.msra.gmra.mrb[46].mxu0 %v6311_v52 }
0x1850   :  { %v4575_v8 = vpop.f32.mrb[46].mxu0 }
0x1851   :  { %v4576_v23 = vpop.f32.mrb[47].mxu0 }
0x1852   :  { %v4577_v25 = vadd.f32 %v4576_v23, %v4575_v8 }
0x1854   :  { %v3200_v49 = vadd.f32 %v7419_v32, %v4577_v25 }
0x1856   :  { %6312 = vtanh.f32 %v3200_v49 }
0x1860   :  { %v6313_v24 = vpop.eup %6312 }
0x1861   :  { %4952 = vmatmul.mubr.f32.vlgmr.msra.gmra.mrb[40].mxu1 %v6313_v24 }
0x1934   :  { %v3287_v45 = vpop.f32.mrb[40].mxu1 }
0x1935   :  { %v3288_v39 = vadd.f32 %v3287_v45, %v3220_v55  ;;  %v4953_v33 = vpop.f32.mrb[41].mxu1 }
0x1937   :  { %3291 = vst [vmem:[%s7556_s7] sm:$0xff] %v3288_v39 }
0x1938   :  { %3296 = vsyncpa [#allocation3], 1 }
0x1939   :  { %3297 = vsyncpa [#allocation5], 1 }

</bundles_post_ra>
